<compile_context>
chip_gen: v7x
topology: tpu7x:2x2x1
jax: 0.10.0
libtpu: 0.0.40
codegen_flags: <defaults>
</compile_context>

<pallas_src>
import numpy as np
import jax
import jax.numpy as jnp
from jax import lax
from jax.experimental import pallas as pl
from jax.experimental.pallas import tpu as pltpu

D = 8                       # matrix dimension d
M = D * (D - 1) // 2        # = 28, length of S_vec
SCALE_POW = 8               # expm(S) = (expm(S / 2^8))^(2^8); ||S||/256 << 1 for these inputs

_IU = np.triu_indices(D, k=1)   # row-major, same order as torch.triu_indices(d, d, offset=1)
_PAIR_INDEX = {(int(i), int(j)): m for m, (i, j) in enumerate(zip(_IU[0], _IU[1]))}


def _round_up(x, m):
    return (x + m - 1) // m * m


def _bmm(a, b):
    """Lane-batched 8x8 matmul: c[i,k,:] = sum_j a[i,j,:] * b[j,k,:].

    Pure VPU multiply-adds over (D, D, Bt) slabs; avoids driving the MXU with
    tiny 8x8 operands (worst on the 256-wide v6e/v7x arrays)."""
    c = a[:, 0:1, :] * b[0:1, :, :]
    for j in range(1, D):
        c = c + a[:, j:j + 1, :] * b[j:j + 1, :, :]
    return c


def _expm_kernel(sv_ref, o_ref):
    # sv_ref: (M, Bt)  strict-upper-triangle entries, batch in lanes
    # o_ref : (D, D, Bt) expm(S), batch in lanes
    Bt = o_ref.shape[-1]

    # Build the *scaled* skew-symmetric A = S / 2^SCALE_POW directly from the packed
    # vector; the 2^-SCALE_POW factor is folded into this single multiply.
    svs = sv_ref[...] * np.float32(1.0 / (2.0 ** SCALE_POW))     # (M, Bt)
    nsvs = -svs
    zero_row = jnp.zeros((1, Bt), jnp.float32)
    rows = []
    for i in range(D):
        cols = []
        for j in range(D):
            if i == j:
                cols.append(zero_row)
            elif i < j:
                cols.append(nsvs[_PAIR_INDEX[(i, j)]:_PAIR_INDEX[(i, j)] + 1, :])  # S[i,j] = -v
            else:
                cols.append(svs[_PAIR_INDEX[(j, i)]:_PAIR_INDEX[(j, i)] + 1, :])   # S[i,j] = +v
        rows.append(jnp.concatenate(cols, axis=0))               # (D, Bt): row i
    A = jnp.stack(rows, axis=0)                                   # (D, D, Bt)

    # Lane-dense identity (no broadcast of a lane-sparse 8x8 eye).
    eye = (lax.broadcasted_iota(jnp.int32, (D, D, Bt), 0) ==
           lax.broadcasted_iota(jnp.int32, (D, D, Bt), 1)).astype(jnp.float32)

    # Order-6 Taylor polynomial of expm(A), Paterson-Stockmeyer: 3 matmuls.
    A2 = _bmm(A, A)
    A3 = _bmm(A2, A)
    U = eye + A + A2 * (1.0 / 2.0) + A3 * (1.0 / 6.0)
    W = A * (1.0 / 24.0) + A2 * (1.0 / 120.0) + A3 * (1.0 / 720.0)
    P = U + _bmm(A3, W)

    # Undo the scaling by repeated squaring: 8 more lane-batched matmuls.
    for _ in range(SCALE_POW):
        P = _bmm(P, P)

    o_ref[...] = P.astype(o_ref.dtype)


def skew_sym_matrix_exp(S_vec, d=D, block_b=1024):
    """Pallas implementation of SkewSymMatrixExpLegacy.forward (return_grad=False)."""
    assert d == D
    B = S_vec.shape[0]

    # Lane-dense tiling: batch on the lane axis, tiles of up to `block_b` matrices
    # (a 1024-matrix tile is ~256 KB -> fine even for v7x's 64 MiB VMEM), ragged
    # batches handled by zero-padding (exp(0)=I on the pad, sliced off below).
    block_b = max(128, min(_round_up(block_b, 128), _round_up(B, 128)))
    B_pad = _round_up(B, block_b)
    sv_t = jnp.pad(S_vec.astype(jnp.float32).T, ((0, 0), (0, B_pad - B)))   # (M, B_pad)

    out = pl.pallas_call(
        _expm_kernel,
        out_shape=jax.ShapeDtypeStruct((D, D, B_pad), jnp.float32),
        grid_spec=pltpu.PrefetchScalarGridSpec(
            num_scalar_prefetch=0,
            grid=(B_pad // block_b,),
            in_specs=[pl.BlockSpec((M, block_b), lambda i: (0, i))],
            out_specs=pl.BlockSpec((D, D, block_b), lambda i: (0, 0, i)),
        ),
        compiler_params=pltpu.CompilerParams(
            dimension_semantics=("parallel",)),   # batch grid shards across v7x TCs
    )(sv_t)

    # Layout plumbing back to the module's (B, d, d) convention.
    return jnp.transpose(out, (2, 0, 1))[:B]


if __name__ == "__main__":
    B = 8
    key = jax.random.PRNGKey(0)
    S_vec = jax.random.normal(key, (B, M), dtype=jnp.float32)

    out = skew_sym_matrix_exp(S_vec)
    out = jax.block_until_ready(out)

    # Reference: mirror the PyTorch eigh-based path in numpy (complex128).
    sv = np.asarray(S_vec, dtype=np.float64)
    iu = np.triu_indices(D, k=1)
    S_ref = np.zeros((B, D, D), dtype=np.float64)
    S_ref[:, iu[0], iu[1]] = -sv
    S_ref[:, iu[1], iu[0]] = sv
    w, V = np.linalg.eigh(1j * S_ref)          # Hermitian: i*S
    Dvals = w / 1j
    exp_D = np.exp(Dvals)
    ref = np.real((V * exp_D[..., None, :]) @ np.conj(np.swapaxes(V, -1, -2)))

    err = float(np.max(np.abs(np.asarray(out, dtype=np.float64) - ref)))
    assert np.allclose(np.asarray(out), ref, atol=1e-4, rtol=1e-3), f"max abs err {err}"
    assert out.shape == (B, D, D) and out.dtype == jnp.float32

    print("KERNEL_OK")
</pallas_src>

<mosaic_0001>
module attributes {stable_mosaic.version = 11 : i64} {
  func.func @_expm_kernel(%arg0: i32, %arg1: memref<28x128xf32, #tpu.memory_space<vmem>>, %arg2: memref<8x8x128xf32, #tpu.memory_space<vmem>>) attributes {dimension_semantics = [#tpu.dimension_semantics<parallel>], iteration_bounds = array<i64: 1>, scalar_prefetch = 0 : i64, scratch_operands = 0 : i64, tpu.core_type = #tpu.core_type<tc>, window_params = [{transform_indices = @transform_0, window_bounds = array<i64: 28, 128>}, {transform_indices = @transform_1, window_bounds = array<i64: 8, 8, 128>}]} {
    %c0 = arith.constant 0 : index
    %c0_0 = arith.constant 0 : index
    %0 = vector.load %arg1[%c0, %c0_0] : memref<28x128xf32, #tpu.memory_space<vmem>>, vector<28x128xf32>
    %cst = arith.constant 3.906250e-03 : f32
    %1 = vector.broadcast %cst : f32 to vector<28x128xf32>
    %2 = arith.mulf %0, %1 : vector<28x128xf32>
    %cst_1 = arith.constant 0.000000e+00 : f32
    %3 = vector.broadcast %cst_1 : f32 to vector<28x128xf32>
    %4 = arith.subf %3, %2 : vector<28x128xf32>
    %cst_2 = arith.constant 0.000000e+00 : f32
    %5 = vector.broadcast %cst_2 : f32 to vector<1x128xf32>
    %6 = vector.extract_strided_slice %4 {offsets = [0, 0], sizes = [1, 128], strides = [1, 1]} : vector<28x128xf32> to vector<1x128xf32>
    %7 = vector.extract_strided_slice %4 {offsets = [1, 0], sizes = [1, 128], strides = [1, 1]} : vector<28x128xf32> to vector<1x128xf32>
    %8 = vector.extract_strided_slice %4 {offsets = [2, 0], sizes = [1, 128], strides = [1, 1]} : vector<28x128xf32> to vector<1x128xf32>
    %9 = vector.extract_strided_slice %4 {offsets = [3, 0], sizes = [1, 128], strides = [1, 1]} : vector<28x128xf32> to vector<1x128xf32>
    %10 = vector.extract_strided_slice %4 {offsets = [4, 0], sizes = [1, 128], strides = [1, 1]} : vector<28x128xf32> to vector<1x128xf32>
    %11 = vector.extract_strided_slice %4 {offsets = [5, 0], sizes = [1, 128], strides = [1, 1]} : vector<28x128xf32> to vector<1x128xf32>
    %12 = vector.extract_strided_slice %4 {offsets = [6, 0], sizes = [1, 128], strides = [1, 1]} : vector<28x128xf32> to vector<1x128xf32>
    %13 = tpu.concatenate %5, %6, %7, %8, %9, %10, %11, %12 in 0 : vector<1x128xf32>, vector<1x128xf32>, vector<1x128xf32>, vector<1x128xf32>, vector<1x128xf32>, vector<1x128xf32>, vector<1x128xf32>, vector<1x128xf32> -> vector<8x128xf32>
    %14 = vector.extract_strided_slice %2 {offsets = [0, 0], sizes = [1, 128], strides = [1, 1]} : vector<28x128xf32> to vector<1x128xf32>
    %15 = vector.extract_strided_slice %4 {offsets = [7, 0], sizes = [1, 128], strides = [1, 1]} : vector<28x128xf32> to vector<1x128xf32>
    %16 = vector.extract_strided_slice %4 {offsets = [8, 0], sizes = [1, 128], strides = [1, 1]} : vector<28x128xf32> to vector<1x128xf32>
    %17 = vector.extract_strided_slice %4 {offsets = [9, 0], sizes = [1, 128], strides = [1, 1]} : vector<28x128xf32> to vector<1x128xf32>
    %18 = vector.extract_strided_slice %4 {offsets = [10, 0], sizes = [1, 128], strides = [1, 1]} : vector<28x128xf32> to vector<1x128xf32>
    %19 = vector.extract_strided_slice %4 {offsets = [11, 0], sizes = [1, 128], strides = [1, 1]} : vector<28x128xf32> to vector<1x128xf32>
    %20 = vector.extract_strided_slice %4 {offsets = [12, 0], sizes = [1, 128], strides = [1, 1]} : vector<28x128xf32> to vector<1x128xf32>
    %21 = tpu.concatenate %14, %5, %15, %16, %17, %18, %19, %20 in 0 : vector<1x128xf32>, vector<1x128xf32>, vector<1x128xf32>, vector<1x128xf32>, vector<1x128xf32>, vector<1x128xf32>, vector<1x128xf32>, vector<1x128xf32> -> vector<8x128xf32>
    %22 = vector.extract_strided_slice %2 {offsets = [1, 0], sizes = [1, 128], strides = [1, 1]} : vector<28x128xf32> to vector<1x128xf32>
    %23 = vector.extract_strided_slice %2 {offsets = [7, 0], sizes = [1, 128], strides = [1, 1]} : vector<28x128xf32> to vector<1x128xf32>
    %24 = vector.extract_strided_slice %4 {offsets = [13, 0], sizes = [1, 128], strides = [1, 1]} : vector<28x128xf32> to vector<1x128xf32>
    %25 = vector.extract_strided_slice %4 {offsets = [14, 0], sizes = [1, 128], strides = [1, 1]} : vector<28x128xf32> to vector<1x128xf32>
    %26 = vector.extract_strided_slice %4 {offsets = [15, 0], sizes = [1, 128], strides = [1, 1]} : vector<28x128xf32> to vector<1x128xf32>
    %27 = vector.extract_strided_slice %4 {offsets = [16, 0], sizes = [1, 128], strides = [1, 1]} : vector<28x128xf32> to vector<1x128xf32>
    %28 = vector.extract_strided_slice %4 {offsets = [17, 0], sizes = [1, 128], strides = [1, 1]} : vector<28x128xf32> to vector<1x128xf32>
    %29 = tpu.concatenate %22, %23, %5, %24, %25, %26, %27, %28 in 0 : vector<1x128xf32>, vector<1x128xf32>, vector<1x128xf32>, vector<1x128xf32>, vector<1x128xf32>, vector<1x128xf32>, vector<1x128xf32>, vector<1x128xf32> -> vector<8x128xf32>
    %30 = vector.extract_strided_slice %2 {offsets = [2, 0], sizes = [1, 128], strides = [1, 1]} : vector<28x128xf32> to vector<1x128xf32>
    %31 = vector.extract_strided_slice %2 {offsets = [8, 0], sizes = [1, 128], strides = [1, 1]} : vector<28x128xf32> to vector<1x128xf32>
    %32 = vector.extract_strided_slice %2 {offsets = [13, 0], sizes = [1, 128], strides = [1, 1]} : vector<28x128xf32> to vector<1x128xf32>
    %33 = vector.extract_strided_slice %4 {offsets = [18, 0], sizes = [1, 128], strides = [1, 1]} : vector<28x128xf32> to vector<1x128xf32>
    %34 = vector.extract_strided_slice %4 {offsets = [19, 0], sizes = [1, 128], strides = [1, 1]} : vector<28x128xf32> to vector<1x128xf32>
    %35 = vector.extract_strided_slice %4 {offsets = [20, 0], sizes = [1, 128], strides = [1, 1]} : vector<28x128xf32> to vector<1x128xf32>
    %36 = vector.extract_strided_slice %4 {offsets = [21, 0], sizes = [1, 128], strides = [1, 1]} : vector<28x128xf32> to vector<1x128xf32>
    %37 = tpu.concatenate %30, %31, %32, %5, %33, %34, %35, %36 in 0 : vector<1x128xf32>, vector<1x128xf32>, vector<1x128xf32>, vector<1x128xf32>, vector<1x128xf32>, vector<1x128xf32>, vector<1x128xf32>, vector<1x128xf32> -> vector<8x128xf32>
    %38 = vector.extract_strided_slice %2 {offsets = [3, 0], sizes = [1, 128], strides = [1, 1]} : vector<28x128xf32> to vector<1x128xf32>
    %39 = vector.extract_strided_slice %2 {offsets = [9, 0], sizes = [1, 128], strides = [1, 1]} : vector<28x128xf32> to vector<1x128xf32>
    %40 = vector.extract_strided_slice %2 {offsets = [14, 0], sizes = [1, 128], strides = [1, 1]} : vector<28x128xf32> to vector<1x128xf32>
    %41 = vector.extract_strided_slice %2 {offsets = [18, 0], sizes = [1, 128], strides = [1, 1]} : vector<28x128xf32> to vector<1x128xf32>
    %42 = vector.extract_strided_slice %4 {offsets = [22, 0], sizes = [1, 128], strides = [1, 1]} : vector<28x128xf32> to vector<1x128xf32>
    %43 = vector.extract_strided_slice %4 {offsets = [23, 0], sizes = [1, 128], strides = [1, 1]} : vector<28x128xf32> to vector<1x128xf32>
    %44 = vector.extract_strided_slice %4 {offsets = [24, 0], sizes = [1, 128], strides = [1, 1]} : vector<28x128xf32> to vector<1x128xf32>
    %45 = tpu.concatenate %38, %39, %40, %41, %5, %42, %43, %44 in 0 : vector<1x128xf32>, vector<1x128xf32>, vector<1x128xf32>, vector<1x128xf32>, vector<1x128xf32>, vector<1x128xf32>, vector<1x128xf32>, vector<1x128xf32> -> vector<8x128xf32>
    %46 = vector.extract_strided_slice %2 {offsets = [4, 0], sizes = [1, 128], strides = [1, 1]} : vector<28x128xf32> to vector<1x128xf32>
    %47 = vector.extract_strided_slice %2 {offsets = [10, 0], sizes = [1, 128], strides = [1, 1]} : vector<28x128xf32> to vector<1x128xf32>
    %48 = vector.extract_strided_slice %2 {offsets = [15, 0], sizes = [1, 128], strides = [1, 1]} : vector<28x128xf32> to vector<1x128xf32>
    %49 = vector.extract_strided_slice %2 {offsets = [19, 0], sizes = [1, 128], strides = [1, 1]} : vector<28x128xf32> to vector<1x128xf32>
    %50 = vector.extract_strided_slice %2 {offsets = [22, 0], sizes = [1, 128], strides = [1, 1]} : vector<28x128xf32> to vector<1x128xf32>
    %51 = vector.extract_strided_slice %4 {offsets = [25, 0], sizes = [1, 128], strides = [1, 1]} : vector<28x128xf32> to vector<1x128xf32>
    %52 = vector.extract_strided_slice %4 {offsets = [26, 0], sizes = [1, 128], strides = [1, 1]} : vector<28x128xf32> to vector<1x128xf32>
    %53 = tpu.concatenate %46, %47, %48, %49, %50, %5, %51, %52 in 0 : vector<1x128xf32>, vector<1x128xf32>, vector<1x128xf32>, vector<1x128xf32>, vector<1x128xf32>, vector<1x128xf32>, vector<1x128xf32>, vector<1x128xf32> -> vector<8x128xf32>
    %54 = vector.extract_strided_slice %2 {offsets = [5, 0], sizes = [1, 128], strides = [1, 1]} : vector<28x128xf32> to vector<1x128xf32>
    %55 = vector.extract_strided_slice %2 {offsets = [11, 0], sizes = [1, 128], strides = [1, 1]} : vector<28x128xf32> to vector<1x128xf32>
    %56 = vector.extract_strided_slice %2 {offsets = [16, 0], sizes = [1, 128], strides = [1, 1]} : vector<28x128xf32> to vector<1x128xf32>
    %57 = vector.extract_strided_slice %2 {offsets = [20, 0], sizes = [1, 128], strides = [1, 1]} : vector<28x128xf32> to vector<1x128xf32>
    %58 = vector.extract_strided_slice %2 {offsets = [23, 0], sizes = [1, 128], strides = [1, 1]} : vector<28x128xf32> to vector<1x128xf32>
    %59 = vector.extract_strided_slice %2 {offsets = [25, 0], sizes = [1, 128], strides = [1, 1]} : vector<28x128xf32> to vector<1x128xf32>
    %60 = vector.extract_strided_slice %4 {offsets = [27, 0], sizes = [1, 128], strides = [1, 1]} : vector<28x128xf32> to vector<1x128xf32>
    %61 = tpu.concatenate %54, %55, %56, %57, %58, %59, %5, %60 in 0 : vector<1x128xf32>, vector<1x128xf32>, vector<1x128xf32>, vector<1x128xf32>, vector<1x128xf32>, vector<1x128xf32>, vector<1x128xf32>, vector<1x128xf32> -> vector<8x128xf32>
    %62 = vector.extract_strided_slice %2 {offsets = [6, 0], sizes = [1, 128], strides = [1, 1]} : vector<28x128xf32> to vector<1x128xf32>
    %63 = vector.extract_strided_slice %2 {offsets = [12, 0], sizes = [1, 128], strides = [1, 1]} : vector<28x128xf32> to vector<1x128xf32>
    %64 = vector.extract_strided_slice %2 {offsets = [17, 0], sizes = [1, 128], strides = [1, 1]} : vector<28x128xf32> to vector<1x128xf32>
    %65 = vector.extract_strided_slice %2 {offsets = [21, 0], sizes = [1, 128], strides = [1, 1]} : vector<28x128xf32> to vector<1x128xf32>
    %66 = vector.extract_strided_slice %2 {offsets = [24, 0], sizes = [1, 128], strides = [1, 1]} : vector<28x128xf32> to vector<1x128xf32>
    %67 = vector.extract_strided_slice %2 {offsets = [26, 0], sizes = [1, 128], strides = [1, 1]} : vector<28x128xf32> to vector<1x128xf32>
    %68 = vector.extract_strided_slice %2 {offsets = [27, 0], sizes = [1, 128], strides = [1, 1]} : vector<28x128xf32> to vector<1x128xf32>
    %69 = tpu.concatenate %62, %63, %64, %65, %66, %67, %68, %5 in 0 : vector<1x128xf32>, vector<1x128xf32>, vector<1x128xf32>, vector<1x128xf32>, vector<1x128xf32>, vector<1x128xf32>, vector<1x128xf32>, vector<1x128xf32> -> vector<8x128xf32>
    %70 = vector.shape_cast %13 : vector<8x128xf32> to vector<1x8x128xf32>
    %71 = vector.shape_cast %21 : vector<8x128xf32> to vector<1x8x128xf32>
    %72 = vector.shape_cast %29 : vector<8x128xf32> to vector<1x8x128xf32>
    %73 = vector.shape_cast %37 : vector<8x128xf32> to vector<1x8x128xf32>
    %74 = vector.shape_cast %45 : vector<8x128xf32> to vector<1x8x128xf32>
    %75 = vector.shape_cast %53 : vector<8x128xf32> to vector<1x8x128xf32>
    %76 = vector.shape_cast %61 : vector<8x128xf32> to vector<1x8x128xf32>
    %77 = vector.shape_cast %69 : vector<8x128xf32> to vector<1x8x128xf32>
    %78 = tpu.concatenate %70, %71, %72, %73, %74, %75, %76, %77 in 0 : vector<1x8x128xf32>, vector<1x8x128xf32>, vector<1x8x128xf32>, vector<1x8x128xf32>, vector<1x8x128xf32>, vector<1x8x128xf32>, vector<1x8x128xf32>, vector<1x8x128xf32> -> vector<8x8x128xf32>
    %79 = tpu.iota {dimensions = array<i32: 0>} : vector<8x8x128xi32>
    %80 = tpu.iota {dimensions = array<i32: 1>} : vector<8x8x128xi32>
    %81 = arith.cmpi eq, %79, %80 : vector<8x8x128xi32>
    %82 = arith.extui %81 : vector<8x8x128xi1> to vector<8x8x128xi32>
    %83 = arith.sitofp %82 : vector<8x8x128xi32> to vector<8x8x128xf32>
    %84 = vector.extract_strided_slice %78 {offsets = [0, 0, 0], sizes = [8, 1, 128], strides = [1, 1, 1]} : vector<8x8x128xf32> to vector<8x1x128xf32>
    %85 = vector.extract_strided_slice %78 {offsets = [0, 0, 0], sizes = [1, 8, 128], strides = [1, 1, 1]} : vector<8x8x128xf32> to vector<1x8x128xf32>
    %86 = vector.broadcast %84 : vector<8x1x128xf32> to vector<8x8x128xf32>
    %87 = vector.broadcast %85 : vector<1x8x128xf32> to vector<8x8x128xf32>
    %88 = arith.mulf %86, %87 : vector<8x8x128xf32>
    %89 = vector.extract_strided_slice %78 {offsets = [0, 1, 0], sizes = [8, 1, 128], strides = [1, 1, 1]} : vector<8x8x128xf32> to vector<8x1x128xf32>
    %90 = vector.extract_strided_slice %78 {offsets = [1, 0, 0], sizes = [1, 8, 128], strides = [1, 1, 1]} : vector<8x8x128xf32> to vector<1x8x128xf32>
    %91 = vector.broadcast %89 : vector<8x1x128xf32> to vector<8x8x128xf32>
    %92 = vector.broadcast %90 : vector<1x8x128xf32> to vector<8x8x128xf32>
    %93 = arith.mulf %91, %92 : vector<8x8x128xf32>
    %94 = arith.addf %88, %93 : vector<8x8x128xf32>
    %95 = vector.extract_strided_slice %78 {offsets = [0, 2, 0], sizes = [8, 1, 128], strides = [1, 1, 1]} : vector<8x8x128xf32> to vector<8x1x128xf32>
    %96 = vector.extract_strided_slice %78 {offsets = [2, 0, 0], sizes = [1, 8, 128], strides = [1, 1, 1]} : vector<8x8x128xf32> to vector<1x8x128xf32>
    %97 = vector.broadcast %95 : vector<8x1x128xf32> to vector<8x8x128xf32>
    %98 = vector.broadcast %96 : vector<1x8x128xf32> to vector<8x8x128xf32>
    %99 = arith.mulf %97, %98 : vector<8x8x128xf32>
    %100 = arith.addf %94, %99 : vector<8x8x128xf32>
    %101 = vector.extract_strided_slice %78 {offsets = [0, 3, 0], sizes = [8, 1, 128], strides = [1, 1, 1]} : vector<8x8x128xf32> to vector<8x1x128xf32>
    %102 = vector.extract_strided_slice %78 {offsets = [3, 0, 0], sizes = [1, 8, 128], strides = [1, 1, 1]} : vector<8x8x128xf32> to vector<1x8x128xf32>
    %103 = vector.broadcast %101 : vector<8x1x128xf32> to vector<8x8x128xf32>
    %104 = vector.broadcast %102 : vector<1x8x128xf32> to vector<8x8x128xf32>
    %105 = arith.mulf %103, %104 : vector<8x8x128xf32>
    %106 = arith.addf %100, %105 : vector<8x8x128xf32>
    %107 = vector.extract_strided_slice %78 {offsets = [0, 4, 0], sizes = [8, 1, 128], strides = [1, 1, 1]} : vector<8x8x128xf32> to vector<8x1x128xf32>
    %108 = vector.extract_strided_slice %78 {offsets = [4, 0, 0], sizes = [1, 8, 128], strides = [1, 1, 1]} : vector<8x8x128xf32> to vector<1x8x128xf32>
    %109 = vector.broadcast %107 : vector<8x1x128xf32> to vector<8x8x128xf32>
    %110 = vector.broadcast %108 : vector<1x8x128xf32> to vector<8x8x128xf32>
    %111 = arith.mulf %109, %110 : vector<8x8x128xf32>
    %112 = arith.addf %106, %111 : vector<8x8x128xf32>
    %113 = vector.extract_strided_slice %78 {offsets = [0, 5, 0], sizes = [8, 1, 128], strides = [1, 1, 1]} : vector<8x8x128xf32> to vector<8x1x128xf32>
    %114 = vector.extract_strided_slice %78 {offsets = [5, 0, 0], sizes = [1, 8, 128], strides = [1, 1, 1]} : vector<8x8x128xf32> to vector<1x8x128xf32>
    %115 = vector.broadcast %113 : vector<8x1x128xf32> to vector<8x8x128xf32>
    %116 = vector.broadcast %114 : vector<1x8x128xf32> to vector<8x8x128xf32>
    %117 = arith.mulf %115, %116 : vector<8x8x128xf32>
    %118 = arith.addf %112, %117 : vector<8x8x128xf32>
    %119 = vector.extract_strided_slice %78 {offsets = [0, 6, 0], sizes = [8, 1, 128], strides = [1, 1, 1]} : vector<8x8x128xf32> to vector<8x1x128xf32>
    %120 = vector.extract_strided_slice %78 {offsets = [6, 0, 0], sizes = [1, 8, 128], strides = [1, 1, 1]} : vector<8x8x128xf32> to vector<1x8x128xf32>
    %121 = vector.broadcast %119 : vector<8x1x128xf32> to vector<8x8x128xf32>
    %122 = vector.broadcast %120 : vector<1x8x128xf32> to vector<8x8x128xf32>
    %123 = arith.mulf %121, %122 : vector<8x8x128xf32>
    %124 = arith.addf %118, %123 : vector<8x8x128xf32>
    %125 = vector.extract_strided_slice %78 {offsets = [0, 7, 0], sizes = [8, 1, 128], strides = [1, 1, 1]} : vector<8x8x128xf32> to vector<8x1x128xf32>
    %126 = vector.extract_strided_slice %78 {offsets = [7, 0, 0], sizes = [1, 8, 128], strides = [1, 1, 1]} : vector<8x8x128xf32> to vector<1x8x128xf32>
    %127 = vector.broadcast %125 : vector<8x1x128xf32> to vector<8x8x128xf32>
    %128 = vector.broadcast %126 : vector<1x8x128xf32> to vector<8x8x128xf32>
    %129 = arith.mulf %127, %128 : vector<8x8x128xf32>
    %130 = arith.addf %124, %129 : vector<8x8x128xf32>
    %131 = vector.extract_strided_slice %130 {offsets = [0, 0, 0], sizes = [8, 1, 128], strides = [1, 1, 1]} : vector<8x8x128xf32> to vector<8x1x128xf32>
    %132 = vector.extract_strided_slice %78 {offsets = [0, 0, 0], sizes = [1, 8, 128], strides = [1, 1, 1]} : vector<8x8x128xf32> to vector<1x8x128xf32>
    %133 = vector.broadcast %131 : vector<8x1x128xf32> to vector<8x8x128xf32>
    %134 = vector.broadcast %132 : vector<1x8x128xf32> to vector<8x8x128xf32>
    %135 = arith.mulf %133, %134 : vector<8x8x128xf32>
    %136 = vector.extract_strided_slice %130 {offsets = [0, 1, 0], sizes = [8, 1, 128], strides = [1, 1, 1]} : vector<8x8x128xf32> to vector<8x1x128xf32>
    %137 = vector.extract_strided_slice %78 {offsets = [1, 0, 0], sizes = [1, 8, 128], strides = [1, 1, 1]} : vector<8x8x128xf32> to vector<1x8x128xf32>
    %138 = vector.broadcast %136 : vector<8x1x128xf32> to vector<8x8x128xf32>
    %139 = vector.broadcast %137 : vector<1x8x128xf32> to vector<8x8x128xf32>
    %140 = arith.mulf %138, %139 : vector<8x8x128xf32>
    %141 = arith.addf %135, %140 : vector<8x8x128xf32>
    %142 = vector.extract_strided_slice %130 {offsets = [0, 2, 0], sizes = [8, 1, 128], strides = [1, 1, 1]} : vector<8x8x128xf32> to vector<8x1x128xf32>
    %143 = vector.extract_strided_slice %78 {offsets = [2, 0, 0], sizes = [1, 8, 128], strides = [1, 1, 1]} : vector<8x8x128xf32> to vector<1x8x128xf32>
    %144 = vector.broadcast %142 : vector<8x1x128xf32> to vector<8x8x128xf32>
    %145 = vector.broadcast %143 : vector<1x8x128xf32> to vector<8x8x128xf32>
    %146 = arith.mulf %144, %145 : vector<8x8x128xf32>
    %147 = arith.addf %141, %146 : vector<8x8x128xf32>
    %148 = vector.extract_strided_slice %130 {offsets = [0, 3, 0], sizes = [8, 1, 128], strides = [1, 1, 1]} : vector<8x8x128xf32> to vector<8x1x128xf32>
    %149 = vector.extract_strided_slice %78 {offsets = [3, 0, 0], sizes = [1, 8, 128], strides = [1, 1, 1]} : vector<8x8x128xf32> to vector<1x8x128xf32>
    %150 = vector.broadcast %148 : vector<8x1x128xf32> to vector<8x8x128xf32>
    %151 = vector.broadcast %149 : vector<1x8x128xf32> to vector<8x8x128xf32>
    %152 = arith.mulf %150, %151 : vector<8x8x128xf32>
    %153 = arith.addf %147, %152 : vector<8x8x128xf32>
    %154 = vector.extract_strided_slice %130 {offsets = [0, 4, 0], sizes = [8, 1, 128], strides = [1, 1, 1]} : vector<8x8x128xf32> to vector<8x1x128xf32>
    %155 = vector.extract_strided_slice %78 {offsets = [4, 0, 0], sizes = [1, 8, 128], strides = [1, 1, 1]} : vector<8x8x128xf32> to vector<1x8x128xf32>
    %156 = vector.broadcast %154 : vector<8x1x128xf32> to vector<8x8x128xf32>
    %157 = vector.broadcast %155 : vector<1x8x128xf32> to vector<8x8x128xf32>
    %158 = arith.mulf %156, %157 : vector<8x8x128xf32>
    %159 = arith.addf %153, %158 : vector<8x8x128xf32>
    %160 = vector.extract_strided_slice %130 {offsets = [0, 5, 0], sizes = [8, 1, 128], strides = [1, 1, 1]} : vector<8x8x128xf32> to vector<8x1x128xf32>
    %161 = vector.extract_strided_slice %78 {offsets = [5, 0, 0], sizes = [1, 8, 128], strides = [1, 1, 1]} : vector<8x8x128xf32> to vector<1x8x128xf32>
    %162 = vector.broadcast %160 : vector<8x1x128xf32> to vector<8x8x128xf32>
    %163 = vector.broadcast %161 : vector<1x8x128xf32> to vector<8x8x128xf32>
    %164 = arith.mulf %162, %163 : vector<8x8x128xf32>
    %165 = arith.addf %159, %164 : vector<8x8x128xf32>
    %166 = vector.extract_strided_slice %130 {offsets = [0, 6, 0], sizes = [8, 1, 128], strides = [1, 1, 1]} : vector<8x8x128xf32> to vector<8x1x128xf32>
    %167 = vector.extract_strided_slice %78 {offsets = [6, 0, 0], sizes = [1, 8, 128], strides = [1, 1, 1]} : vector<8x8x128xf32> to vector<1x8x128xf32>
    %168 = vector.broadcast %166 : vector<8x1x128xf32> to vector<8x8x128xf32>
    %169 = vector.broadcast %167 : vector<1x8x128xf32> to vector<8x8x128xf32>
    %170 = arith.mulf %168, %169 : vector<8x8x128xf32>
    %171 = arith.addf %165, %170 : vector<8x8x128xf32>
    %172 = vector.extract_strided_slice %130 {offsets = [0, 7, 0], sizes = [8, 1, 128], strides = [1, 1, 1]} : vector<8x8x128xf32> to vector<8x1x128xf32>
    %173 = vector.extract_strided_slice %78 {offsets = [7, 0, 0], sizes = [1, 8, 128], strides = [1, 1, 1]} : vector<8x8x128xf32> to vector<1x8x128xf32>
    %174 = vector.broadcast %172 : vector<8x1x128xf32> to vector<8x8x128xf32>
    %175 = vector.broadcast %173 : vector<1x8x128xf32> to vector<8x8x128xf32>
    %176 = arith.mulf %174, %175 : vector<8x8x128xf32>
    %177 = arith.addf %171, %176 : vector<8x8x128xf32>
    %178 = arith.addf %83, %78 : vector<8x8x128xf32>
    %cst_3 = arith.constant 5.000000e-01 : f32
    %179 = vector.broadcast %cst_3 : f32 to vector<8x8x128xf32>
    %180 = arith.mulf %130, %179 : vector<8x8x128xf32>
    %181 = arith.addf %178, %180 : vector<8x8x128xf32>
    %cst_4 = arith.constant 0.166666672 : f32
    %182 = vector.broadcast %cst_4 : f32 to vector<8x8x128xf32>
    %183 = arith.mulf %177, %182 : vector<8x8x128xf32>
    %184 = arith.addf %181, %183 : vector<8x8x128xf32>
    %cst_5 = arith.constant 0.0416666679 : f32
    %185 = vector.broadcast %cst_5 : f32 to vector<8x8x128xf32>
    %186 = arith.mulf %78, %185 : vector<8x8x128xf32>
    %cst_6 = arith.constant 0.00833333377 : f32
    %187 = vector.broadcast %cst_6 : f32 to vector<8x8x128xf32>
    %188 = arith.mulf %130, %187 : vector<8x8x128xf32>
    %189 = arith.addf %186, %188 : vector<8x8x128xf32>
    %cst_7 = arith.constant 0.00138888892 : f32
    %190 = vector.broadcast %cst_7 : f32 to vector<8x8x128xf32>
    %191 = arith.mulf %177, %190 : vector<8x8x128xf32>
    %192 = arith.addf %189, %191 : vector<8x8x128xf32>
    %193 = vector.extract_strided_slice %177 {offsets = [0, 0, 0], sizes = [8, 1, 128], strides = [1, 1, 1]} : vector<8x8x128xf32> to vector<8x1x128xf32>
    %194 = vector.extract_strided_slice %192 {offsets = [0, 0, 0], sizes = [1, 8, 128], strides = [1, 1, 1]} : vector<8x8x128xf32> to vector<1x8x128xf32>
    %195 = vector.broadcast %193 : vector<8x1x128xf32> to vector<8x8x128xf32>
    %196 = vector.broadcast %194 : vector<1x8x128xf32> to vector<8x8x128xf32>
    %197 = arith.mulf %195, %196 : vector<8x8x128xf32>
    %198 = vector.extract_strided_slice %177 {offsets = [0, 1, 0], sizes = [8, 1, 128], strides = [1, 1, 1]} : vector<8x8x128xf32> to vector<8x1x128xf32>
    %199 = vector.extract_strided_slice %192 {offsets = [1, 0, 0], sizes = [1, 8, 128], strides = [1, 1, 1]} : vector<8x8x128xf32> to vector<1x8x128xf32>
    %200 = vector.broadcast %198 : vector<8x1x128xf32> to vector<8x8x128xf32>
    %201 = vector.broadcast %199 : vector<1x8x128xf32> to vector<8x8x128xf32>
    %202 = arith.mulf %200, %201 : vector<8x8x128xf32>
    %203 = arith.addf %197, %202 : vector<8x8x128xf32>
    %204 = vector.extract_strided_slice %177 {offsets = [0, 2, 0], sizes = [8, 1, 128], strides = [1, 1, 1]} : vector<8x8x128xf32> to vector<8x1x128xf32>
    %205 = vector.extract_strided_slice %192 {offsets = [2, 0, 0], sizes = [1, 8, 128], strides = [1, 1, 1]} : vector<8x8x128xf32> to vector<1x8x128xf32>
    %206 = vector.broadcast %204 : vector<8x1x128xf32> to vector<8x8x128xf32>
    %207 = vector.broadcast %205 : vector<1x8x128xf32> to vector<8x8x128xf32>
    %208 = arith.mulf %206, %207 : vector<8x8x128xf32>
    %209 = arith.addf %203, %208 : vector<8x8x128xf32>
    %210 = vector.extract_strided_slice %177 {offsets = [0, 3, 0], sizes = [8, 1, 128], strides = [1, 1, 1]} : vector<8x8x128xf32> to vector<8x1x128xf32>
    %211 = vector.extract_strided_slice %192 {offsets = [3, 0, 0], sizes = [1, 8, 128], strides = [1, 1, 1]} : vector<8x8x128xf32> to vector<1x8x128xf32>
    %212 = vector.broadcast %210 : vector<8x1x128xf32> to vector<8x8x128xf32>
    %213 = vector.broadcast %211 : vector<1x8x128xf32> to vector<8x8x128xf32>
    %214 = arith.mulf %212, %213 : vector<8x8x128xf32>
    %215 = arith.addf %209, %214 : vector<8x8x128xf32>
    %216 = vector.extract_strided_slice %177 {offsets = [0, 4, 0], sizes = [8, 1, 128], strides = [1, 1, 1]} : vector<8x8x128xf32> to vector<8x1x128xf32>
    %217 = vector.extract_strided_slice %192 {offsets = [4, 0, 0], sizes = [1, 8, 128], strides = [1, 1, 1]} : vector<8x8x128xf32> to vector<1x8x128xf32>
    %218 = vector.broadcast %216 : vector<8x1x128xf32> to vector<8x8x128xf32>
    %219 = vector.broadcast %217 : vector<1x8x128xf32> to vector<8x8x128xf32>
    %220 = arith.mulf %218, %219 : vector<8x8x128xf32>
    %221 = arith.addf %215, %220 : vector<8x8x128xf32>
    %222 = vector.extract_strided_slice %177 {offsets = [0, 5, 0], sizes = [8, 1, 128], strides = [1, 1, 1]} : vector<8x8x128xf32> to vector<8x1x128xf32>
    %223 = vector.extract_strided_slice %192 {offsets = [5, 0, 0], sizes = [1, 8, 128], strides = [1, 1, 1]} : vector<8x8x128xf32> to vector<1x8x128xf32>
    %224 = vector.broadcast %222 : vector<8x1x128xf32> to vector<8x8x128xf32>
    %225 = vector.broadcast %223 : vector<1x8x128xf32> to vector<8x8x128xf32>
    %226 = arith.mulf %224, %225 : vector<8x8x128xf32>
    %227 = arith.addf %221, %226 : vector<8x8x128xf32>
    %228 = vector.extract_strided_slice %177 {offsets = [0, 6, 0], sizes = [8, 1, 128], strides = [1, 1, 1]} : vector<8x8x128xf32> to vector<8x1x128xf32>
    %229 = vector.extract_strided_slice %192 {offsets = [6, 0, 0], sizes = [1, 8, 128], strides = [1, 1, 1]} : vector<8x8x128xf32> to vector<1x8x128xf32>
    %230 = vector.broadcast %228 : vector<8x1x128xf32> to vector<8x8x128xf32>
    %231 = vector.broadcast %229 : vector<1x8x128xf32> to vector<8x8x128xf32>
    %232 = arith.mulf %230, %231 : vector<8x8x128xf32>
    %233 = arith.addf %227, %232 : vector<8x8x128xf32>
    %234 = vector.extract_strided_slice %177 {offsets = [0, 7, 0], sizes = [8, 1, 128], strides = [1, 1, 1]} : vector<8x8x128xf32> to vector<8x1x128xf32>
    %235 = vector.extract_strided_slice %192 {offsets = [7, 0, 0], sizes = [1, 8, 128], strides = [1, 1, 1]} : vector<8x8x128xf32> to vector<1x8x128xf32>
    %236 = vector.broadcast %234 : vector<8x1x128xf32> to vector<8x8x128xf32>
    %237 = vector.broadcast %235 : vector<1x8x128xf32> to vector<8x8x128xf32>
    %238 = arith.mulf %236, %237 : vector<8x8x128xf32>
    %239 = arith.addf %233, %238 : vector<8x8x128xf32>
    %240 = arith.addf %184, %239 : vector<8x8x128xf32>
    %241 = vector.extract_strided_slice %240 {offsets = [0, 0, 0], sizes = [8, 1, 128], strides = [1, 1, 1]} : vector<8x8x128xf32> to vector<8x1x128xf32>
    %242 = vector.extract_strided_slice %240 {offsets = [0, 0, 0], sizes = [1, 8, 128], strides = [1, 1, 1]} : vector<8x8x128xf32> to vector<1x8x128xf32>
    %243 = vector.broadcast %241 : vector<8x1x128xf32> to vector<8x8x128xf32>
    %244 = vector.broadcast %242 : vector<1x8x128xf32> to vector<8x8x128xf32>
    %245 = arith.mulf %243, %244 : vector<8x8x128xf32>
    %246 = vector.extract_strided_slice %240 {offsets = [0, 1, 0], sizes = [8, 1, 128], strides = [1, 1, 1]} : vector<8x8x128xf32> to vector<8x1x128xf32>
    %247 = vector.extract_strided_slice %240 {offsets = [1, 0, 0], sizes = [1, 8, 128], strides = [1, 1, 1]} : vector<8x8x128xf32> to vector<1x8x128xf32>
    %248 = vector.broadcast %246 : vector<8x1x128xf32> to vector<8x8x128xf32>
    %249 = vector.broadcast %247 : vector<1x8x128xf32> to vector<8x8x128xf32>
    %250 = arith.mulf %248, %249 : vector<8x8x128xf32>
    %251 = arith.addf %245, %250 : vector<8x8x128xf32>
    %252 = vector.extract_strided_slice %240 {offsets = [0, 2, 0], sizes = [8, 1, 128], strides = [1, 1, 1]} : vector<8x8x128xf32> to vector<8x1x128xf32>
    %253 = vector.extract_strided_slice %240 {offsets = [2, 0, 0], sizes = [1, 8, 128], strides = [1, 1, 1]} : vector<8x8x128xf32> to vector<1x8x128xf32>
    %254 = vector.broadcast %252 : vector<8x1x128xf32> to vector<8x8x128xf32>
    %255 = vector.broadcast %253 : vector<1x8x128xf32> to vector<8x8x128xf32>
    %256 = arith.mulf %254, %255 : vector<8x8x128xf32>
    %257 = arith.addf %251, %256 : vector<8x8x128xf32>
    %258 = vector.extract_strided_slice %240 {offsets = [0, 3, 0], sizes = [8, 1, 128], strides = [1, 1, 1]} : vector<8x8x128xf32> to vector<8x1x128xf32>
    %259 = vector.extract_strided_slice %240 {offsets = [3, 0, 0], sizes = [1, 8, 128], strides = [1, 1, 1]} : vector<8x8x128xf32> to vector<1x8x128xf32>
    %260 = vector.broadcast %258 : vector<8x1x128xf32> to vector<8x8x128xf32>
    %261 = vector.broadcast %259 : vector<1x8x128xf32> to vector<8x8x128xf32>
    %262 = arith.mulf %260, %261 : vector<8x8x128xf32>
    %263 = arith.addf %257, %262 : vector<8x8x128xf32>
    %264 = vector.extract_strided_slice %240 {offsets = [0, 4, 0], sizes = [8, 1, 128], strides = [1, 1, 1]} : vector<8x8x128xf32> to vector<8x1x128xf32>
    %265 = vector.extract_strided_slice %240 {offsets = [4, 0, 0], sizes = [1, 8, 128], strides = [1, 1, 1]} : vector<8x8x128xf32> to vector<1x8x128xf32>
    %266 = vector.broadcast %264 : vector<8x1x128xf32> to vector<8x8x128xf32>
    %267 = vector.broadcast %265 : vector<1x8x128xf32> to vector<8x8x128xf32>
    %268 = arith.mulf %266, %267 : vector<8x8x128xf32>
    %269 = arith.addf %263, %268 : vector<8x8x128xf32>
    %270 = vector.extract_strided_slice %240 {offsets = [0, 5, 0], sizes = [8, 1, 128], strides = [1, 1, 1]} : vector<8x8x128xf32> to vector<8x1x128xf32>
    %271 = vector.extract_strided_slice %240 {offsets = [5, 0, 0], sizes = [1, 8, 128], strides = [1, 1, 1]} : vector<8x8x128xf32> to vector<1x8x128xf32>
    %272 = vector.broadcast %270 : vector<8x1x128xf32> to vector<8x8x128xf32>
    %273 = vector.broadcast %271 : vector<1x8x128xf32> to vector<8x8x128xf32>
    %274 = arith.mulf %272, %273 : vector<8x8x128xf32>
    %275 = arith.addf %269, %274 : vector<8x8x128xf32>
    %276 = vector.extract_strided_slice %240 {offsets = [0, 6, 0], sizes = [8, 1, 128], strides = [1, 1, 1]} : vector<8x8x128xf32> to vector<8x1x128xf32>
    %277 = vector.extract_strided_slice %240 {offsets = [6, 0, 0], sizes = [1, 8, 128], strides = [1, 1, 1]} : vector<8x8x128xf32> to vector<1x8x128xf32>
    %278 = vector.broadcast %276 : vector<8x1x128xf32> to vector<8x8x128xf32>
    %279 = vector.broadcast %277 : vector<1x8x128xf32> to vector<8x8x128xf32>
    %280 = arith.mulf %278, %279 : vector<8x8x128xf32>
    %281 = arith.addf %275, %280 : vector<8x8x128xf32>
    %282 = vector.extract_strided_slice %240 {offsets = [0, 7, 0], sizes = [8, 1, 128], strides = [1, 1, 1]} : vector<8x8x128xf32> to vector<8x1x128xf32>
    %283 = vector.extract_strided_slice %240 {offsets = [7, 0, 0], sizes = [1, 8, 128], strides = [1, 1, 1]} : vector<8x8x128xf32> to vector<1x8x128xf32>
    %284 = vector.broadcast %282 : vector<8x1x128xf32> to vector<8x8x128xf32>
    %285 = vector.broadcast %283 : vector<1x8x128xf32> to vector<8x8x128xf32>
    %286 = arith.mulf %284, %285 : vector<8x8x128xf32>
    %287 = arith.addf %281, %286 : vector<8x8x128xf32>
    %288 = vector.extract_strided_slice %287 {offsets = [0, 0, 0], sizes = [8, 1, 128], strides = [1, 1, 1]} : vector<8x8x128xf32> to vector<8x1x128xf32>
    %289 = vector.extract_strided_slice %287 {offsets = [0, 0, 0], sizes = [1, 8, 128], strides = [1, 1, 1]} : vector<8x8x128xf32> to vector<1x8x128xf32>
    %290 = vector.broadcast %288 : vector<8x1x128xf32> to vector<8x8x128xf32>
    %291 = vector.broadcast %289 : vector<1x8x128xf32> to vector<8x8x128xf32>
    %292 = arith.mulf %290, %291 : vector<8x8x128xf32>
    %293 = vector.extract_strided_slice %287 {offsets = [0, 1, 0], sizes = [8, 1, 128], strides = [1, 1, 1]} : vector<8x8x128xf32> to vector<8x1x128xf32>
    %294 = vector.extract_strided_slice %287 {offsets = [1, 0, 0], sizes = [1, 8, 128], strides = [1, 1, 1]} : vector<8x8x128xf32> to vector<1x8x128xf32>
    %295 = vector.broadcast %293 : vector<8x1x128xf32> to vector<8x8x128xf32>
    %296 = vector.broadcast %294 : vector<1x8x128xf32> to vector<8x8x128xf32>
    %297 = arith.mulf %295, %296 : vector<8x8x128xf32>
    %298 = arith.addf %292, %297 : vector<8x8x128xf32>
    %299 = vector.extract_strided_slice %287 {offsets = [0, 2, 0], sizes = [8, 1, 128], strides = [1, 1, 1]} : vector<8x8x128xf32> to vector<8x1x128xf32>
    %300 = vector.extract_strided_slice %287 {offsets = [2, 0, 0], sizes = [1, 8, 128], strides = [1, 1, 1]} : vector<8x8x128xf32> to vector<1x8x128xf32>
    %301 = vector.broadcast %299 : vector<8x1x128xf32> to vector<8x8x128xf32>
    %302 = vector.broadcast %300 : vector<1x8x128xf32> to vector<8x8x128xf32>
    %303 = arith.mulf %301, %302 : vector<8x8x128xf32>
    %304 = arith.addf %298, %303 : vector<8x8x128xf32>
    %305 = vector.extract_strided_slice %287 {offsets = [0, 3, 0], sizes = [8, 1, 128], strides = [1, 1, 1]} : vector<8x8x128xf32> to vector<8x1x128xf32>
    %306 = vector.extract_strided_slice %287 {offsets = [3, 0, 0], sizes = [1, 8, 128], strides = [1, 1, 1]} : vector<8x8x128xf32> to vector<1x8x128xf32>
    %307 = vector.broadcast %305 : vector<8x1x128xf32> to vector<8x8x128xf32>
    %308 = vector.broadcast %306 : vector<1x8x128xf32> to vector<8x8x128xf32>
    %309 = arith.mulf %307, %308 : vector<8x8x128xf32>
    %310 = arith.addf %304, %309 : vector<8x8x128xf32>
    %311 = vector.extract_strided_slice %287 {offsets = [0, 4, 0], sizes = [8, 1, 128], strides = [1, 1, 1]} : vector<8x8x128xf32> to vector<8x1x128xf32>
    %312 = vector.extract_strided_slice %287 {offsets = [4, 0, 0], sizes = [1, 8, 128], strides = [1, 1, 1]} : vector<8x8x128xf32> to vector<1x8x128xf32>
    %313 = vector.broadcast %311 : vector<8x1x128xf32> to vector<8x8x128xf32>
    %314 = vector.broadcast %312 : vector<1x8x128xf32> to vector<8x8x128xf32>
    %315 = arith.mulf %313, %314 : vector<8x8x128xf32>
    %316 = arith.addf %310, %315 : vector<8x8x128xf32>
    %317 = vector.extract_strided_slice %287 {offsets = [0, 5, 0], sizes = [8, 1, 128], strides = [1, 1, 1]} : vector<8x8x128xf32> to vector<8x1x128xf32>
    %318 = vector.extract_strided_slice %287 {offsets = [5, 0, 0], sizes = [1, 8, 128], strides = [1, 1, 1]} : vector<8x8x128xf32> to vector<1x8x128xf32>
    %319 = vector.broadcast %317 : vector<8x1x128xf32> to vector<8x8x128xf32>
    %320 = vector.broadcast %318 : vector<1x8x128xf32> to vector<8x8x128xf32>
    %321 = arith.mulf %319, %320 : vector<8x8x128xf32>
    %322 = arith.addf %316, %321 : vector<8x8x128xf32>
    %323 = vector.extract_strided_slice %287 {offsets = [0, 6, 0], sizes = [8, 1, 128], strides = [1, 1, 1]} : vector<8x8x128xf32> to vector<8x1x128xf32>
    %324 = vector.extract_strided_slice %287 {offsets = [6, 0, 0], sizes = [1, 8, 128], strides = [1, 1, 1]} : vector<8x8x128xf32> to vector<1x8x128xf32>
    %325 = vector.broadcast %323 : vector<8x1x128xf32> to vector<8x8x128xf32>
    %326 = vector.broadcast %324 : vector<1x8x128xf32> to vector<8x8x128xf32>
    %327 = arith.mulf %325, %326 : vector<8x8x128xf32>
    %328 = arith.addf %322, %327 : vector<8x8x128xf32>
    %329 = vector.extract_strided_slice %287 {offsets = [0, 7, 0], sizes = [8, 1, 128], strides = [1, 1, 1]} : vector<8x8x128xf32> to vector<8x1x128xf32>
    %330 = vector.extract_strided_slice %287 {offsets = [7, 0, 0], sizes = [1, 8, 128], strides = [1, 1, 1]} : vector<8x8x128xf32> to vector<1x8x128xf32>
    %331 = vector.broadcast %329 : vector<8x1x128xf32> to vector<8x8x128xf32>
    %332 = vector.broadcast %330 : vector<1x8x128xf32> to vector<8x8x128xf32>
    %333 = arith.mulf %331, %332 : vector<8x8x128xf32>
    %334 = arith.addf %328, %333 : vector<8x8x128xf32>
    %335 = vector.extract_strided_slice %334 {offsets = [0, 0, 0], sizes = [8, 1, 128], strides = [1, 1, 1]} : vector<8x8x128xf32> to vector<8x1x128xf32>
    %336 = vector.extract_strided_slice %334 {offsets = [0, 0, 0], sizes = [1, 8, 128], strides = [1, 1, 1]} : vector<8x8x128xf32> to vector<1x8x128xf32>
    %337 = vector.broadcast %335 : vector<8x1x128xf32> to vector<8x8x128xf32>
    %338 = vector.broadcast %336 : vector<1x8x128xf32> to vector<8x8x128xf32>
    %339 = arith.mulf %337, %338 : vector<8x8x128xf32>
    %340 = vector.extract_strided_slice %334 {offsets = [0, 1, 0], sizes = [8, 1, 128], strides = [1, 1, 1]} : vector<8x8x128xf32> to vector<8x1x128xf32>
    %341 = vector.extract_strided_slice %334 {offsets = [1, 0, 0], sizes = [1, 8, 128], strides = [1, 1, 1]} : vector<8x8x128xf32> to vector<1x8x128xf32>
    %342 = vector.broadcast %340 : vector<8x1x128xf32> to vector<8x8x128xf32>
    %343 = vector.broadcast %341 : vector<1x8x128xf32> to vector<8x8x128xf32>
    %344 = arith.mulf %342, %343 : vector<8x8x128xf32>
    %345 = arith.addf %339, %344 : vector<8x8x128xf32>
    %346 = vector.extract_strided_slice %334 {offsets = [0, 2, 0], sizes = [8, 1, 128], strides = [1, 1, 1]} : vector<8x8x128xf32> to vector<8x1x128xf32>
    %347 = vector.extract_strided_slice %334 {offsets = [2, 0, 0], sizes = [1, 8, 128], strides = [1, 1, 1]} : vector<8x8x128xf32> to vector<1x8x128xf32>
    %348 = vector.broadcast %346 : vector<8x1x128xf32> to vector<8x8x128xf32>
    %349 = vector.broadcast %347 : vector<1x8x128xf32> to vector<8x8x128xf32>
    %350 = arith.mulf %348, %349 : vector<8x8x128xf32>
    %351 = arith.addf %345, %350 : vector<8x8x128xf32>
    %352 = vector.extract_strided_slice %334 {offsets = [0, 3, 0], sizes = [8, 1, 128], strides = [1, 1, 1]} : vector<8x8x128xf32> to vector<8x1x128xf32>
    %353 = vector.extract_strided_slice %334 {offsets = [3, 0, 0], sizes = [1, 8, 128], strides = [1, 1, 1]} : vector<8x8x128xf32> to vector<1x8x128xf32>
    %354 = vector.broadcast %352 : vector<8x1x128xf32> to vector<8x8x128xf32>
    %355 = vector.broadcast %353 : vector<1x8x128xf32> to vector<8x8x128xf32>
    %356 = arith.mulf %354, %355 : vector<8x8x128xf32>
    %357 = arith.addf %351, %356 : vector<8x8x128xf32>
    %358 = vector.extract_strided_slice %334 {offsets = [0, 4, 0], sizes = [8, 1, 128], strides = [1, 1, 1]} : vector<8x8x128xf32> to vector<8x1x128xf32>
    %359 = vector.extract_strided_slice %334 {offsets = [4, 0, 0], sizes = [1, 8, 128], strides = [1, 1, 1]} : vector<8x8x128xf32> to vector<1x8x128xf32>
    %360 = vector.broadcast %358 : vector<8x1x128xf32> to vector<8x8x128xf32>
    %361 = vector.broadcast %359 : vector<1x8x128xf32> to vector<8x8x128xf32>
    %362 = arith.mulf %360, %361 : vector<8x8x128xf32>
    %363 = arith.addf %357, %362 : vector<8x8x128xf32>
    %364 = vector.extract_strided_slice %334 {offsets = [0, 5, 0], sizes = [8, 1, 128], strides = [1, 1, 1]} : vector<8x8x128xf32> to vector<8x1x128xf32>
    %365 = vector.extract_strided_slice %334 {offsets = [5, 0, 0], sizes = [1, 8, 128], strides = [1, 1, 1]} : vector<8x8x128xf32> to vector<1x8x128xf32>
    %366 = vector.broadcast %364 : vector<8x1x128xf32> to vector<8x8x128xf32>
    %367 = vector.broadcast %365 : vector<1x8x128xf32> to vector<8x8x128xf32>
    %368 = arith.mulf %366, %367 : vector<8x8x128xf32>
    %369 = arith.addf %363, %368 : vector<8x8x128xf32>
    %370 = vector.extract_strided_slice %334 {offsets = [0, 6, 0], sizes = [8, 1, 128], strides = [1, 1, 1]} : vector<8x8x128xf32> to vector<8x1x128xf32>
    %371 = vector.extract_strided_slice %334 {offsets = [6, 0, 0], sizes = [1, 8, 128], strides = [1, 1, 1]} : vector<8x8x128xf32> to vector<1x8x128xf32>
    %372 = vector.broadcast %370 : vector<8x1x128xf32> to vector<8x8x128xf32>
    %373 = vector.broadcast %371 : vector<1x8x128xf32> to vector<8x8x128xf32>
    %374 = arith.mulf %372, %373 : vector<8x8x128xf32>
    %375 = arith.addf %369, %374 : vector<8x8x128xf32>
    %376 = vector.extract_strided_slice %334 {offsets = [0, 7, 0], sizes = [8, 1, 128], strides = [1, 1, 1]} : vector<8x8x128xf32> to vector<8x1x128xf32>
    %377 = vector.extract_strided_slice %334 {offsets = [7, 0, 0], sizes = [1, 8, 128], strides = [1, 1, 1]} : vector<8x8x128xf32> to vector<1x8x128xf32>
    %378 = vector.broadcast %376 : vector<8x1x128xf32> to vector<8x8x128xf32>
    %379 = vector.broadcast %377 : vector<1x8x128xf32> to vector<8x8x128xf32>
    %380 = arith.mulf %378, %379 : vector<8x8x128xf32>
    %381 = arith.addf %375, %380 : vector<8x8x128xf32>
    %382 = vector.extract_strided_slice %381 {offsets = [0, 0, 0], sizes = [8, 1, 128], strides = [1, 1, 1]} : vector<8x8x128xf32> to vector<8x1x128xf32>
    %383 = vector.extract_strided_slice %381 {offsets = [0, 0, 0], sizes = [1, 8, 128], strides = [1, 1, 1]} : vector<8x8x128xf32> to vector<1x8x128xf32>
    %384 = vector.broadcast %382 : vector<8x1x128xf32> to vector<8x8x128xf32>
    %385 = vector.broadcast %383 : vector<1x8x128xf32> to vector<8x8x128xf32>
    %386 = arith.mulf %384, %385 : vector<8x8x128xf32>
    %387 = vector.extract_strided_slice %381 {offsets = [0, 1, 0], sizes = [8, 1, 128], strides = [1, 1, 1]} : vector<8x8x128xf32> to vector<8x1x128xf32>
    %388 = vector.extract_strided_slice %381 {offsets = [1, 0, 0], sizes = [1, 8, 128], strides = [1, 1, 1]} : vector<8x8x128xf32> to vector<1x8x128xf32>
    %389 = vector.broadcast %387 : vector<8x1x128xf32> to vector<8x8x128xf32>
    %390 = vector.broadcast %388 : vector<1x8x128xf32> to vector<8x8x128xf32>
    %391 = arith.mulf %389, %390 : vector<8x8x128xf32>
    %392 = arith.addf %386, %391 : vector<8x8x128xf32>
    %393 = vector.extract_strided_slice %381 {offsets = [0, 2, 0], sizes = [8, 1, 128], strides = [1, 1, 1]} : vector<8x8x128xf32> to vector<8x1x128xf32>
    %394 = vector.extract_strided_slice %381 {offsets = [2, 0, 0], sizes = [1, 8, 128], strides = [1, 1, 1]} : vector<8x8x128xf32> to vector<1x8x128xf32>
    %395 = vector.broadcast %393 : vector<8x1x128xf32> to vector<8x8x128xf32>
    %396 = vector.broadcast %394 : vector<1x8x128xf32> to vector<8x8x128xf32>
    %397 = arith.mulf %395, %396 : vector<8x8x128xf32>
    %398 = arith.addf %392, %397 : vector<8x8x128xf32>
    %399 = vector.extract_strided_slice %381 {offsets = [0, 3, 0], sizes = [8, 1, 128], strides = [1, 1, 1]} : vector<8x8x128xf32> to vector<8x1x128xf32>
    %400 = vector.extract_strided_slice %381 {offsets = [3, 0, 0], sizes = [1, 8, 128], strides = [1, 1, 1]} : vector<8x8x128xf32> to vector<1x8x128xf32>
    %401 = vector.broadcast %399 : vector<8x1x128xf32> to vector<8x8x128xf32>
    %402 = vector.broadcast %400 : vector<1x8x128xf32> to vector<8x8x128xf32>
    %403 = arith.mulf %401, %402 : vector<8x8x128xf32>
    %404 = arith.addf %398, %403 : vector<8x8x128xf32>
    %405 = vector.extract_strided_slice %381 {offsets = [0, 4, 0], sizes = [8, 1, 128], strides = [1, 1, 1]} : vector<8x8x128xf32> to vector<8x1x128xf32>
    %406 = vector.extract_strided_slice %381 {offsets = [4, 0, 0], sizes = [1, 8, 128], strides = [1, 1, 1]} : vector<8x8x128xf32> to vector<1x8x128xf32>
    %407 = vector.broadcast %405 : vector<8x1x128xf32> to vector<8x8x128xf32>
    %408 = vector.broadcast %406 : vector<1x8x128xf32> to vector<8x8x128xf32>
    %409 = arith.mulf %407, %408 : vector<8x8x128xf32>
    %410 = arith.addf %404, %409 : vector<8x8x128xf32>
    %411 = vector.extract_strided_slice %381 {offsets = [0, 5, 0], sizes = [8, 1, 128], strides = [1, 1, 1]} : vector<8x8x128xf32> to vector<8x1x128xf32>
    %412 = vector.extract_strided_slice %381 {offsets = [5, 0, 0], sizes = [1, 8, 128], strides = [1, 1, 1]} : vector<8x8x128xf32> to vector<1x8x128xf32>
    %413 = vector.broadcast %411 : vector<8x1x128xf32> to vector<8x8x128xf32>
    %414 = vector.broadcast %412 : vector<1x8x128xf32> to vector<8x8x128xf32>
    %415 = arith.mulf %413, %414 : vector<8x8x128xf32>
    %416 = arith.addf %410, %415 : vector<8x8x128xf32>
    %417 = vector.extract_strided_slice %381 {offsets = [0, 6, 0], sizes = [8, 1, 128], strides = [1, 1, 1]} : vector<8x8x128xf32> to vector<8x1x128xf32>
    %418 = vector.extract_strided_slice %381 {offsets = [6, 0, 0], sizes = [1, 8, 128], strides = [1, 1, 1]} : vector<8x8x128xf32> to vector<1x8x128xf32>
    %419 = vector.broadcast %417 : vector<8x1x128xf32> to vector<8x8x128xf32>
    %420 = vector.broadcast %418 : vector<1x8x128xf32> to vector<8x8x128xf32>
    %421 = arith.mulf %419, %420 : vector<8x8x128xf32>
    %422 = arith.addf %416, %421 : vector<8x8x128xf32>
    %423 = vector.extract_strided_slice %381 {offsets = [0, 7, 0], sizes = [8, 1, 128], strides = [1, 1, 1]} : vector<8x8x128xf32> to vector<8x1x128xf32>
    %424 = vector.extract_strided_slice %381 {offsets = [7, 0, 0], sizes = [1, 8, 128], strides = [1, 1, 1]} : vector<8x8x128xf32> to vector<1x8x128xf32>
    %425 = vector.broadcast %423 : vector<8x1x128xf32> to vector<8x8x128xf32>
    %426 = vector.broadcast %424 : vector<1x8x128xf32> to vector<8x8x128xf32>
    %427 = arith.mulf %425, %426 : vector<8x8x128xf32>
    %428 = arith.addf %422, %427 : vector<8x8x128xf32>
    %429 = vector.extract_strided_slice %428 {offsets = [0, 0, 0], sizes = [8, 1, 128], strides = [1, 1, 1]} : vector<8x8x128xf32> to vector<8x1x128xf32>
    %430 = vector.extract_strided_slice %428 {offsets = [0, 0, 0], sizes = [1, 8, 128], strides = [1, 1, 1]} : vector<8x8x128xf32> to vector<1x8x128xf32>
    %431 = vector.broadcast %429 : vector<8x1x128xf32> to vector<8x8x128xf32>
    %432 = vector.broadcast %430 : vector<1x8x128xf32> to vector<8x8x128xf32>
    %433 = arith.mulf %431, %432 : vector<8x8x128xf32>
    %434 = vector.extract_strided_slice %428 {offsets = [0, 1, 0], sizes = [8, 1, 128], strides = [1, 1, 1]} : vector<8x8x128xf32> to vector<8x1x128xf32>
    %435 = vector.extract_strided_slice %428 {offsets = [1, 0, 0], sizes = [1, 8, 128], strides = [1, 1, 1]} : vector<8x8x128xf32> to vector<1x8x128xf32>
    %436 = vector.broadcast %434 : vector<8x1x128xf32> to vector<8x8x128xf32>
    %437 = vector.broadcast %435 : vector<1x8x128xf32> to vector<8x8x128xf32>
    %438 = arith.mulf %436, %437 : vector<8x8x128xf32>
    %439 = arith.addf %433, %438 : vector<8x8x128xf32>
    %440 = vector.extract_strided_slice %428 {offsets = [0, 2, 0], sizes = [8, 1, 128], strides = [1, 1, 1]} : vector<8x8x128xf32> to vector<8x1x128xf32>
    %441 = vector.extract_strided_slice %428 {offsets = [2, 0, 0], sizes = [1, 8, 128], strides = [1, 1, 1]} : vector<8x8x128xf32> to vector<1x8x128xf32>
    %442 = vector.broadcast %440 : vector<8x1x128xf32> to vector<8x8x128xf32>
    %443 = vector.broadcast %441 : vector<1x8x128xf32> to vector<8x8x128xf32>
    %444 = arith.mulf %442, %443 : vector<8x8x128xf32>
    %445 = arith.addf %439, %444 : vector<8x8x128xf32>
    %446 = vector.extract_strided_slice %428 {offsets = [0, 3, 0], sizes = [8, 1, 128], strides = [1, 1, 1]} : vector<8x8x128xf32> to vector<8x1x128xf32>
    %447 = vector.extract_strided_slice %428 {offsets = [3, 0, 0], sizes = [1, 8, 128], strides = [1, 1, 1]} : vector<8x8x128xf32> to vector<1x8x128xf32>
    %448 = vector.broadcast %446 : vector<8x1x128xf32> to vector<8x8x128xf32>
    %449 = vector.broadcast %447 : vector<1x8x128xf32> to vector<8x8x128xf32>
    %450 = arith.mulf %448, %449 : vector<8x8x128xf32>
    %451 = arith.addf %445, %450 : vector<8x8x128xf32>
    %452 = vector.extract_strided_slice %428 {offsets = [0, 4, 0], sizes = [8, 1, 128], strides = [1, 1, 1]} : vector<8x8x128xf32> to vector<8x1x128xf32>
    %453 = vector.extract_strided_slice %428 {offsets = [4, 0, 0], sizes = [1, 8, 128], strides = [1, 1, 1]} : vector<8x8x128xf32> to vector<1x8x128xf32>
    %454 = vector.broadcast %452 : vector<8x1x128xf32> to vector<8x8x128xf32>
    %455 = vector.broadcast %453 : vector<1x8x128xf32> to vector<8x8x128xf32>
    %456 = arith.mulf %454, %455 : vector<8x8x128xf32>
    %457 = arith.addf %451, %456 : vector<8x8x128xf32>
    %458 = vector.extract_strided_slice %428 {offsets = [0, 5, 0], sizes = [8, 1, 128], strides = [1, 1, 1]} : vector<8x8x128xf32> to vector<8x1x128xf32>
    %459 = vector.extract_strided_slice %428 {offsets = [5, 0, 0], sizes = [1, 8, 128], strides = [1, 1, 1]} : vector<8x8x128xf32> to vector<1x8x128xf32>
    %460 = vector.broadcast %458 : vector<8x1x128xf32> to vector<8x8x128xf32>
    %461 = vector.broadcast %459 : vector<1x8x128xf32> to vector<8x8x128xf32>
    %462 = arith.mulf %460, %461 : vector<8x8x128xf32>
    %463 = arith.addf %457, %462 : vector<8x8x128xf32>
    %464 = vector.extract_strided_slice %428 {offsets = [0, 6, 0], sizes = [8, 1, 128], strides = [1, 1, 1]} : vector<8x8x128xf32> to vector<8x1x128xf32>
    %465 = vector.extract_strided_slice %428 {offsets = [6, 0, 0], sizes = [1, 8, 128], strides = [1, 1, 1]} : vector<8x8x128xf32> to vector<1x8x128xf32>
    %466 = vector.broadcast %464 : vector<8x1x128xf32> to vector<8x8x128xf32>
    %467 = vector.broadcast %465 : vector<1x8x128xf32> to vector<8x8x128xf32>
    %468 = arith.mulf %466, %467 : vector<8x8x128xf32>
    %469 = arith.addf %463, %468 : vector<8x8x128xf32>
    %470 = vector.extract_strided_slice %428 {offsets = [0, 7, 0], sizes = [8, 1, 128], strides = [1, 1, 1]} : vector<8x8x128xf32> to vector<8x1x128xf32>
    %471 = vector.extract_strided_slice %428 {offsets = [7, 0, 0], sizes = [1, 8, 128], strides = [1, 1, 1]} : vector<8x8x128xf32> to vector<1x8x128xf32>
    %472 = vector.broadcast %470 : vector<8x1x128xf32> to vector<8x8x128xf32>
    %473 = vector.broadcast %471 : vector<1x8x128xf32> to vector<8x8x128xf32>
    %474 = arith.mulf %472, %473 : vector<8x8x128xf32>
    %475 = arith.addf %469, %474 : vector<8x8x128xf32>
    %476 = vector.extract_strided_slice %475 {offsets = [0, 0, 0], sizes = [8, 1, 128], strides = [1, 1, 1]} : vector<8x8x128xf32> to vector<8x1x128xf32>
    %477 = vector.extract_strided_slice %475 {offsets = [0, 0, 0], sizes = [1, 8, 128], strides = [1, 1, 1]} : vector<8x8x128xf32> to vector<1x8x128xf32>
    %478 = vector.broadcast %476 : vector<8x1x128xf32> to vector<8x8x128xf32>
    %479 = vector.broadcast %477 : vector<1x8x128xf32> to vector<8x8x128xf32>
    %480 = arith.mulf %478, %479 : vector<8x8x128xf32>
    %481 = vector.extract_strided_slice %475 {offsets = [0, 1, 0], sizes = [8, 1, 128], strides = [1, 1, 1]} : vector<8x8x128xf32> to vector<8x1x128xf32>
    %482 = vector.extract_strided_slice %475 {offsets = [1, 0, 0], sizes = [1, 8, 128], strides = [1, 1, 1]} : vector<8x8x128xf32> to vector<1x8x128xf32>
    %483 = vector.broadcast %481 : vector<8x1x128xf32> to vector<8x8x128xf32>
    %484 = vector.broadcast %482 : vector<1x8x128xf32> to vector<8x8x128xf32>
    %485 = arith.mulf %483, %484 : vector<8x8x128xf32>
    %486 = arith.addf %480, %485 : vector<8x8x128xf32>
    %487 = vector.extract_strided_slice %475 {offsets = [0, 2, 0], sizes = [8, 1, 128], strides = [1, 1, 1]} : vector<8x8x128xf32> to vector<8x1x128xf32>
    %488 = vector.extract_strided_slice %475 {offsets = [2, 0, 0], sizes = [1, 8, 128], strides = [1, 1, 1]} : vector<8x8x128xf32> to vector<1x8x128xf32>
    %489 = vector.broadcast %487 : vector<8x1x128xf32> to vector<8x8x128xf32>
    %490 = vector.broadcast %488 : vector<1x8x128xf32> to vector<8x8x128xf32>
    %491 = arith.mulf %489, %490 : vector<8x8x128xf32>
    %492 = arith.addf %486, %491 : vector<8x8x128xf32>
    %493 = vector.extract_strided_slice %475 {offsets = [0, 3, 0], sizes = [8, 1, 128], strides = [1, 1, 1]} : vector<8x8x128xf32> to vector<8x1x128xf32>
    %494 = vector.extract_strided_slice %475 {offsets = [3, 0, 0], sizes = [1, 8, 128], strides = [1, 1, 1]} : vector<8x8x128xf32> to vector<1x8x128xf32>
    %495 = vector.broadcast %493 : vector<8x1x128xf32> to vector<8x8x128xf32>
    %496 = vector.broadcast %494 : vector<1x8x128xf32> to vector<8x8x128xf32>
    %497 = arith.mulf %495, %496 : vector<8x8x128xf32>
    %498 = arith.addf %492, %497 : vector<8x8x128xf32>
    %499 = vector.extract_strided_slice %475 {offsets = [0, 4, 0], sizes = [8, 1, 128], strides = [1, 1, 1]} : vector<8x8x128xf32> to vector<8x1x128xf32>
    %500 = vector.extract_strided_slice %475 {offsets = [4, 0, 0], sizes = [1, 8, 128], strides = [1, 1, 1]} : vector<8x8x128xf32> to vector<1x8x128xf32>
    %501 = vector.broadcast %499 : vector<8x1x128xf32> to vector<8x8x128xf32>
    %502 = vector.broadcast %500 : vector<1x8x128xf32> to vector<8x8x128xf32>
    %503 = arith.mulf %501, %502 : vector<8x8x128xf32>
    %504 = arith.addf %498, %503 : vector<8x8x128xf32>
    %505 = vector.extract_strided_slice %475 {offsets = [0, 5, 0], sizes = [8, 1, 128], strides = [1, 1, 1]} : vector<8x8x128xf32> to vector<8x1x128xf32>
    %506 = vector.extract_strided_slice %475 {offsets = [5, 0, 0], sizes = [1, 8, 128], strides = [1, 1, 1]} : vector<8x8x128xf32> to vector<1x8x128xf32>
    %507 = vector.broadcast %505 : vector<8x1x128xf32> to vector<8x8x128xf32>
    %508 = vector.broadcast %506 : vector<1x8x128xf32> to vector<8x8x128xf32>
    %509 = arith.mulf %507, %508 : vector<8x8x128xf32>
    %510 = arith.addf %504, %509 : vector<8x8x128xf32>
    %511 = vector.extract_strided_slice %475 {offsets = [0, 6, 0], sizes = [8, 1, 128], strides = [1, 1, 1]} : vector<8x8x128xf32> to vector<8x1x128xf32>
    %512 = vector.extract_strided_slice %475 {offsets = [6, 0, 0], sizes = [1, 8, 128], strides = [1, 1, 1]} : vector<8x8x128xf32> to vector<1x8x128xf32>
    %513 = vector.broadcast %511 : vector<8x1x128xf32> to vector<8x8x128xf32>
    %514 = vector.broadcast %512 : vector<1x8x128xf32> to vector<8x8x128xf32>
    %515 = arith.mulf %513, %514 : vector<8x8x128xf32>
    %516 = arith.addf %510, %515 : vector<8x8x128xf32>
    %517 = vector.extract_strided_slice %475 {offsets = [0, 7, 0], sizes = [8, 1, 128], strides = [1, 1, 1]} : vector<8x8x128xf32> to vector<8x1x128xf32>
    %518 = vector.extract_strided_slice %475 {offsets = [7, 0, 0], sizes = [1, 8, 128], strides = [1, 1, 1]} : vector<8x8x128xf32> to vector<1x8x128xf32>
    %519 = vector.broadcast %517 : vector<8x1x128xf32> to vector<8x8x128xf32>
    %520 = vector.broadcast %518 : vector<1x8x128xf32> to vector<8x8x128xf32>
    %521 = arith.mulf %519, %520 : vector<8x8x128xf32>
    %522 = arith.addf %516, %521 : vector<8x8x128xf32>
    %523 = vector.extract_strided_slice %522 {offsets = [0, 0, 0], sizes = [8, 1, 128], strides = [1, 1, 1]} : vector<8x8x128xf32> to vector<8x1x128xf32>
    %524 = vector.extract_strided_slice %522 {offsets = [0, 0, 0], sizes = [1, 8, 128], strides = [1, 1, 1]} : vector<8x8x128xf32> to vector<1x8x128xf32>
    %525 = vector.broadcast %523 : vector<8x1x128xf32> to vector<8x8x128xf32>
    %526 = vector.broadcast %524 : vector<1x8x128xf32> to vector<8x8x128xf32>
    %527 = arith.mulf %525, %526 : vector<8x8x128xf32>
    %528 = vector.extract_strided_slice %522 {offsets = [0, 1, 0], sizes = [8, 1, 128], strides = [1, 1, 1]} : vector<8x8x128xf32> to vector<8x1x128xf32>
    %529 = vector.extract_strided_slice %522 {offsets = [1, 0, 0], sizes = [1, 8, 128], strides = [1, 1, 1]} : vector<8x8x128xf32> to vector<1x8x128xf32>
    %530 = vector.broadcast %528 : vector<8x1x128xf32> to vector<8x8x128xf32>
    %531 = vector.broadcast %529 : vector<1x8x128xf32> to vector<8x8x128xf32>
    %532 = arith.mulf %530, %531 : vector<8x8x128xf32>
    %533 = arith.addf %527, %532 : vector<8x8x128xf32>
    %534 = vector.extract_strided_slice %522 {offsets = [0, 2, 0], sizes = [8, 1, 128], strides = [1, 1, 1]} : vector<8x8x128xf32> to vector<8x1x128xf32>
    %535 = vector.extract_strided_slice %522 {offsets = [2, 0, 0], sizes = [1, 8, 128], strides = [1, 1, 1]} : vector<8x8x128xf32> to vector<1x8x128xf32>
    %536 = vector.broadcast %534 : vector<8x1x128xf32> to vector<8x8x128xf32>
    %537 = vector.broadcast %535 : vector<1x8x128xf32> to vector<8x8x128xf32>
    %538 = arith.mulf %536, %537 : vector<8x8x128xf32>
    %539 = arith.addf %533, %538 : vector<8x8x128xf32>
    %540 = vector.extract_strided_slice %522 {offsets = [0, 3, 0], sizes = [8, 1, 128], strides = [1, 1, 1]} : vector<8x8x128xf32> to vector<8x1x128xf32>
    %541 = vector.extract_strided_slice %522 {offsets = [3, 0, 0], sizes = [1, 8, 128], strides = [1, 1, 1]} : vector<8x8x128xf32> to vector<1x8x128xf32>
    %542 = vector.broadcast %540 : vector<8x1x128xf32> to vector<8x8x128xf32>
    %543 = vector.broadcast %541 : vector<1x8x128xf32> to vector<8x8x128xf32>
    %544 = arith.mulf %542, %543 : vector<8x8x128xf32>
    %545 = arith.addf %539, %544 : vector<8x8x128xf32>
    %546 = vector.extract_strided_slice %522 {offsets = [0, 4, 0], sizes = [8, 1, 128], strides = [1, 1, 1]} : vector<8x8x128xf32> to vector<8x1x128xf32>
    %547 = vector.extract_strided_slice %522 {offsets = [4, 0, 0], sizes = [1, 8, 128], strides = [1, 1, 1]} : vector<8x8x128xf32> to vector<1x8x128xf32>
    %548 = vector.broadcast %546 : vector<8x1x128xf32> to vector<8x8x128xf32>
    %549 = vector.broadcast %547 : vector<1x8x128xf32> to vector<8x8x128xf32>
    %550 = arith.mulf %548, %549 : vector<8x8x128xf32>
    %551 = arith.addf %545, %550 : vector<8x8x128xf32>
    %552 = vector.extract_strided_slice %522 {offsets = [0, 5, 0], sizes = [8, 1, 128], strides = [1, 1, 1]} : vector<8x8x128xf32> to vector<8x1x128xf32>
    %553 = vector.extract_strided_slice %522 {offsets = [5, 0, 0], sizes = [1, 8, 128], strides = [1, 1, 1]} : vector<8x8x128xf32> to vector<1x8x128xf32>
    %554 = vector.broadcast %552 : vector<8x1x128xf32> to vector<8x8x128xf32>
    %555 = vector.broadcast %553 : vector<1x8x128xf32> to vector<8x8x128xf32>
    %556 = arith.mulf %554, %555 : vector<8x8x128xf32>
    %557 = arith.addf %551, %556 : vector<8x8x128xf32>
    %558 = vector.extract_strided_slice %522 {offsets = [0, 6, 0], sizes = [8, 1, 128], strides = [1, 1, 1]} : vector<8x8x128xf32> to vector<8x1x128xf32>
    %559 = vector.extract_strided_slice %522 {offsets = [6, 0, 0], sizes = [1, 8, 128], strides = [1, 1, 1]} : vector<8x8x128xf32> to vector<1x8x128xf32>
    %560 = vector.broadcast %558 : vector<8x1x128xf32> to vector<8x8x128xf32>
    %561 = vector.broadcast %559 : vector<1x8x128xf32> to vector<8x8x128xf32>
    %562 = arith.mulf %560, %561 : vector<8x8x128xf32>
    %563 = arith.addf %557, %562 : vector<8x8x128xf32>
    %564 = vector.extract_strided_slice %522 {offsets = [0, 7, 0], sizes = [8, 1, 128], strides = [1, 1, 1]} : vector<8x8x128xf32> to vector<8x1x128xf32>
    %565 = vector.extract_strided_slice %522 {offsets = [7, 0, 0], sizes = [1, 8, 128], strides = [1, 1, 1]} : vector<8x8x128xf32> to vector<1x8x128xf32>
    %566 = vector.broadcast %564 : vector<8x1x128xf32> to vector<8x8x128xf32>
    %567 = vector.broadcast %565 : vector<1x8x128xf32> to vector<8x8x128xf32>
    %568 = arith.mulf %566, %567 : vector<8x8x128xf32>
    %569 = arith.addf %563, %568 : vector<8x8x128xf32>
    %570 = vector.extract_strided_slice %569 {offsets = [0, 0, 0], sizes = [8, 1, 128], strides = [1, 1, 1]} : vector<8x8x128xf32> to vector<8x1x128xf32>
    %571 = vector.extract_strided_slice %569 {offsets = [0, 0, 0], sizes = [1, 8, 128], strides = [1, 1, 1]} : vector<8x8x128xf32> to vector<1x8x128xf32>
    %572 = vector.broadcast %570 : vector<8x1x128xf32> to vector<8x8x128xf32>
    %573 = vector.broadcast %571 : vector<1x8x128xf32> to vector<8x8x128xf32>
    %574 = arith.mulf %572, %573 : vector<8x8x128xf32>
    %575 = vector.extract_strided_slice %569 {offsets = [0, 1, 0], sizes = [8, 1, 128], strides = [1, 1, 1]} : vector<8x8x128xf32> to vector<8x1x128xf32>
    %576 = vector.extract_strided_slice %569 {offsets = [1, 0, 0], sizes = [1, 8, 128], strides = [1, 1, 1]} : vector<8x8x128xf32> to vector<1x8x128xf32>
    %577 = vector.broadcast %575 : vector<8x1x128xf32> to vector<8x8x128xf32>
    %578 = vector.broadcast %576 : vector<1x8x128xf32> to vector<8x8x128xf32>
    %579 = arith.mulf %577, %578 : vector<8x8x128xf32>
    %580 = arith.addf %574, %579 : vector<8x8x128xf32>
    %581 = vector.extract_strided_slice %569 {offsets = [0, 2, 0], sizes = [8, 1, 128], strides = [1, 1, 1]} : vector<8x8x128xf32> to vector<8x1x128xf32>
    %582 = vector.extract_strided_slice %569 {offsets = [2, 0, 0], sizes = [1, 8, 128], strides = [1, 1, 1]} : vector<8x8x128xf32> to vector<1x8x128xf32>
    %583 = vector.broadcast %581 : vector<8x1x128xf32> to vector<8x8x128xf32>
    %584 = vector.broadcast %582 : vector<1x8x128xf32> to vector<8x8x128xf32>
    %585 = arith.mulf %583, %584 : vector<8x8x128xf32>
    %586 = arith.addf %580, %585 : vector<8x8x128xf32>
    %587 = vector.extract_strided_slice %569 {offsets = [0, 3, 0], sizes = [8, 1, 128], strides = [1, 1, 1]} : vector<8x8x128xf32> to vector<8x1x128xf32>
    %588 = vector.extract_strided_slice %569 {offsets = [3, 0, 0], sizes = [1, 8, 128], strides = [1, 1, 1]} : vector<8x8x128xf32> to vector<1x8x128xf32>
    %589 = vector.broadcast %587 : vector<8x1x128xf32> to vector<8x8x128xf32>
    %590 = vector.broadcast %588 : vector<1x8x128xf32> to vector<8x8x128xf32>
    %591 = arith.mulf %589, %590 : vector<8x8x128xf32>
    %592 = arith.addf %586, %591 : vector<8x8x128xf32>
    %593 = vector.extract_strided_slice %569 {offsets = [0, 4, 0], sizes = [8, 1, 128], strides = [1, 1, 1]} : vector<8x8x128xf32> to vector<8x1x128xf32>
    %594 = vector.extract_strided_slice %569 {offsets = [4, 0, 0], sizes = [1, 8, 128], strides = [1, 1, 1]} : vector<8x8x128xf32> to vector<1x8x128xf32>
    %595 = vector.broadcast %593 : vector<8x1x128xf32> to vector<8x8x128xf32>
    %596 = vector.broadcast %594 : vector<1x8x128xf32> to vector<8x8x128xf32>
    %597 = arith.mulf %595, %596 : vector<8x8x128xf32>
    %598 = arith.addf %592, %597 : vector<8x8x128xf32>
    %599 = vector.extract_strided_slice %569 {offsets = [0, 5, 0], sizes = [8, 1, 128], strides = [1, 1, 1]} : vector<8x8x128xf32> to vector<8x1x128xf32>
    %600 = vector.extract_strided_slice %569 {offsets = [5, 0, 0], sizes = [1, 8, 128], strides = [1, 1, 1]} : vector<8x8x128xf32> to vector<1x8x128xf32>
    %601 = vector.broadcast %599 : vector<8x1x128xf32> to vector<8x8x128xf32>
    %602 = vector.broadcast %600 : vector<1x8x128xf32> to vector<8x8x128xf32>
    %603 = arith.mulf %601, %602 : vector<8x8x128xf32>
    %604 = arith.addf %598, %603 : vector<8x8x128xf32>
    %605 = vector.extract_strided_slice %569 {offsets = [0, 6, 0], sizes = [8, 1, 128], strides = [1, 1, 1]} : vector<8x8x128xf32> to vector<8x1x128xf32>
    %606 = vector.extract_strided_slice %569 {offsets = [6, 0, 0], sizes = [1, 8, 128], strides = [1, 1, 1]} : vector<8x8x128xf32> to vector<1x8x128xf32>
    %607 = vector.broadcast %605 : vector<8x1x128xf32> to vector<8x8x128xf32>
    %608 = vector.broadcast %606 : vector<1x8x128xf32> to vector<8x8x128xf32>
    %609 = arith.mulf %607, %608 : vector<8x8x128xf32>
    %610 = arith.addf %604, %609 : vector<8x8x128xf32>
    %611 = vector.extract_strided_slice %569 {offsets = [0, 7, 0], sizes = [8, 1, 128], strides = [1, 1, 1]} : vector<8x8x128xf32> to vector<8x1x128xf32>
    %612 = vector.extract_strided_slice %569 {offsets = [7, 0, 0], sizes = [1, 8, 128], strides = [1, 1, 1]} : vector<8x8x128xf32> to vector<1x8x128xf32>
    %613 = vector.broadcast %611 : vector<8x1x128xf32> to vector<8x8x128xf32>
    %614 = vector.broadcast %612 : vector<1x8x128xf32> to vector<8x8x128xf32>
    %615 = arith.mulf %613, %614 : vector<8x8x128xf32>
    %616 = arith.addf %610, %615 : vector<8x8x128xf32>
    %c0_8 = arith.constant 0 : index
    %c0_9 = arith.constant 0 : index
    %c0_10 = arith.constant 0 : index
    %617 = vector.load %arg2[%c0_8, %c0_9, %c0_10] : memref<8x8x128xf32, #tpu.memory_space<vmem>>, vector<8x8x128xf32>
    tpu.vector_store %arg2[%c0_8, %c0_9, %c0_10], %616 {strides = array<i32>} : memref<8x8x128xf32, #tpu.memory_space<vmem>>, vector<8x8x128xf32>,
    return
  }
  func.func @transform_0(%arg0: i32) -> (i32, i32) {
    %c0_i32 = arith.constant 0 : i32
    %c0_i32_0 = arith.constant 0 : i32
    return %c0_i32, %arg0 : i32, i32
  }
  func.func @transform_1(%arg0: i32) -> (i32, i32, i32) {
    %c0_i32 = arith.constant 0 : i32
    %c0_i32_0 = arith.constant 0 : i32
    %c0_i32_1 = arith.constant 0 : i32
    return %c0_i32, %c0_i32_0, %arg0 : i32, i32, i32
  }
}

</mosaic_0001>

<bundles_post_ra>
// kernel: tpu_custom_call.1
= control target key start
LH: loop header
LB: loop body
LE: loop exit
PB: predicated region body
PF: predicated region fallthrough
CT: control target
= control target key end

     0   :  { %6 = vsyncpa [#allocation3], 0  ;;  %s7077_s0 = inlined_call_operand.hbm [shape: f32[28,128], index: 0, kind: input, shape index: {}]   ;;  %s7078_s1 = inlined_call_operand.hbm [shape: f32[8,8,128], index: 1, kind: output, shape index: {}]  }
   0x1   :  { %7 = vsyncpa [#allocation4], 0  ;;  %s4500_s6 = smov [#allocation2]   ;;  %s4452_s10 = scalar_lea.hbm %s7077_s0, 512 }
   0x2   :  { %s13_s7 = sshll.u32 %s4500_s6, 4  ;;  %p4453_p0 = scmp.ne.s32.totalorder %s7077_s0, %s4452_s10  ;;  %s14_s7 = int_to_ptr.vmem [resolvable:$true] %s13_s7 }
   0x3   :  { %p4456_p1 = scmp.lt.u32.totalorder %s4452_s10, %s7077_s0 }
   0x5   :  { %p4458_p2 = pnand %p4456_p1, %p4453_p0 }
   0x7   :  { %4461 = shalt.err (!%p4458_p2)
}
   0x8   :  { %s4462_s15 = scalar_lea.vmem %s14_s7, 512  ;;  %p4467_p4 = scmp.lt.s32.totalorder %s14_s7, %s14_s7 }
   0x9   :  { %p4463_p3 = scmp.ne.s32.totalorder %s14_s7, %s4462_s15  ;;  %p4468_p5 = scmp.lt.s32.totalorder %s4462_s15, %s4462_s15 }
   0xb   :  { %p4469_p6 = por %p4468_p5, %p4467_p4 }
   0xd   :  { %p4470_p7 = pnand %p4469_p6, %p4463_p3 }
   0xf   :  { %4473 = shalt.err (!%p4470_p7)
}
  0x10   :  { %s4501_s16 = smov 128   ;;  %s4502_s17 = smov 8  }
  0x11   :  { %19 = dma.hbm_to_vmem [thread:$0]  %s7077_s0, 512, %s14_s7, [#allocation3], %s4501_s16, %s4501_s16, %s4502_s17  }
  0x12   :  { %4496 = dma.done.wait [#allocation3], 512  }
  0x13   :  { %4497 = vsyncadd [#allocation3], 4294966784  ;;  %v164_v0 = vlaneseq  ;;  %vm38_vm0 = vcmask 1040384   ;;  %vm40_vm1 = vcmask 1041408   ;;  %vm42_vm2 = vcmask 1042432   ;;  %v23_v2 = vld [vmem:[#allocation2] sm:$0xff] }
  0x14   :  { %vm44_vm3 = vcmask 1043456   ;;  %vm46_vm8 = vcmask 1044480   ;;  %v24_v3 = vld [vmem:[#allocation2 + $0x8] sm:$0xff]  ;;  %v25_v4 = vld [vmem:[#allocation2 + $0x10] sm:$0xff]  ;;  %vm48_vm12 = vcmask 1045504   ;;  %v4503_v5 = vmov 0.0  }
  0x15   :  { %v4530_v1 = vshrl.u32 %v164_v0, 7  ;;  %v26_v9 = vld [vmem:[#allocation2 + $0x18] sm:$0xf]  ;;  %v4548_v10 = vmul.f32 0.00390625, %v23_v2  ;;  %v4550_v11 = vmul.f32 0.00390625, %v24_v3  ;;  %v4552_v12 = vmul.f32 0.00390625, %v25_v4 }
  0x16   :  { %vm50_vm13 = vcmask 1046528   ;;  %v4559_v14 = vmul.f32 0.00390625, %v26_v9  ;;  %s4504_s0 = smov [#allocation5]  }
  0x17   :  { %vm166_vm4 = vcmp.eq.s32.totalorder %v4530_v1, 0  ;;  %vm167_vm5 = vcmp.eq.s32.totalorder %v4530_v1, 1  ;;  %vm168_vm6 = vcmp.eq.s32.totalorder %v4530_v1, 2  ;;  %vm169_vm7 = vcmp.eq.s32.totalorder %v4530_v1, 3  ;;  %s4427_s20 = sshll.u32 %s4504_s0, 4  ;;  %s4428_s20 = int_to_ptr.vmem [resolvable:$true] %s4427_s20 }
  0x18   :  { %vm170_vm9 = vcmp.eq.s32.totalorder %v4530_v1, 4  ;;  %vm171_vm10 = vcmp.eq.s32.totalorder %v4530_v1, 5  ;;  %vm172_vm11 = vcmp.eq.s32.totalorder %v4530_v1, 6  ;;  %v4540_v6 = vsel %vm166_vm4, 1.0, %v4503_v5  ;;  %s4474_s21 = scalar_lea.vmem %s4428_s20, 1024  ;;  %p4479_p9 = scmp.lt.s32.totalorder %s4428_s20, %s4428_s20 }
  0x19   :  { %v4543_v7 = vsel %vm167_vm5, 1.0, %v4503_v5  ;;  %v4546_v8 = vsel %vm168_vm6, 1.0, %v4503_v5  ;;  %v4557_v13 = vsel %vm169_vm7, 1.0, %v4503_v5  ;;  %v4564_v15 = vsel %vm170_vm9, 1.0, %v4503_v5  ;;  %p4475_p8 = scmp.ne.s32.totalorder %s4428_s20, %s4474_s21  ;;  %p4480_p10 = scmp.lt.s32.totalorder %s4474_s21, %s4474_s21 }
  0x1a   :  { %v4569_v16 = vsel %vm171_vm10, 1.0, %v4503_v5  ;;  %v4574_v17 = vsel %vm172_vm11, 1.0, %v4503_v5  ;;  %v31_v18 = vsub.f32 0.0, %v4548_v10  ;;  %v32_v19 = vsub.f32 0.0, %v4550_v11 }
  0x1b   :  { %v4579_v20 = vsub.f32 0.0, %v4552_v12  ;;  %v57_v21 = vsel %vm38_vm0, %v4548_v10, 0.0  ;;  %v4584_v22 = vsub.f32 0.0, %v4559_v14  ;;  %v65_v23 = vrot.slane %v4548_v10, 1  ;;  %p4481_p11 = por %p4480_p10, %p4479_p9 }
  0x1c   :  { %v67_v24 = vrot.slane %v4548_v10, 6  ;;  %v81_v25 = vrot.slane %v4548_v10, 2  ;;  %v36_v26 = vrot.slane %v31_v18, 7  ;;  %v52_v27 = vrot.slane %v31_v18, 5 }
  0x1d   :  { %v55_v28 = vrot.slane %v32_v19, 5  ;;  %v69_v29 = vrot.slane %v32_v19, 2  ;;  %v72_v30 = vrot.slane %v4579_v20, 2  ;;  %v84_v32 = vrot.slane %v4550_v11, 7  ;;  %p4482_p12 = pnand %p4481_p11, %p4475_p8 }
  0x1e   :  { %v74_v31 = vsel %vm38_vm0, %v65_v23, %v67_v24  ;;  %v86_v33 = vrot.slane %v4550_v11, 3  ;;  %v39_v34 = vsel %vm38_vm0, 0.0, %v36_v26  ;;  %v58_v35 = vsel %vm40_vm1, %v57_v21, %v52_v27 }
  0x1f   :  { %v75_v36 = vsel %vm40_vm1, %v74_v31, 0.0  ;;  %v88_v37 = vrot.slane %v4579_v20, 6  ;;  %v41_v38 = vsel %vm40_vm1, %v39_v34, %v36_v26  ;;  %v59_v39 = vsel %vm42_vm2, %v58_v35, %v55_v28 }
  0x20   :  { %v76_v40 = vsel %vm42_vm2, %v75_v36, %v69_v29  ;;  %v90_v41 = vsel %vm38_vm0, %v81_v25, %v84_v32  ;;  %v43_v42 = vsel %vm42_vm2, %v41_v38, %v36_v26  ;;  %v60_v43 = vsel %vm44_vm3, %v59_v39, %v55_v28 }
  0x21   :  { %v77_v44 = vsel %vm44_vm3, %v76_v40, %v69_v29  ;;  %v91_v45 = vsel %vm40_vm1, %v90_v41, %v86_v33  ;;  %v45_v46 = vsel %vm44_vm3, %v43_v42, %v36_v26  ;;  %v61_v47 = vsel %vm46_vm8, %v60_v43, %v55_v28 }
  0x22   :  { %v78_v48 = vsel %vm46_vm8, %v77_v44, %v69_v29  ;;  %v92_v49 = vsel %vm42_vm2, %v91_v45, 0.0  ;;  %v47_v50 = vsel %vm46_vm8, %v45_v46, %v36_v26  ;;  %v62_v51 = vsel %vm48_vm12, %v61_v47, %v55_v28 }
  0x23   :  { %v79_v52 = vsel %vm48_vm12, %v78_v48, %v72_v30  ;;  %v93_v53 = vsel %vm44_vm3, %v92_v49, %v88_v37  ;;  %vm173_vm14 = vcmp.eq.s32.totalorder %v4530_v1, 7  ;;  %v49_v54 = vsel %vm48_vm12, %v47_v50, %v36_v26 }
  0x24   :  { %v4618_v55 = vsel %vm50_vm13, %v62_v51, %v55_v28  ;;  %v4621_v56 = vsel %vm50_vm13, %v79_v52, %v72_v30  ;;  %v94_v57 = vsel %vm46_vm8, %v93_v53, %v88_v37  ;;  %v4625_v58 = vsel %vm50_vm13, %v49_v54, %v36_v26 }
  0x25   :  { %v95_v59 = vsel %vm48_vm12, %v94_v57, %v88_v37  ;;  %v97_v60 = vrot.slane %v4548_v10, 3  ;;  %v99_v61 = vrot.slane %v4550_v11, 4  ;;  %v102_v63 = vrot.slane %v4552_v12, 7 }
  0x26   :  { %v4631_v62 = vsel %vm50_vm13, %v95_v59, %v88_v37  ;;  %v104_v0 = vrot.slane %v4579_v20, 1  ;;  %v107_v2 = vrot.slane %v4584_v22, 1  ;;  %v116_v4 = vrot.slane %v4548_v10, 4 }
  0x27   :  { %v109_v3 = vsel %vm38_vm0, %v97_v60, %v4550_v11  ;;  %v118_v9 = vrot.slane %v4550_v11, 1  ;;  %v120_v18 = vrot.slane %v4550_v11, 5  ;;  %v122_v21 = vrot.slane %v4552_v12, 2 }
  0x28   :  { %v110_v19 = vsel %vm40_vm1, %v109_v3, %v99_v61  ;;  %v124_v23 = vrot.slane %v4584_v22, 3  ;;  %v133_v25 = vrot.slane %v4548_v10, 5  ;;  %v135_v27 = vrot.slane %v4550_v11, 2 }
  0x29   :  { %v111_v20 = vsel %vm42_vm2, %v110_v19, %v102_v63  ;;  %v126_v26 = vsel %vm38_vm0, %v116_v4, %v118_v9  ;;  %v137_v28 = vrot.slane %v4552_v12, 6  ;;  %v139_v31 = vrot.slane %v4552_v12, 1 }
  0x2a   :  { %v112_v29 = vsel %vm44_vm3, %v111_v20, 0.0  ;;  %v127_v30 = vsel %vm40_vm1, %v126_v26, %v120_v18  ;;  %v141_v32 = vrot.slane %v4552_v12, 3  ;;  %v144_v36 = vrot.slane %v4559_v14, 4 }
  0x2b   :  { %v113_v34 = vsel %vm46_vm8, %v112_v29, %v104_v0  ;;  %v128_v35 = vsel %vm42_vm2, %v127_v30, %v4552_v12  ;;  %v146_v37 = vrot.slane %v4584_v22, 4  ;;  %v148_v39 = vsel %vm38_vm0, %v133_v25, %v135_v27 }
  0x2c   :  { %v114_v11 = vsel %vm48_vm12, %v113_v34, %v104_v0  ;;  %v129_v38 = vsel %vm44_vm3, %v128_v35, %v122_v21  ;;  %v155_v40 = vrot.slane %v4559_v14, 5  ;;  %v149_v43 = vsel %vm40_vm1, %v148_v39, %v137_v28 }
  0x2d   :  { %v4663_v41 = vsel %vm50_vm13, %v114_v11, %v107_v2  ;;  %v130_v42 = vsel %vm46_vm8, %v129_v38, 0.0  ;;  %v157_v12 = vsel %vm38_vm0, %v67_v24, %v86_v33  ;;  %v150_v44 = vsel %vm42_vm2, %v149_v43, %v139_v31 }
  0x2e   :  { %v131_v22 = vsel %vm48_vm12, %v130_v42, %v124_v23  ;;  %v158_v45 = vsel %vm40_vm1, %v157_v12, %v102_v63  ;;  %v4676_v14 = vsel %vm173_vm14, 1.0, %v4503_v5  ;;  %v151_v47 = vsel %vm44_vm3, %v150_v44, %v141_v32 }
  0x2f   :  { %v4679_v46 = vsel %vm50_vm13, %v131_v22, %v124_v23  ;;  %v159_v10 = vsel %vm42_vm2, %v158_v45, %v122_v21  ;;  %v4684_v24 = vsub.s32 0, %v4530_v1  ;;  %v152_v33 = vsel %vm46_vm8, %v151_v47, %v144_v36 }
  0x30   :  { %v160_v48 = vsel %vm44_vm3, %v159_v10, %v144_v36  ;;  %v4689_v49 = vsub.s32 1, %v4530_v1  ;;  %v4692_v5 = vsub.s32 2, %v4530_v1  ;;  %v153_v50 = vsel %vm48_vm12, %v152_v33, 0.0 }
  0x31   :  { %v161_v51 = vsel %vm46_vm8, %v160_v48, %v155_v40  ;;  %v193_v52 = vrot.slane %v4625_v58, %v4684_v24  ;;  %v197_v53 = vrot.slane %v4618_v55, %v4684_v24  ;;  %v4701_v54 = vsel %vm50_vm13, %v153_v50, %v146_v37 }
  0x32   :  { %v162_v57 = vsel %vm48_vm12, %v161_v51, %v155_v40  ;;  %v201_v59 = vrot.slane %v4621_v56, %v4684_v24  ;;  %v205_v60 = vrot.slane %v4631_v62, %v4684_v24  ;;  %v209_v63 = vrot.slane %v4663_v41, %v4684_v24 }
  0x33   :  { %v4709_v61 = vsel %vm50_vm13, %v162_v57, 0.0  ;;  %v213_v0 = vrot.slane %v4679_v46, %v4684_v24  ;;  %v217_v2 = vrot.slane %v4701_v54, %v4684_v24  ;;  %v222_v4 = vmul.f32 %v193_v52, %v4625_v58 }
  0x34   :  { %v221_v3 = vrot.slane %v4709_v61, %v4684_v24  ;;  %v223_v9 = vmul.f32 %v197_v53, %v4625_v58  ;;  %v224_v18 = vmul.f32 %v201_v59, %v4625_v58  ;;  %v225_v19 = vmul.f32 %v205_v60, %v4625_v58 }
  0x35   :  { %v226_v21 = vmul.f32 %v209_v63, %v4625_v58  ;;  %v227_v23 = vmul.f32 %v213_v0, %v4625_v58  ;;  %v228_v25 = vmul.f32 %v217_v2, %v4625_v58  ;;  %v233_v26 = vrot.slane %v4625_v58, %v4689_v49 }
  0x36   :  { %v229_v20 = vmul.f32 %v221_v3, %v4625_v58  ;;  %v237_v27 = vrot.slane %v4618_v55, %v4689_v49  ;;  %v241_v28 = vrot.slane %v4621_v56, %v4689_v49  ;;  %v245_v29 = vrot.slane %v4631_v62, %v4689_v49 }
  0x37   :  { %v249_v30 = vrot.slane %v4663_v41, %v4689_v49  ;;  %v253_v31 = vrot.slane %v4679_v46, %v4689_v49  ;;  %v257_v32 = vrot.slane %v4701_v54, %v4689_v49  ;;  %v261_v34 = vrot.slane %v4709_v61, %v4689_v49 }
  0x38   :  { %v262_v35 = vmul.f32 %v233_v26, %v4618_v55  ;;  %v263_v36 = vmul.f32 %v237_v27, %v4618_v55  ;;  %v264_v37 = vmul.f32 %v241_v28, %v4618_v55  ;;  %v265_v11 = vmul.f32 %v245_v29, %v4618_v55 }
  0x39   :  { %v266_v38 = vmul.f32 %v249_v30, %v4618_v55  ;;  %v267_v39 = vmul.f32 %v253_v31, %v4618_v55  ;;  %v268_v40 = vmul.f32 %v257_v32, %v4618_v55  ;;  %v269_v42 = vmul.f32 %v261_v34, %v4618_v55 }
  0x3a   :  { %v270_v43 = vadd.f32 %v262_v35, %v222_v4  ;;  %v271_v12 = vadd.f32 %v263_v36, %v223_v9  ;;  %v272_v22 = vadd.f32 %v264_v37, %v224_v18  ;;  %v273_v44 = vadd.f32 %v265_v11, %v225_v19 }
  0x3b   :  { %v274_v45 = vadd.f32 %v266_v38, %v226_v21  ;;  %v275_v47 = vadd.f32 %v267_v39, %v227_v23  ;;  %v276_v10 = vadd.f32 %v268_v40, %v228_v25  ;;  %v277_v33 = vadd.f32 %v269_v42, %v229_v20 }
  0x3c   :  { %v281_v48 = vrot.slane %v4625_v58, %v4692_v5  ;;  %v285_v50 = vrot.slane %v4618_v55, %v4692_v5  ;;  %v289_v51 = vrot.slane %v4621_v56, %v4692_v5  ;;  %v293_v52 = vrot.slane %v4631_v62, %v4692_v5 }
  0x3d   :  { %v297_v53 = vrot.slane %v4663_v41, %v4692_v5  ;;  %v301_v57 = vrot.slane %v4679_v46, %v4692_v5  ;;  %v305_v59 = vrot.slane %v4701_v54, %v4692_v5  ;;  %v309_v60 = vrot.slane %v4709_v61, %v4692_v5 }
  0x3e   :  { %v310_v63 = vmul.f32 %v281_v48, %v4621_v56  ;;  %v311_v0 = vmul.f32 %v285_v50, %v4621_v56  ;;  %v312_v2 = vmul.f32 %v289_v51, %v4621_v56  ;;  %v313_v3 = vmul.f32 %v293_v52, %v4621_v56 }
  0x3f   :  { %v314_v4 = vmul.f32 %v297_v53, %v4621_v56  ;;  %v315_v9 = vmul.f32 %v301_v57, %v4621_v56  ;;  %v316_v18 = vmul.f32 %v305_v59, %v4621_v56  ;;  %v317_v19 = vmul.f32 %v309_v60, %v4621_v56 }
  0x40   :  { %v318_v21 = vadd.f32 %v310_v63, %v270_v43  ;;  %v319_v23 = vadd.f32 %v311_v0, %v271_v12  ;;  %v320_v25 = vadd.f32 %v312_v2, %v272_v22  ;;  %v321_v20 = vadd.f32 %v313_v3, %v273_v44 }
  0x41   :  { %v322_v26 = vadd.f32 %v314_v4, %v274_v45  ;;  %v323_v27 = vadd.f32 %v315_v9, %v275_v47  ;;  %v324_v28 = vadd.f32 %v316_v18, %v276_v10  ;;  %v325_v29 = vadd.f32 %v317_v19, %v277_v33 }
  0x42   :  { %v4776_v30 = vsub.s32 3, %v4530_v1  ;;  %v4779_v31 = vsub.s32 4, %v4530_v1  ;;  %v4782_v32 = vsub.s32 5, %v4530_v1  ;;  %v4785_v34 = vsub.s32 6, %v4530_v1 }
  0x43   :  { %v4788_v35 = vsub.s32 7, %v4530_v1  ;;  %v4792_v36 = vadd.f32 %v4540_v6, %v4625_v58  ;;  %v4796_v37 = vadd.f32 %v4543_v7, %v4618_v55 }
  0x44   :  { %v329_v11 = vrot.slane %v4625_v58, %v4776_v30  ;;  %v333_v38 = vrot.slane %v4618_v55, %v4776_v30  ;;  %v337_v39 = vrot.slane %v4621_v56, %v4776_v30  ;;  %v341_v1 = vrot.slane %v4631_v62, %v4776_v30 }
  0x45   :  { %v345_v6 = vrot.slane %v4663_v41, %v4776_v30  ;;  %v349_v40 = vrot.slane %v4679_v46, %v4776_v30  ;;  %v353_v7 = vrot.slane %v4701_v54, %v4776_v30  ;;  %v357_v42 = vrot.slane %v4709_v61, %v4776_v30 }
  0x46   :  { %v358_v43 = vmul.f32 %v329_v11, %v4631_v62  ;;  %v359_v12 = vmul.f32 %v333_v38, %v4631_v62  ;;  %v360_v22 = vmul.f32 %v337_v39, %v4631_v62  ;;  %v361_v44 = vmul.f32 %v341_v1, %v4631_v62 }
  0x47   :  { %v362_v45 = vmul.f32 %v345_v6, %v4631_v62  ;;  %v363_v47 = vmul.f32 %v349_v40, %v4631_v62  ;;  %v364_v10 = vmul.f32 %v353_v7, %v4631_v62  ;;  %v365_v33 = vmul.f32 %v357_v42, %v4631_v62 }
  0x48   :  { %v366_v48 = vadd.f32 %v358_v43, %v318_v21  ;;  %v367_v50 = vadd.f32 %v359_v12, %v319_v23  ;;  %v368_v51 = vadd.f32 %v360_v22, %v320_v25  ;;  %v369_v52 = vadd.f32 %v361_v44, %v321_v20 }
  0x49   :  { %v370_v53 = vadd.f32 %v362_v45, %v322_v26  ;;  %v371_v57 = vadd.f32 %v363_v47, %v323_v27  ;;  %v372_v59 = vadd.f32 %v364_v10, %v324_v28  ;;  %v373_v60 = vadd.f32 %v365_v33, %v325_v29 }
  0x4a   :  { %v377_v63 = vrot.slane %v4625_v58, %v4779_v31  ;;  %v381_v0 = vrot.slane %v4618_v55, %v4779_v31  ;;  %v385_v2 = vrot.slane %v4621_v56, %v4779_v31  ;;  %v389_v3 = vrot.slane %v4631_v62, %v4779_v31 }
  0x4b   :  { %v393_v4 = vrot.slane %v4663_v41, %v4779_v31  ;;  %v397_v9 = vrot.slane %v4679_v46, %v4779_v31  ;;  %v401_v18 = vrot.slane %v4701_v54, %v4779_v31  ;;  %v405_v19 = vrot.slane %v4709_v61, %v4779_v31 }
  0x4c   :  { %v406_v21 = vmul.f32 %v377_v63, %v4663_v41  ;;  %v407_v23 = vmul.f32 %v381_v0, %v4663_v41  ;;  %v408_v25 = vmul.f32 %v385_v2, %v4663_v41  ;;  %v409_v20 = vmul.f32 %v389_v3, %v4663_v41 }
  0x4d   :  { %v410_v26 = vmul.f32 %v393_v4, %v4663_v41  ;;  %v411_v27 = vmul.f32 %v397_v9, %v4663_v41  ;;  %v412_v28 = vmul.f32 %v401_v18, %v4663_v41  ;;  %v413_v29 = vmul.f32 %v405_v19, %v4663_v41 }
  0x4e   :  { %v414_v11 = vadd.f32 %v406_v21, %v366_v48  ;;  %v415_v38 = vadd.f32 %v407_v23, %v367_v50  ;;  %v416_v39 = vadd.f32 %v408_v25, %v368_v51  ;;  %v417_v1 = vadd.f32 %v409_v20, %v369_v52 }
  0x4f   :  { %v418_v6 = vadd.f32 %v410_v26, %v370_v53  ;;  %v419_v40 = vadd.f32 %v411_v27, %v371_v57  ;;  %v420_v7 = vadd.f32 %v412_v28, %v372_v59  ;;  %v421_v42 = vadd.f32 %v413_v29, %v373_v60 }
  0x50   :  { %v425_v43 = vrot.slane %v4625_v58, %v4782_v32  ;;  %v429_v12 = vrot.slane %v4618_v55, %v4782_v32  ;;  %v433_v22 = vrot.slane %v4621_v56, %v4782_v32  ;;  %v437_v44 = vrot.slane %v4631_v62, %v4782_v32 }
  0x51   :  { %v441_v45 = vrot.slane %v4663_v41, %v4782_v32  ;;  %v445_v47 = vrot.slane %v4679_v46, %v4782_v32  ;;  %v449_v10 = vrot.slane %v4701_v54, %v4782_v32  ;;  %v453_v33 = vrot.slane %v4709_v61, %v4782_v32 }
  0x52   :  { %v454_v48 = vmul.f32 %v425_v43, %v4679_v46  ;;  %v455_v50 = vmul.f32 %v429_v12, %v4679_v46  ;;  %v456_v51 = vmul.f32 %v433_v22, %v4679_v46  ;;  %v457_v52 = vmul.f32 %v437_v44, %v4679_v46 }
  0x53   :  { %v458_v53 = vmul.f32 %v441_v45, %v4679_v46  ;;  %v459_v57 = vmul.f32 %v445_v47, %v4679_v46  ;;  %v460_v59 = vmul.f32 %v449_v10, %v4679_v46  ;;  %v461_v60 = vmul.f32 %v453_v33, %v4679_v46 }
  0x54   :  { %v462_v63 = vadd.f32 %v454_v48, %v414_v11  ;;  %v463_v0 = vadd.f32 %v455_v50, %v415_v38  ;;  %v464_v2 = vadd.f32 %v456_v51, %v416_v39  ;;  %v465_v3 = vadd.f32 %v457_v52, %v417_v1 }
  0x55   :  { %v466_v4 = vadd.f32 %v458_v53, %v418_v6  ;;  %v467_v9 = vadd.f32 %v459_v57, %v419_v40  ;;  %v468_v18 = vadd.f32 %v460_v59, %v420_v7  ;;  %v469_v19 = vadd.f32 %v461_v60, %v421_v42 }
  0x56   :  { %v473_v21 = vrot.slane %v4625_v58, %v4785_v34  ;;  %v477_v23 = vrot.slane %v4618_v55, %v4785_v34  ;;  %v481_v25 = vrot.slane %v4621_v56, %v4785_v34  ;;  %v485_v20 = vrot.slane %v4631_v62, %v4785_v34 }
  0x57   :  { %v489_v26 = vrot.slane %v4663_v41, %v4785_v34  ;;  %v493_v27 = vrot.slane %v4679_v46, %v4785_v34  ;;  %v497_v28 = vrot.slane %v4701_v54, %v4785_v34  ;;  %v501_v29 = vrot.slane %v4709_v61, %v4785_v34 }
  0x58   :  { %v502_v11 = vmul.f32 %v473_v21, %v4701_v54  ;;  %v503_v38 = vmul.f32 %v477_v23, %v4701_v54  ;;  %v504_v39 = vmul.f32 %v481_v25, %v4701_v54  ;;  %v505_v1 = vmul.f32 %v485_v20, %v4701_v54 }
  0x59   :  { %v506_v6 = vmul.f32 %v489_v26, %v4701_v54  ;;  %v507_v40 = vmul.f32 %v493_v27, %v4701_v54  ;;  %v508_v7 = vmul.f32 %v497_v28, %v4701_v54  ;;  %v509_v42 = vmul.f32 %v501_v29, %v4701_v54 }
  0x5a   :  { %v510_v43 = vadd.f32 %v502_v11, %v462_v63  ;;  %v511_v12 = vadd.f32 %v503_v38, %v463_v0  ;;  %v512_v22 = vadd.f32 %v504_v39, %v464_v2  ;;  %v513_v44 = vadd.f32 %v505_v1, %v465_v3 }
  0x5b   :  { %v514_v45 = vadd.f32 %v506_v6, %v466_v4  ;;  %v515_v47 = vadd.f32 %v507_v40, %v467_v9  ;;  %v516_v10 = vadd.f32 %v508_v7, %v468_v18  ;;  %v517_v33 = vadd.f32 %v509_v42, %v469_v19 }
  0x5c   :  { %v521_v48 = vrot.slane %v4625_v58, %v4788_v35  ;;  %v525_v50 = vrot.slane %v4618_v55, %v4788_v35  ;;  %v529_v51 = vrot.slane %v4621_v56, %v4788_v35  ;;  %v533_v52 = vrot.slane %v4631_v62, %v4788_v35 }
  0x5d   :  { %v537_v53 = vrot.slane %v4663_v41, %v4788_v35  ;;  %v541_v57 = vrot.slane %v4679_v46, %v4788_v35  ;;  %v545_v59 = vrot.slane %v4701_v54, %v4788_v35  ;;  %v549_v60 = vrot.slane %v4709_v61, %v4788_v35 }
  0x5e   :  { %v550_v63 = vmul.f32 %v521_v48, %v4709_v61  ;;  %v551_v0 = vmul.f32 %v525_v50, %v4709_v61  ;;  %v552_v2 = vmul.f32 %v529_v51, %v4709_v61  ;;  %v553_v3 = vmul.f32 %v533_v52, %v4709_v61 }
  0x5f   :  { %v554_v4 = vmul.f32 %v537_v53, %v4709_v61  ;;  %v555_v9 = vmul.f32 %v541_v57, %v4709_v61  ;;  %v556_v18 = vmul.f32 %v545_v59, %v4709_v61  ;;  %v557_v19 = vmul.f32 %v549_v60, %v4709_v61 }
  0x60   :  { %v4918_v21 = vadd.f32 %v550_v63, %v510_v43  ;;  %v4920_v23 = vadd.f32 %v551_v0, %v511_v12  ;;  %v4922_v25 = vadd.f32 %v552_v2, %v512_v22  ;;  %v4924_v20 = vadd.f32 %v553_v3, %v513_v44 }
  0x61   :  { %v4926_v26 = vadd.f32 %v554_v4, %v514_v45  ;;  %v4928_v27 = vadd.f32 %v555_v9, %v515_v47  ;;  %v4930_v28 = vadd.f32 %v556_v18, %v516_v10  ;;  %v4932_v29 = vadd.f32 %v557_v19, %v517_v33 }
  0x62   :  { %v569_v11 = vrot.slane %v4918_v21, %v4684_v24  ;;  %v573_v38 = vrot.slane %v4920_v23, %v4684_v24  ;;  %v577_v39 = vrot.slane %v4922_v25, %v4684_v24  ;;  %v581_v1 = vrot.slane %v4924_v20, %v4684_v24 }
  0x63   :  { %v585_v6 = vrot.slane %v4926_v26, %v4684_v24  ;;  %v589_v40 = vrot.slane %v4928_v27, %v4684_v24  ;;  %v593_v7 = vrot.slane %v4930_v28, %v4684_v24  ;;  %v597_v42 = vrot.slane %v4932_v29, %v4684_v24 }
  0x64   :  { %v598_v43 = vmul.f32 %v569_v11, %v4625_v58  ;;  %v599_v12 = vmul.f32 %v573_v38, %v4625_v58  ;;  %v600_v22 = vmul.f32 %v577_v39, %v4625_v58  ;;  %v601_v44 = vmul.f32 %v581_v1, %v4625_v58 }
  0x65   :  { %v602_v45 = vmul.f32 %v585_v6, %v4625_v58  ;;  %v603_v47 = vmul.f32 %v589_v40, %v4625_v58  ;;  %v604_v10 = vmul.f32 %v593_v7, %v4625_v58  ;;  %v605_v33 = vmul.f32 %v597_v42, %v4625_v58 }
  0x66   :  { %v609_v48 = vrot.slane %v4918_v21, %v4689_v49  ;;  %v613_v50 = vrot.slane %v4920_v23, %v4689_v49  ;;  %v617_v51 = vrot.slane %v4922_v25, %v4689_v49  ;;  %v621_v52 = vrot.slane %v4924_v20, %v4689_v49 }
  0x67   :  { %v625_v53 = vrot.slane %v4926_v26, %v4689_v49  ;;  %v629_v57 = vrot.slane %v4928_v27, %v4689_v49  ;;  %v633_v59 = vrot.slane %v4930_v28, %v4689_v49  ;;  %v637_v60 = vrot.slane %v4932_v29, %v4689_v49 }
  0x68   :  { %v638_v63 = vmul.f32 %v609_v48, %v4618_v55  ;;  %v639_v0 = vmul.f32 %v613_v50, %v4618_v55  ;;  %v640_v2 = vmul.f32 %v617_v51, %v4618_v55  ;;  %v641_v3 = vmul.f32 %v621_v52, %v4618_v55 }
  0x69   :  { %v642_v4 = vmul.f32 %v625_v53, %v4618_v55  ;;  %v643_v9 = vmul.f32 %v629_v57, %v4618_v55  ;;  %v644_v18 = vmul.f32 %v633_v59, %v4618_v55  ;;  %v645_v19 = vmul.f32 %v637_v60, %v4618_v55 }
  0x6a   :  { %v646_v11 = vadd.f32 %v638_v63, %v598_v43  ;;  %v647_v38 = vadd.f32 %v639_v0, %v599_v12  ;;  %v648_v39 = vadd.f32 %v640_v2, %v600_v22  ;;  %v649_v1 = vadd.f32 %v641_v3, %v601_v44 }
  0x6b   :  { %v650_v6 = vadd.f32 %v642_v4, %v602_v45  ;;  %v651_v40 = vadd.f32 %v643_v9, %v603_v47  ;;  %v652_v7 = vadd.f32 %v644_v18, %v604_v10  ;;  %v653_v42 = vadd.f32 %v645_v19, %v605_v33 }
  0x6c   :  { %v657_v48 = vrot.slane %v4918_v21, %v4692_v5  ;;  %v661_v50 = vrot.slane %v4920_v23, %v4692_v5  ;;  %v665_v51 = vrot.slane %v4922_v25, %v4692_v5  ;;  %v669_v52 = vrot.slane %v4924_v20, %v4692_v5 }
  0x6d   :  { %v673_v43 = vrot.slane %v4926_v26, %v4692_v5  ;;  %v677_v12 = vrot.slane %v4928_v27, %v4692_v5  ;;  %v681_v22 = vrot.slane %v4930_v28, %v4692_v5  ;;  %v685_v44 = vrot.slane %v4932_v29, %v4692_v5 }
  0x6e   :  { %v686_v45 = vmul.f32 %v657_v48, %v4621_v56  ;;  %v687_v47 = vmul.f32 %v661_v50, %v4621_v56  ;;  %v688_v10 = vmul.f32 %v665_v51, %v4621_v56  ;;  %v689_v33 = vmul.f32 %v669_v52, %v4621_v56 }
  0x6f   :  { %v690_v53 = vmul.f32 %v673_v43, %v4621_v56  ;;  %v691_v57 = vmul.f32 %v677_v12, %v4621_v56  ;;  %v692_v59 = vmul.f32 %v681_v22, %v4621_v56  ;;  %v693_v60 = vmul.f32 %v685_v44, %v4621_v56 }
  0x70   :  { %v694_v63 = vadd.f32 %v686_v45, %v646_v11  ;;  %v695_v0 = vadd.f32 %v687_v47, %v647_v38  ;;  %v696_v2 = vadd.f32 %v688_v10, %v648_v39  ;;  %v697_v3 = vadd.f32 %v689_v33, %v649_v1 }
  0x71   :  { %v698_v4 = vadd.f32 %v690_v53, %v650_v6  ;;  %v699_v9 = vadd.f32 %v691_v57, %v651_v40  ;;  %v700_v18 = vadd.f32 %v692_v59, %v652_v7  ;;  %v701_v19 = vadd.f32 %v693_v60, %v653_v42 }
  0x72   :  { %v705_v48 = vrot.slane %v4918_v21, %v4776_v30  ;;  %v709_v50 = vrot.slane %v4920_v23, %v4776_v30  ;;  %v713_v51 = vrot.slane %v4922_v25, %v4776_v30  ;;  %v717_v52 = vrot.slane %v4924_v20, %v4776_v30 }
  0x73   :  { %v721_v11 = vrot.slane %v4926_v26, %v4776_v30  ;;  %v725_v38 = vrot.slane %v4928_v27, %v4776_v30  ;;  %v729_v39 = vrot.slane %v4930_v28, %v4776_v30  ;;  %v733_v1 = vrot.slane %v4932_v29, %v4776_v30 }
  0x74   :  { %v734_v6 = vmul.f32 %v705_v48, %v4631_v62  ;;  %v735_v40 = vmul.f32 %v709_v50, %v4631_v62  ;;  %v736_v7 = vmul.f32 %v713_v51, %v4631_v62  ;;  %v737_v42 = vmul.f32 %v717_v52, %v4631_v62 }
  0x75   :  { %v738_v43 = vmul.f32 %v721_v11, %v4631_v62  ;;  %v739_v12 = vmul.f32 %v725_v38, %v4631_v62  ;;  %v740_v22 = vmul.f32 %v729_v39, %v4631_v62  ;;  %v741_v44 = vmul.f32 %v733_v1, %v4631_v62 }
  0x76   :  { %v742_v45 = vadd.f32 %v734_v6, %v694_v63  ;;  %v743_v47 = vadd.f32 %v735_v40, %v695_v0  ;;  %v744_v10 = vadd.f32 %v736_v7, %v696_v2  ;;  %v745_v33 = vadd.f32 %v737_v42, %v697_v3 }
  0x77   :  { %v746_v53 = vadd.f32 %v738_v43, %v698_v4  ;;  %v747_v57 = vadd.f32 %v739_v12, %v699_v9  ;;  %v748_v59 = vadd.f32 %v740_v22, %v700_v18  ;;  %v749_v60 = vadd.f32 %v741_v44, %v701_v19 }
  0x78   :  { %v753_v48 = vrot.slane %v4918_v21, %v4779_v31  ;;  %v757_v50 = vrot.slane %v4920_v23, %v4779_v31  ;;  %v761_v51 = vrot.slane %v4922_v25, %v4779_v31  ;;  %v765_v52 = vrot.slane %v4924_v20, %v4779_v31 }
  0x79   :  { %v769_v63 = vrot.slane %v4926_v26, %v4779_v31  ;;  %v773_v0 = vrot.slane %v4928_v27, %v4779_v31  ;;  %v777_v2 = vrot.slane %v4930_v28, %v4779_v31  ;;  %v781_v3 = vrot.slane %v4932_v29, %v4779_v31 }
  0x7a   :  { %v782_v4 = vmul.f32 %v753_v48, %v4663_v41  ;;  %v783_v9 = vmul.f32 %v757_v50, %v4663_v41  ;;  %v784_v18 = vmul.f32 %v761_v51, %v4663_v41  ;;  %v785_v19 = vmul.f32 %v765_v52, %v4663_v41 }
  0x7b   :  { %v786_v11 = vmul.f32 %v769_v63, %v4663_v41  ;;  %v787_v38 = vmul.f32 %v773_v0, %v4663_v41  ;;  %v788_v39 = vmul.f32 %v777_v2, %v4663_v41  ;;  %v789_v1 = vmul.f32 %v781_v3, %v4663_v41 }
  0x7c   :  { %v790_v6 = vadd.f32 %v782_v4, %v742_v45  ;;  %v791_v40 = vadd.f32 %v783_v9, %v743_v47  ;;  %v792_v7 = vadd.f32 %v784_v18, %v744_v10  ;;  %v793_v42 = vadd.f32 %v785_v19, %v745_v33 }
  0x7d   :  { %v794_v43 = vadd.f32 %v786_v11, %v746_v53  ;;  %v795_v12 = vadd.f32 %v787_v38, %v747_v57  ;;  %v796_v22 = vadd.f32 %v788_v39, %v748_v59  ;;  %v797_v44 = vadd.f32 %v789_v1, %v749_v60 }
  0x7e   :  { %v801_v48 = vrot.slane %v4918_v21, %v4782_v32  ;;  %v805_v50 = vrot.slane %v4920_v23, %v4782_v32  ;;  %v809_v51 = vrot.slane %v4922_v25, %v4782_v32  ;;  %v813_v52 = vrot.slane %v4924_v20, %v4782_v32 }
  0x7f   :  { %v817_v45 = vrot.slane %v4926_v26, %v4782_v32  ;;  %v821_v47 = vrot.slane %v4928_v27, %v4782_v32  ;;  %v825_v10 = vrot.slane %v4930_v28, %v4782_v32  ;;  %v829_v33 = vrot.slane %v4932_v29, %v4782_v32 }
  0x80   :  { %v830_v53 = vmul.f32 %v801_v48, %v4679_v46  ;;  %v831_v57 = vmul.f32 %v805_v50, %v4679_v46  ;;  %v832_v59 = vmul.f32 %v809_v51, %v4679_v46  ;;  %v833_v60 = vmul.f32 %v813_v52, %v4679_v46 }
  0x81   :  { %v834_v63 = vmul.f32 %v817_v45, %v4679_v46  ;;  %v835_v0 = vmul.f32 %v821_v47, %v4679_v46  ;;  %v836_v2 = vmul.f32 %v825_v10, %v4679_v46  ;;  %v837_v3 = vmul.f32 %v829_v33, %v4679_v46 }
  0x82   :  { %v838_v4 = vadd.f32 %v830_v53, %v790_v6  ;;  %v839_v9 = vadd.f32 %v831_v57, %v791_v40  ;;  %v840_v18 = vadd.f32 %v832_v59, %v792_v7  ;;  %v841_v19 = vadd.f32 %v833_v60, %v793_v42 }
  0x83   :  { %v842_v11 = vadd.f32 %v834_v63, %v794_v43  ;;  %v843_v38 = vadd.f32 %v835_v0, %v795_v12  ;;  %v844_v39 = vadd.f32 %v836_v2, %v796_v22  ;;  %v845_v1 = vadd.f32 %v837_v3, %v797_v44 }
  0x84   :  { %v849_v48 = vrot.slane %v4918_v21, %v4785_v34  ;;  %v853_v50 = vrot.slane %v4920_v23, %v4785_v34  ;;  %v857_v51 = vrot.slane %v4922_v25, %v4785_v34  ;;  %v861_v52 = vrot.slane %v4924_v20, %v4785_v34 }
  0x85   :  { %v865_v6 = vrot.slane %v4926_v26, %v4785_v34  ;;  %v869_v40 = vrot.slane %v4928_v27, %v4785_v34  ;;  %v873_v7 = vrot.slane %v4930_v28, %v4785_v34  ;;  %v877_v42 = vrot.slane %v4932_v29, %v4785_v34 }
  0x86   :  { %v878_v43 = vmul.f32 %v849_v48, %v4701_v54  ;;  %v879_v12 = vmul.f32 %v853_v50, %v4701_v54  ;;  %v880_v22 = vmul.f32 %v857_v51, %v4701_v54  ;;  %v881_v44 = vmul.f32 %v861_v52, %v4701_v54 }
  0x87   :  { %v882_v45 = vmul.f32 %v865_v6, %v4701_v54  ;;  %v883_v47 = vmul.f32 %v869_v40, %v4701_v54  ;;  %v884_v10 = vmul.f32 %v873_v7, %v4701_v54  ;;  %v885_v33 = vmul.f32 %v877_v42, %v4701_v54 }
  0x88   :  { %v886_v53 = vadd.f32 %v878_v43, %v838_v4  ;;  %v887_v57 = vadd.f32 %v879_v12, %v839_v9  ;;  %v888_v59 = vadd.f32 %v880_v22, %v840_v18  ;;  %v889_v60 = vadd.f32 %v881_v44, %v841_v19 }
  0x89   :  { %v890_v63 = vadd.f32 %v882_v45, %v842_v11  ;;  %v891_v0 = vadd.f32 %v883_v47, %v843_v38  ;;  %v892_v2 = vadd.f32 %v884_v10, %v844_v39  ;;  %v893_v3 = vadd.f32 %v885_v33, %v845_v1 }
  0x8a   :  { %v897_v48 = vrot.slane %v4918_v21, %v4788_v35  ;;  %v901_v50 = vrot.slane %v4920_v23, %v4788_v35  ;;  %v905_v51 = vrot.slane %v4922_v25, %v4788_v35  ;;  %v909_v52 = vrot.slane %v4924_v20, %v4788_v35 }
  0x8b   :  { %v913_v4 = vrot.slane %v4926_v26, %v4788_v35  ;;  %v917_v9 = vrot.slane %v4928_v27, %v4788_v35  ;;  %v921_v18 = vrot.slane %v4930_v28, %v4788_v35  ;;  %v925_v19 = vrot.slane %v4932_v29, %v4788_v35 }
  0x8c   :  { %v926_v11 = vmul.f32 %v897_v48, %v4709_v61  ;;  %v927_v38 = vmul.f32 %v901_v50, %v4709_v61  ;;  %v928_v39 = vmul.f32 %v905_v51, %v4709_v61  ;;  %v929_v1 = vmul.f32 %v909_v52, %v4709_v61 }
  0x8d   :  { %v930_v6 = vmul.f32 %v913_v4, %v4709_v61  ;;  %v931_v40 = vmul.f32 %v917_v9, %v4709_v61  ;;  %v932_v7 = vmul.f32 %v921_v18, %v4709_v61  ;;  %v933_v42 = vmul.f32 %v925_v19, %v4709_v61 }
  0x8e   :  { %v5126_v43 = vadd.f32 %v926_v11, %v886_v53  ;;  %v5128_v12 = vadd.f32 %v927_v38, %v887_v57  ;;  %v5130_v22 = vadd.f32 %v928_v39, %v888_v59  ;;  %v5132_v44 = vadd.f32 %v929_v1, %v889_v60 }
  0x8f   :  { %v5134_v45 = vadd.f32 %v930_v6, %v890_v63  ;;  %v5136_v47 = vadd.f32 %v931_v40, %v891_v0  ;;  %v5138_v10 = vadd.f32 %v932_v7, %v892_v2  ;;  %v5140_v33 = vadd.f32 %v933_v42, %v893_v3 }
  0x90   :  { %v944_v48 = vadd.f32 %v4546_v8, %v4621_v56  ;;  %v945_v53 = vadd.f32 %v4557_v13, %v4631_v62  ;;  %v946_v57 = vadd.f32 %v4564_v15, %v4663_v41  ;;  %v947_v59 = vadd.f32 %v4569_v16, %v4679_v46 }
  0x91   :  { %v948_v60 = vadd.f32 %v4574_v17, %v4701_v54  ;;  %v949_v63 = vadd.f32 %v4676_v14, %v4709_v61  ;;  %v950_v0 = vmul.f32 0.5, %v4918_v21  ;;  %v951_v2 = vmul.f32 0.5, %v4920_v23 }
  0x92   :  { %v952_v8 = vmul.f32 0.5, %v4922_v25  ;;  %v953_v13 = vmul.f32 0.5, %v4924_v20  ;;  %v954_v3 = vmul.f32 0.5, %v4926_v26  ;;  %v955_v15 = vmul.f32 0.5, %v4928_v27 }
  0x93   :  { %v956_v16 = vmul.f32 0.5, %v4930_v28  ;;  %v957_v50 = vmul.f32 0.5, %v4932_v29  ;;  %v958_v17 = vadd.f32 %v950_v0, %v4792_v36  ;;  %v959_v14 = vadd.f32 %v951_v2, %v4796_v37 }
  0x94   :  { %v960_v51 = vadd.f32 %v952_v8, %v944_v48  ;;  %v961_v52 = vadd.f32 %v953_v13, %v945_v53  ;;  %v962_v4 = vadd.f32 %v954_v3, %v946_v57  ;;  %v963_v9 = vadd.f32 %v955_v15, %v947_v59 }
  0x95   :  { %v964_v18 = vadd.f32 %v956_v16, %v948_v60  ;;  %v965_v19 = vadd.f32 %v957_v50, %v949_v63  ;;  %v966_v11 = vmul.f32 0.16666667, %v5126_v43  ;;  %v967_v38 = vmul.f32 0.16666667, %v5128_v12 }
  0x96   :  { %v968_v39 = vmul.f32 0.16666667, %v5130_v22  ;;  %v969_v1 = vmul.f32 0.16666667, %v5132_v44  ;;  %v970_v6 = vmul.f32 0.16666667, %v5134_v45  ;;  %v1025_v36 = vrot.slane %v5126_v43, %v4684_v24 }
  0x97   :  { %v971_v37 = vmul.f32 0.16666667, %v5136_v47  ;;  %v972_v40 = vmul.f32 0.16666667, %v5138_v10  ;;  %v973_v7 = vmul.f32 0.16666667, %v5140_v33  ;;  %v5174_v42 = vadd.f32 %v966_v11, %v958_v17 }
  0x98   :  { %v5176_v48 = vadd.f32 %v967_v38, %v959_v14  ;;  %v5178_v53 = vadd.f32 %v968_v39, %v960_v51  ;;  %v5180_v57 = vadd.f32 %v969_v1, %v961_v52  ;;  %v5182_v59 = vadd.f32 %v970_v6, %v962_v4 }
  0x99   :  { %v5184_v60 = vadd.f32 %v971_v37, %v963_v9  ;;  %v5186_v63 = vadd.f32 %v972_v40, %v964_v18  ;;  %v5188_v0 = vadd.f32 %v973_v7, %v965_v19  ;;  %v982_v2 = vmul.f32 0.041666668, %v4625_v58 }
  0x9a   :  { %v983_v8 = vmul.f32 0.041666668, %v4618_v55  ;;  %v984_v13 = vmul.f32 0.041666668, %v4621_v56  ;;  %v985_v3 = vmul.f32 0.041666668, %v4631_v62  ;;  %v1029_v15 = vrot.slane %v5128_v12, %v4684_v24 }
  0x9b   :  { %v986_v16 = vmul.f32 0.041666668, %v4663_v41  ;;  %v987_v50 = vmul.f32 0.041666668, %v4679_v46  ;;  %v988_v17 = vmul.f32 0.041666668, %v4701_v54  ;;  %v1033_v14 = vrot.slane %v5130_v22, %v4684_v24 }
  0x9c   :  { %v989_v58 = vmul.f32 0.041666668, %v4709_v61  ;;  %v990_v55 = vmul.f32 0.008333334, %v4918_v21  ;;  %v991_v56 = vmul.f32 0.008333334, %v4920_v23  ;;  %v1037_v62 = vrot.slane %v5132_v44, %v4684_v24 }
  0x9d   :  { %v992_v51 = vmul.f32 0.008333334, %v4922_v25  ;;  %v993_v41 = vmul.f32 0.008333334, %v4924_v20  ;;  %v994_v46 = vmul.f32 0.008333334, %v4926_v26  ;;  %v1041_v54 = vrot.slane %v5134_v45, %v4684_v24 }
  0x9e   :  { %v995_v52 = vmul.f32 0.008333334, %v4928_v27  ;;  %v996_v61 = vmul.f32 0.008333334, %v4930_v28  ;;  %v997_v21 = vmul.f32 0.008333334, %v4932_v29  ;;  %v998_v4 = vadd.f32 %v990_v55, %v982_v2 }
  0x9f   :  { %v999_v23 = vadd.f32 %v991_v56, %v983_v8  ;;  %v1000_v9 = vadd.f32 %v992_v51, %v984_v13  ;;  %v1001_v18 = vadd.f32 %v993_v41, %v985_v3  ;;  %v1002_v19 = vadd.f32 %v994_v46, %v986_v16 }
  0xa0   :  { %v1003_v11 = vadd.f32 %v995_v52, %v987_v50  ;;  %v1004_v25 = vadd.f32 %v996_v61, %v988_v17  ;;  %v1005_v38 = vadd.f32 %v997_v21, %v989_v58  ;;  %v1006_v20 = vmul.f32 0.0013888889, %v5126_v43 }
  0xa1   :  { %v1007_v26 = vmul.f32 0.0013888889, %v5128_v12  ;;  %v1008_v39 = vmul.f32 0.0013888889, %v5130_v22  ;;  %v1009_v27 = vmul.f32 0.0013888889, %v5132_v44  ;;  %v1045_v28 = vrot.slane %v5136_v47, %v4684_v24 }
  0xa2   :  { %v1010_v29 = vmul.f32 0.0013888889, %v5134_v45  ;;  %v1011_v1 = vmul.f32 0.0013888889, %v5136_v47  ;;  %v1012_v6 = vmul.f32 0.0013888889, %v5138_v10  ;;  %v1014_v37 = vadd.f32 %v1006_v20, %v998_v4 }
  0xa3   :  { %v1013_v40 = vmul.f32 0.0013888889, %v5140_v33  ;;  %v1015_v7 = vadd.f32 %v1007_v26, %v999_v23  ;;  %v1016_v2 = vadd.f32 %v1008_v39, %v1000_v9  ;;  %v5224_v8 = vadd.f32 %v1009_v27, %v1001_v18 }
  0xa4   :  { %v5226_v13 = vadd.f32 %v1010_v29, %v1002_v19  ;;  %v5228_v3 = vadd.f32 %v1011_v1, %v1003_v11  ;;  %v5230_v16 = vadd.f32 %v1012_v6, %v1004_v25  ;;  %v1049_v50 = vrot.slane %v5138_v10, %v4684_v24 }
  0xa5   :  { %v5234_v17 = vadd.f32 %v1013_v40, %v1005_v38  ;;  %v1053_v58 = vrot.slane %v5140_v33, %v4684_v24  ;;  %v1054_v55 = vmul.f32 %v1025_v36, %v1014_v37  ;;  %v1055_v56 = vmul.f32 %v1029_v15, %v1014_v37 }
  0xa6   :  { %v1056_v51 = vmul.f32 %v1033_v14, %v1014_v37  ;;  %v1057_v41 = vmul.f32 %v1037_v62, %v1014_v37  ;;  %v1058_v46 = vmul.f32 %v1041_v54, %v1014_v37  ;;  %v1059_v52 = vmul.f32 %v1045_v28, %v1014_v37 }
  0xa7   :  { %v1060_v61 = vmul.f32 %v1049_v50, %v1014_v37  ;;  %v1061_v21 = vmul.f32 %v1053_v58, %v1014_v37  ;;  %v1065_v4 = vrot.slane %v5126_v43, %v4689_v49  ;;  %v1069_v23 = vrot.slane %v5128_v12, %v4689_v49 }
  0xa8   :  { %v1073_v9 = vrot.slane %v5130_v22, %v4689_v49  ;;  %v1077_v18 = vrot.slane %v5132_v44, %v4689_v49  ;;  %v1081_v36 = vrot.slane %v5134_v45, %v4689_v49  ;;  %v1085_v15 = vrot.slane %v5136_v47, %v4689_v49 }
  0xa9   :  { %v1089_v14 = vrot.slane %v5138_v10, %v4689_v49  ;;  %v1093_v62 = vrot.slane %v5140_v33, %v4689_v49  ;;  %v1094_v54 = vmul.f32 %v1065_v4, %v1015_v7  ;;  %v1095_v19 = vmul.f32 %v1069_v23, %v1015_v7 }
  0xaa   :  { %v1096_v11 = vmul.f32 %v1073_v9, %v1015_v7  ;;  %v1097_v25 = vmul.f32 %v1077_v18, %v1015_v7  ;;  %v1098_v38 = vmul.f32 %v1081_v36, %v1015_v7  ;;  %v1099_v20 = vmul.f32 %v1085_v15, %v1015_v7 }
  0xab   :  { %v1100_v26 = vmul.f32 %v1089_v14, %v1015_v7  ;;  %v1101_v39 = vmul.f32 %v1093_v62, %v1015_v7  ;;  %v1102_v27 = vadd.f32 %v1094_v54, %v1054_v55  ;;  %v1103_v28 = vadd.f32 %v1095_v19, %v1055_v56 }
  0xac   :  { %v1104_v29 = vadd.f32 %v1096_v11, %v1056_v51  ;;  %v1105_v1 = vadd.f32 %v1097_v25, %v1057_v41  ;;  %v1106_v6 = vadd.f32 %v1098_v38, %v1058_v46  ;;  %v1107_v37 = vadd.f32 %v1099_v20, %v1059_v52 }
  0xad   :  { %v1108_v40 = vadd.f32 %v1100_v26, %v1060_v61  ;;  %v1109_v50 = vadd.f32 %v1101_v39, %v1061_v21  ;;  %v1113_v58 = vrot.slane %v5126_v43, %v4692_v5  ;;  %v1117_v4 = vrot.slane %v5128_v12, %v4692_v5 }
  0xae   :  { %v1121_v23 = vrot.slane %v5130_v22, %v4692_v5  ;;  %v1125_v7 = vrot.slane %v5132_v44, %v4692_v5  ;;  %v1129_v55 = vrot.slane %v5134_v45, %v4692_v5  ;;  %v1133_v56 = vrot.slane %v5136_v47, %v4692_v5 }
  0xaf   :  { %v1137_v51 = vrot.slane %v5138_v10, %v4692_v5  ;;  %v1141_v41 = vrot.slane %v5140_v33, %v4692_v5  ;;  %v1142_v46 = vmul.f32 %v1113_v58, %v1016_v2  ;;  %v1143_v52 = vmul.f32 %v1117_v4, %v1016_v2 }
  0xb0   :  { %v1144_v61 = vmul.f32 %v1121_v23, %v1016_v2  ;;  %v1145_v21 = vmul.f32 %v1125_v7, %v1016_v2  ;;  %v1146_v9 = vmul.f32 %v1129_v55, %v1016_v2  ;;  %v1147_v18 = vmul.f32 %v1133_v56, %v1016_v2 }
  0xb1   :  { %v1148_v36 = vmul.f32 %v1137_v51, %v1016_v2  ;;  %v1149_v15 = vmul.f32 %v1141_v41, %v1016_v2  ;;  %v1150_v14 = vadd.f32 %v1142_v46, %v1102_v27  ;;  %v1151_v62 = vadd.f32 %v1143_v52, %v1103_v28 }
  0xb2   :  { %v1152_v54 = vadd.f32 %v1144_v61, %v1104_v29  ;;  %v1153_v19 = vadd.f32 %v1145_v21, %v1105_v1  ;;  %v1154_v11 = vadd.f32 %v1146_v9, %v1106_v6  ;;  %v1155_v25 = vadd.f32 %v1147_v18, %v1107_v37 }
  0xb3   :  { %v1156_v38 = vadd.f32 %v1148_v36, %v1108_v40  ;;  %v1157_v20 = vadd.f32 %v1149_v15, %v1109_v50  ;;  %v1161_v26 = vrot.slane %v5126_v43, %v4776_v30  ;;  %v1165_v39 = vrot.slane %v5128_v12, %v4776_v30 }
  0xb4   :  { %v1169_v58 = vrot.slane %v5130_v22, %v4776_v30  ;;  %v1173_v2 = vrot.slane %v5132_v44, %v4776_v30  ;;  %v1177_v27 = vrot.slane %v5134_v45, %v4776_v30  ;;  %v1181_v28 = vrot.slane %v5136_v47, %v4776_v30 }
  0xb5   :  { %v1185_v29 = vrot.slane %v5138_v10, %v4776_v30  ;;  %v1189_v1 = vrot.slane %v5140_v33, %v4776_v30  ;;  %v1190_v6 = vmul.f32 %v1161_v26, %v5224_v8  ;;  %v1191_v37 = vmul.f32 %v1165_v39, %v5224_v8 }
  0xb6   :  { %v1192_v40 = vmul.f32 %v1169_v58, %v5224_v8  ;;  %v1193_v50 = vmul.f32 %v1173_v2, %v5224_v8  ;;  %v1194_v4 = vmul.f32 %v1177_v27, %v5224_v8  ;;  %v1195_v23 = vmul.f32 %v1181_v28, %v5224_v8 }
  0xb7   :  { %v1196_v7 = vmul.f32 %v1185_v29, %v5224_v8  ;;  %v1197_v55 = vmul.f32 %v1189_v1, %v5224_v8  ;;  %v1198_v56 = vadd.f32 %v1190_v6, %v1150_v14  ;;  %v1199_v51 = vadd.f32 %v1191_v37, %v1151_v62 }
  0xb8   :  { %v1200_v41 = vadd.f32 %v1192_v40, %v1152_v54  ;;  %v1201_v46 = vadd.f32 %v1193_v50, %v1153_v19  ;;  %v1202_v52 = vadd.f32 %v1194_v4, %v1154_v11  ;;  %v1203_v61 = vadd.f32 %v1195_v23, %v1155_v25 }
  0xb9   :  { %v1204_v21 = vadd.f32 %v1196_v7, %v1156_v38  ;;  %v1205_v9 = vadd.f32 %v1197_v55, %v1157_v20  ;;  %v1209_v18 = vrot.slane %v5126_v43, %v4779_v31  ;;  %v1213_v36 = vrot.slane %v5128_v12, %v4779_v31 }
  0xba   :  { %v1217_v15 = vrot.slane %v5130_v22, %v4779_v31  ;;  %v1221_v8 = vrot.slane %v5132_v44, %v4779_v31  ;;  %v1225_v14 = vrot.slane %v5134_v45, %v4779_v31  ;;  %v1229_v62 = vrot.slane %v5136_v47, %v4779_v31 }
  0xbb   :  { %v1233_v54 = vrot.slane %v5138_v10, %v4779_v31  ;;  %v1237_v19 = vrot.slane %v5140_v33, %v4779_v31  ;;  %v1238_v11 = vmul.f32 %v1209_v18, %v5226_v13  ;;  %v1239_v25 = vmul.f32 %v1213_v36, %v5226_v13 }
  0xbc   :  { %v1240_v38 = vmul.f32 %v1217_v15, %v5226_v13  ;;  %v1241_v20 = vmul.f32 %v1221_v8, %v5226_v13  ;;  %v1242_v26 = vmul.f32 %v1225_v14, %v5226_v13  ;;  %v1243_v39 = vmul.f32 %v1229_v62, %v5226_v13 }
  0xbd   :  { %v1244_v58 = vmul.f32 %v1233_v54, %v5226_v13  ;;  %v1245_v2 = vmul.f32 %v1237_v19, %v5226_v13  ;;  %v1246_v27 = vadd.f32 %v1238_v11, %v1198_v56  ;;  %v1247_v28 = vadd.f32 %v1239_v25, %v1199_v51 }
  0xbe   :  { %v1248_v29 = vadd.f32 %v1240_v38, %v1200_v41  ;;  %v1249_v1 = vadd.f32 %v1241_v20, %v1201_v46  ;;  %v1250_v6 = vadd.f32 %v1242_v26, %v1202_v52  ;;  %v1251_v37 = vadd.f32 %v1243_v39, %v1203_v61 }
  0xbf   :  { %v1252_v40 = vadd.f32 %v1244_v58, %v1204_v21  ;;  %v1253_v50 = vadd.f32 %v1245_v2, %v1205_v9  ;;  %v1257_v4 = vrot.slane %v5126_v43, %v4782_v32  ;;  %v1261_v23 = vrot.slane %v5128_v12, %v4782_v32 }
  0xc0   :  { %v1265_v7 = vrot.slane %v5130_v22, %v4782_v32  ;;  %v1269_v13 = vrot.slane %v5132_v44, %v4782_v32  ;;  %v1273_v55 = vrot.slane %v5134_v45, %v4782_v32  ;;  %v1277_v56 = vrot.slane %v5136_v47, %v4782_v32 }
  0xc1   :  { %v1281_v51 = vrot.slane %v5138_v10, %v4782_v32  ;;  %v1285_v41 = vrot.slane %v5140_v33, %v4782_v32  ;;  %v1286_v46 = vmul.f32 %v1257_v4, %v5228_v3  ;;  %v1287_v52 = vmul.f32 %v1261_v23, %v5228_v3 }
  0xc2   :  { %v1288_v61 = vmul.f32 %v1265_v7, %v5228_v3  ;;  %v1289_v21 = vmul.f32 %v1269_v13, %v5228_v3  ;;  %v1290_v9 = vmul.f32 %v1273_v55, %v5228_v3  ;;  %v1291_v18 = vmul.f32 %v1277_v56, %v5228_v3 }
  0xc3   :  { %v1292_v36 = vmul.f32 %v1281_v51, %v5228_v3  ;;  %v1293_v15 = vmul.f32 %v1285_v41, %v5228_v3  ;;  %v1294_v8 = vadd.f32 %v1286_v46, %v1246_v27  ;;  %v1295_v14 = vadd.f32 %v1287_v52, %v1247_v28 }
  0xc4   :  { %v1296_v62 = vadd.f32 %v1288_v61, %v1248_v29  ;;  %v1297_v54 = vadd.f32 %v1289_v21, %v1249_v1  ;;  %v1298_v19 = vadd.f32 %v1290_v9, %v1250_v6  ;;  %v1299_v11 = vadd.f32 %v1291_v18, %v1251_v37 }
  0xc5   :  { %v1300_v25 = vadd.f32 %v1292_v36, %v1252_v40  ;;  %v1301_v38 = vadd.f32 %v1293_v15, %v1253_v50  ;;  %v1305_v20 = vrot.slane %v5126_v43, %v4785_v34  ;;  %v1309_v26 = vrot.slane %v5128_v12, %v4785_v34 }
  0xc6   :  { %v1313_v39 = vrot.slane %v5130_v22, %v4785_v34  ;;  %v1317_v3 = vrot.slane %v5132_v44, %v4785_v34  ;;  %v1321_v58 = vrot.slane %v5134_v45, %v4785_v34  ;;  %v1325_v2 = vrot.slane %v5136_v47, %v4785_v34 }
  0xc7   :  { %v1329_v27 = vrot.slane %v5138_v10, %v4785_v34  ;;  %v1333_v28 = vrot.slane %v5140_v33, %v4785_v34  ;;  %v1334_v29 = vmul.f32 %v1305_v20, %v5230_v16  ;;  %v1335_v1 = vmul.f32 %v1309_v26, %v5230_v16 }
  0xc8   :  { %v1336_v6 = vmul.f32 %v1313_v39, %v5230_v16  ;;  %v1337_v37 = vmul.f32 %v1317_v3, %v5230_v16  ;;  %v1338_v40 = vmul.f32 %v1321_v58, %v5230_v16  ;;  %v1339_v50 = vmul.f32 %v1325_v2, %v5230_v16 }
  0xc9   :  { %v1340_v4 = vmul.f32 %v1329_v27, %v5230_v16  ;;  %v1341_v23 = vmul.f32 %v1333_v28, %v5230_v16  ;;  %v1342_v7 = vadd.f32 %v1334_v29, %v1294_v8  ;;  %v1343_v13 = vadd.f32 %v1335_v1, %v1295_v14 }
  0xca   :  { %v1344_v55 = vadd.f32 %v1336_v6, %v1296_v62  ;;  %v1345_v56 = vadd.f32 %v1337_v37, %v1297_v54  ;;  %v1346_v51 = vadd.f32 %v1338_v40, %v1298_v19  ;;  %v1347_v41 = vadd.f32 %v1339_v50, %v1299_v11 }
  0xcb   :  { %v1348_v46 = vadd.f32 %v1340_v4, %v1300_v25  ;;  %v1349_v52 = vadd.f32 %v1341_v23, %v1301_v38  ;;  %v1353_v61 = vrot.slane %v5126_v43, %v4788_v35  ;;  %v1357_v21 = vrot.slane %v5128_v12, %v4788_v35 }
  0xcc   :  { %v1361_v9 = vrot.slane %v5130_v22, %v4788_v35  ;;  %v1365_v16 = vrot.slane %v5132_v44, %v4788_v35  ;;  %v1369_v18 = vrot.slane %v5134_v45, %v4788_v35  ;;  %v1373_v36 = vrot.slane %v5136_v47, %v4788_v35 }
  0xcd   :  { %v1377_v15 = vrot.slane %v5138_v10, %v4788_v35  ;;  %v1381_v43 = vrot.slane %v5140_v33, %v4788_v35  ;;  %v1382_v12 = vmul.f32 %v1353_v61, %v5234_v17  ;;  %v1383_v8 = vmul.f32 %v1357_v21, %v5234_v17 }
  0xce   :  { %v1384_v22 = vmul.f32 %v1361_v9, %v5234_v17  ;;  %v1385_v44 = vmul.f32 %v1365_v16, %v5234_v17  ;;  %v1386_v14 = vmul.f32 %v1369_v18, %v5234_v17  ;;  %v1387_v45 = vmul.f32 %v1373_v36, %v5234_v17 }
  0xcf   :  { %v1388_v47 = vmul.f32 %v1377_v15, %v5234_v17  ;;  %v1389_v62 = vmul.f32 %v1381_v43, %v5234_v17  ;;  %v1390_v10 = vadd.f32 %v1382_v12, %v1342_v7  ;;  %v1391_v54 = vadd.f32 %v1383_v8, %v1343_v13 }
  0xd0   :  { %v1392_v19 = vadd.f32 %v1384_v22, %v1344_v55  ;;  %v1393_v33 = vadd.f32 %v1385_v44, %v1345_v56  ;;  %v1394_v11 = vadd.f32 %v1386_v14, %v1346_v51  ;;  %v1395_v25 = vadd.f32 %v1387_v45, %v1347_v41 }
  0xd1   :  { %v1396_v38 = vadd.f32 %v1388_v47, %v1348_v46  ;;  %v1397_v20 = vadd.f32 %v1389_v62, %v1349_v52  ;;  %v5391_v26 = vadd.f32 %v1390_v10, %v5174_v42  ;;  %v5394_v39 = vadd.f32 %v1391_v54, %v5176_v48 }
  0xd2   :  { %v5397_v3 = vadd.f32 %v1392_v19, %v5178_v53  ;;  %v5400_v58 = vadd.f32 %v1393_v33, %v5180_v57  ;;  %v5403_v17 = vadd.f32 %v1394_v11, %v5182_v59  ;;  %v5406_v2 = vadd.f32 %v1395_v25, %v5184_v60 }
  0xd3   :  { %v5409_v27 = vadd.f32 %v1396_v38, %v5186_v63  ;;  %v5412_v42 = vadd.f32 %v1397_v20, %v5188_v0  ;;  %v1409_v48 = vrot.slane %v5391_v26, %v4684_v24  ;;  %v1413_v53 = vrot.slane %v5394_v39, %v4684_v24 }
  0xd4   :  { %v1417_v57 = vrot.slane %v5397_v3, %v4684_v24  ;;  %v1421_v59 = vrot.slane %v5400_v58, %v4684_v24  ;;  %v1425_v60 = vrot.slane %v5403_v17, %v4684_v24  ;;  %v1429_v63 = vrot.slane %v5406_v2, %v4684_v24 }
  0xd5   :  { %v1433_v0 = vrot.slane %v5409_v27, %v4684_v24  ;;  %v1437_v28 = vrot.slane %v5412_v42, %v4684_v24  ;;  %v1438_v29 = vmul.f32 %v1409_v48, %v5391_v26  ;;  %v1439_v1 = vmul.f32 %v1413_v53, %v5391_v26 }
  0xd6   :  { %v1440_v6 = vmul.f32 %v1417_v57, %v5391_v26  ;;  %v1441_v37 = vmul.f32 %v1421_v59, %v5391_v26  ;;  %v1442_v40 = vmul.f32 %v1425_v60, %v5391_v26  ;;  %v1443_v50 = vmul.f32 %v1429_v63, %v5391_v26 }
  0xd7   :  { %v1444_v4 = vmul.f32 %v1433_v0, %v5391_v26  ;;  %v1445_v23 = vmul.f32 %v1437_v28, %v5391_v26  ;;  %v1449_v7 = vrot.slane %v5391_v26, %v4689_v49  ;;  %v1453_v13 = vrot.slane %v5394_v39, %v4689_v49 }
  0xd8   :  { %v1457_v55 = vrot.slane %v5397_v3, %v4689_v49  ;;  %v1461_v56 = vrot.slane %v5400_v58, %v4689_v49  ;;  %v1465_v51 = vrot.slane %v5403_v17, %v4689_v49  ;;  %v1469_v41 = vrot.slane %v5406_v2, %v4689_v49 }
  0xd9   :  { %v1473_v46 = vrot.slane %v5409_v27, %v4689_v49  ;;  %v1477_v52 = vrot.slane %v5412_v42, %v4689_v49  ;;  %v1478_v61 = vmul.f32 %v1449_v7, %v5394_v39  ;;  %v1479_v21 = vmul.f32 %v1453_v13, %v5394_v39 }
  0xda   :  { %v1480_v9 = vmul.f32 %v1457_v55, %v5394_v39  ;;  %v1481_v16 = vmul.f32 %v1461_v56, %v5394_v39  ;;  %v1482_v18 = vmul.f32 %v1465_v51, %v5394_v39  ;;  %v1483_v36 = vmul.f32 %v1469_v41, %v5394_v39 }
  0xdb   :  { %v1484_v15 = vmul.f32 %v1473_v46, %v5394_v39  ;;  %v1485_v43 = vmul.f32 %v1477_v52, %v5394_v39  ;;  %v1486_v12 = vadd.f32 %v1478_v61, %v1438_v29  ;;  %v1487_v8 = vadd.f32 %v1479_v21, %v1439_v1 }
  0xdc   :  { %v1488_v22 = vadd.f32 %v1480_v9, %v1440_v6  ;;  %v1489_v44 = vadd.f32 %v1481_v16, %v1441_v37  ;;  %v1490_v14 = vadd.f32 %v1482_v18, %v1442_v40  ;;  %v1491_v45 = vadd.f32 %v1483_v36, %v1443_v50 }
  0xdd   :  { %v1492_v47 = vadd.f32 %v1484_v15, %v1444_v4  ;;  %v1493_v62 = vadd.f32 %v1485_v43, %v1445_v23  ;;  %v1497_v10 = vrot.slane %v5391_v26, %v4692_v5  ;;  %v1501_v54 = vrot.slane %v5394_v39, %v4692_v5 }
  0xde   :  { %v1505_v19 = vrot.slane %v5397_v3, %v4692_v5  ;;  %v1509_v33 = vrot.slane %v5400_v58, %v4692_v5  ;;  %v1513_v11 = vrot.slane %v5403_v17, %v4692_v5  ;;  %v1517_v25 = vrot.slane %v5406_v2, %v4692_v5 }
  0xdf   :  { %v1521_v38 = vrot.slane %v5409_v27, %v4692_v5  ;;  %v1525_v20 = vrot.slane %v5412_v42, %v4692_v5  ;;  %v1526_v48 = vmul.f32 %v1497_v10, %v5397_v3  ;;  %v1527_v53 = vmul.f32 %v1501_v54, %v5397_v3 }
  0xe0   :  { %v1528_v57 = vmul.f32 %v1505_v19, %v5397_v3  ;;  %v1529_v59 = vmul.f32 %v1509_v33, %v5397_v3  ;;  %v1530_v60 = vmul.f32 %v1513_v11, %v5397_v3  ;;  %v1531_v63 = vmul.f32 %v1517_v25, %v5397_v3 }
  0xe1   :  { %v1532_v0 = vmul.f32 %v1521_v38, %v5397_v3  ;;  %v1533_v28 = vmul.f32 %v1525_v20, %v5397_v3  ;;  %v1534_v29 = vadd.f32 %v1526_v48, %v1486_v12  ;;  %v1535_v1 = vadd.f32 %v1527_v53, %v1487_v8 }
  0xe2   :  { %v1536_v6 = vadd.f32 %v1528_v57, %v1488_v22  ;;  %v1537_v37 = vadd.f32 %v1529_v59, %v1489_v44  ;;  %v1538_v40 = vadd.f32 %v1530_v60, %v1490_v14  ;;  %v1539_v50 = vadd.f32 %v1531_v63, %v1491_v45 }
  0xe3   :  { %v1540_v4 = vadd.f32 %v1532_v0, %v1492_v47  ;;  %v1541_v23 = vadd.f32 %v1533_v28, %v1493_v62  ;;  %v1545_v7 = vrot.slane %v5391_v26, %v4776_v30  ;;  %v1549_v13 = vrot.slane %v5394_v39, %v4776_v30 }
  0xe4   :  { %v1553_v55 = vrot.slane %v5397_v3, %v4776_v30  ;;  %v1557_v56 = vrot.slane %v5400_v58, %v4776_v30  ;;  %v1561_v51 = vrot.slane %v5403_v17, %v4776_v30  ;;  %v1565_v41 = vrot.slane %v5406_v2, %v4776_v30 }
  0xe5   :  { %v1569_v46 = vrot.slane %v5409_v27, %v4776_v30  ;;  %v1573_v52 = vrot.slane %v5412_v42, %v4776_v30  ;;  %v1574_v61 = vmul.f32 %v1545_v7, %v5400_v58  ;;  %v1575_v21 = vmul.f32 %v1549_v13, %v5400_v58 }
  0xe6   :  { %v1576_v9 = vmul.f32 %v1553_v55, %v5400_v58  ;;  %v1577_v16 = vmul.f32 %v1557_v56, %v5400_v58  ;;  %v1578_v18 = vmul.f32 %v1561_v51, %v5400_v58  ;;  %v1579_v36 = vmul.f32 %v1565_v41, %v5400_v58 }
  0xe7   :  { %v1580_v15 = vmul.f32 %v1569_v46, %v5400_v58  ;;  %v1581_v43 = vmul.f32 %v1573_v52, %v5400_v58  ;;  %v1582_v12 = vadd.f32 %v1574_v61, %v1534_v29  ;;  %v1583_v8 = vadd.f32 %v1575_v21, %v1535_v1 }
  0xe8   :  { %v1584_v22 = vadd.f32 %v1576_v9, %v1536_v6  ;;  %v1585_v44 = vadd.f32 %v1577_v16, %v1537_v37  ;;  %v1586_v14 = vadd.f32 %v1578_v18, %v1538_v40  ;;  %v1587_v45 = vadd.f32 %v1579_v36, %v1539_v50 }
  0xe9   :  { %v1588_v47 = vadd.f32 %v1580_v15, %v1540_v4  ;;  %v1589_v62 = vadd.f32 %v1581_v43, %v1541_v23  ;;  %v1593_v10 = vrot.slane %v5391_v26, %v4779_v31  ;;  %v1597_v54 = vrot.slane %v5394_v39, %v4779_v31 }
  0xea   :  { %v1601_v19 = vrot.slane %v5397_v3, %v4779_v31  ;;  %v1605_v33 = vrot.slane %v5400_v58, %v4779_v31  ;;  %v1609_v11 = vrot.slane %v5403_v17, %v4779_v31  ;;  %v1613_v25 = vrot.slane %v5406_v2, %v4779_v31 }
  0xeb   :  { %v1617_v38 = vrot.slane %v5409_v27, %v4779_v31  ;;  %v1621_v20 = vrot.slane %v5412_v42, %v4779_v31  ;;  %v1622_v48 = vmul.f32 %v1593_v10, %v5403_v17  ;;  %v1623_v53 = vmul.f32 %v1597_v54, %v5403_v17 }
  0xec   :  { %v1624_v57 = vmul.f32 %v1601_v19, %v5403_v17  ;;  %v1625_v59 = vmul.f32 %v1605_v33, %v5403_v17  ;;  %v1626_v60 = vmul.f32 %v1609_v11, %v5403_v17  ;;  %v1627_v63 = vmul.f32 %v1613_v25, %v5403_v17 }
  0xed   :  { %v1628_v0 = vmul.f32 %v1617_v38, %v5403_v17  ;;  %v1629_v28 = vmul.f32 %v1621_v20, %v5403_v17  ;;  %v1630_v29 = vadd.f32 %v1622_v48, %v1582_v12  ;;  %v1631_v1 = vadd.f32 %v1623_v53, %v1583_v8 }
  0xee   :  { %v1632_v6 = vadd.f32 %v1624_v57, %v1584_v22  ;;  %v1633_v37 = vadd.f32 %v1625_v59, %v1585_v44  ;;  %v1634_v40 = vadd.f32 %v1626_v60, %v1586_v14  ;;  %v1635_v50 = vadd.f32 %v1627_v63, %v1587_v45 }
  0xef   :  { %v1636_v4 = vadd.f32 %v1628_v0, %v1588_v47  ;;  %v1637_v23 = vadd.f32 %v1629_v28, %v1589_v62  ;;  %v1641_v7 = vrot.slane %v5391_v26, %v4782_v32  ;;  %v1645_v13 = vrot.slane %v5394_v39, %v4782_v32 }
  0xf0   :  { %v1649_v55 = vrot.slane %v5397_v3, %v4782_v32  ;;  %v1653_v56 = vrot.slane %v5400_v58, %v4782_v32  ;;  %v1657_v51 = vrot.slane %v5403_v17, %v4782_v32  ;;  %v1661_v41 = vrot.slane %v5406_v2, %v4782_v32 }
  0xf1   :  { %v1665_v46 = vrot.slane %v5409_v27, %v4782_v32  ;;  %v1669_v52 = vrot.slane %v5412_v42, %v4782_v32  ;;  %v1670_v61 = vmul.f32 %v1641_v7, %v5406_v2  ;;  %v1671_v21 = vmul.f32 %v1645_v13, %v5406_v2 }
  0xf2   :  { %v1672_v9 = vmul.f32 %v1649_v55, %v5406_v2  ;;  %v1673_v16 = vmul.f32 %v1653_v56, %v5406_v2  ;;  %v1674_v18 = vmul.f32 %v1657_v51, %v5406_v2  ;;  %v1675_v36 = vmul.f32 %v1661_v41, %v5406_v2 }
  0xf3   :  { %v1676_v15 = vmul.f32 %v1665_v46, %v5406_v2  ;;  %v1677_v43 = vmul.f32 %v1669_v52, %v5406_v2  ;;  %v1678_v12 = vadd.f32 %v1670_v61, %v1630_v29  ;;  %v1679_v8 = vadd.f32 %v1671_v21, %v1631_v1 }
  0xf4   :  { %v1680_v22 = vadd.f32 %v1672_v9, %v1632_v6  ;;  %v1681_v44 = vadd.f32 %v1673_v16, %v1633_v37  ;;  %v1682_v14 = vadd.f32 %v1674_v18, %v1634_v40  ;;  %v1683_v45 = vadd.f32 %v1675_v36, %v1635_v50 }
  0xf5   :  { %v1684_v47 = vadd.f32 %v1676_v15, %v1636_v4  ;;  %v1685_v62 = vadd.f32 %v1677_v43, %v1637_v23  ;;  %v1689_v10 = vrot.slane %v5391_v26, %v4785_v34  ;;  %v1693_v54 = vrot.slane %v5394_v39, %v4785_v34 }
  0xf6   :  { %v1697_v19 = vrot.slane %v5397_v3, %v4785_v34  ;;  %v1701_v33 = vrot.slane %v5400_v58, %v4785_v34  ;;  %v1705_v11 = vrot.slane %v5403_v17, %v4785_v34  ;;  %v1709_v25 = vrot.slane %v5406_v2, %v4785_v34 }
  0xf7   :  { %v1713_v38 = vrot.slane %v5409_v27, %v4785_v34  ;;  %v1717_v20 = vrot.slane %v5412_v42, %v4785_v34  ;;  %v1718_v48 = vmul.f32 %v1689_v10, %v5409_v27  ;;  %v1719_v53 = vmul.f32 %v1693_v54, %v5409_v27 }
  0xf8   :  { %v1720_v57 = vmul.f32 %v1697_v19, %v5409_v27  ;;  %v1721_v59 = vmul.f32 %v1701_v33, %v5409_v27  ;;  %v1722_v60 = vmul.f32 %v1705_v11, %v5409_v27  ;;  %v1723_v63 = vmul.f32 %v1709_v25, %v5409_v27 }
  0xf9   :  { %v1724_v0 = vmul.f32 %v1713_v38, %v5409_v27  ;;  %v1725_v28 = vmul.f32 %v1717_v20, %v5409_v27  ;;  %v1726_v29 = vadd.f32 %v1718_v48, %v1678_v12  ;;  %v1727_v1 = vadd.f32 %v1719_v53, %v1679_v8 }
  0xfa   :  { %v1728_v6 = vadd.f32 %v1720_v57, %v1680_v22  ;;  %v1729_v37 = vadd.f32 %v1721_v59, %v1681_v44  ;;  %v1730_v40 = vadd.f32 %v1722_v60, %v1682_v14  ;;  %v1731_v50 = vadd.f32 %v1723_v63, %v1683_v45 }
  0xfb   :  { %v1732_v4 = vadd.f32 %v1724_v0, %v1684_v47  ;;  %v1733_v23 = vadd.f32 %v1725_v28, %v1685_v62  ;;  %v1737_v7 = vrot.slane %v5391_v26, %v4788_v35  ;;  %v1741_v13 = vrot.slane %v5394_v39, %v4788_v35 }
  0xfc   :  { %v1745_v55 = vrot.slane %v5397_v3, %v4788_v35  ;;  %v1749_v56 = vrot.slane %v5400_v58, %v4788_v35  ;;  %v1753_v51 = vrot.slane %v5403_v17, %v4788_v35  ;;  %v1757_v41 = vrot.slane %v5406_v2, %v4788_v35 }
  0xfd   :  { %v1761_v46 = vrot.slane %v5409_v27, %v4788_v35  ;;  %v1765_v26 = vrot.slane %v5412_v42, %v4788_v35  ;;  %v1766_v39 = vmul.f32 %v1737_v7, %v5412_v42  ;;  %v1767_v52 = vmul.f32 %v1741_v13, %v5412_v42 }
  0xfe   :  { %v1768_v3 = vmul.f32 %v1745_v55, %v5412_v42  ;;  %v1769_v58 = vmul.f32 %v1749_v56, %v5412_v42  ;;  %v1770_v61 = vmul.f32 %v1753_v51, %v5412_v42  ;;  %v1771_v17 = vmul.f32 %v1757_v41, %v5412_v42 }
  0xff   :  { %v1772_v2 = vmul.f32 %v1761_v46, %v5412_v42  ;;  %v1773_v21 = vmul.f32 %v1765_v26, %v5412_v42  ;;  %v5606_v27 = vadd.f32 %v1766_v39, %v1726_v29  ;;  %v5608_v9 = vadd.f32 %v1767_v52, %v1727_v1 }
 0x100   :  { %v5610_v16 = vadd.f32 %v1768_v3, %v1728_v6  ;;  %v5612_v18 = vadd.f32 %v1769_v58, %v1729_v37  ;;  %v5614_v36 = vadd.f32 %v1770_v61, %v1730_v40  ;;  %v5616_v15 = vadd.f32 %v1771_v17, %v1731_v50 }
 0x101   :  { %v5618_v43 = vadd.f32 %v1772_v2, %v1732_v4  ;;  %v5620_v12 = vadd.f32 %v1773_v21, %v1733_v23  ;;  %v1785_v8 = vrot.slane %v5606_v27, %v4684_v24  ;;  %v1789_v42 = vrot.slane %v5608_v9, %v4684_v24 }
 0x102   :  { %v1793_v22 = vrot.slane %v5610_v16, %v4684_v24  ;;  %v1797_v44 = vrot.slane %v5612_v18, %v4684_v24  ;;  %v1801_v14 = vrot.slane %v5614_v36, %v4684_v24  ;;  %v1805_v45 = vrot.slane %v5616_v15, %v4684_v24 }
 0x103   :  { %v1809_v47 = vrot.slane %v5618_v43, %v4684_v24  ;;  %v1813_v62 = vrot.slane %v5620_v12, %v4684_v24  ;;  %v1814_v10 = vmul.f32 %v1785_v8, %v5606_v27  ;;  %v1815_v54 = vmul.f32 %v1789_v42, %v5606_v27 }
 0x104   :  { %v1816_v19 = vmul.f32 %v1793_v22, %v5606_v27  ;;  %v1817_v33 = vmul.f32 %v1797_v44, %v5606_v27  ;;  %v1818_v11 = vmul.f32 %v1801_v14, %v5606_v27  ;;  %v1819_v25 = vmul.f32 %v1805_v45, %v5606_v27 }
 0x105   :  { %v1820_v38 = vmul.f32 %v1809_v47, %v5606_v27  ;;  %v1821_v20 = vmul.f32 %v1813_v62, %v5606_v27  ;;  %v1825_v48 = vrot.slane %v5606_v27, %v4689_v49  ;;  %v1829_v53 = vrot.slane %v5608_v9, %v4689_v49 }
 0x106   :  { %v1833_v57 = vrot.slane %v5610_v16, %v4689_v49  ;;  %v1837_v59 = vrot.slane %v5612_v18, %v4689_v49  ;;  %v1841_v60 = vrot.slane %v5614_v36, %v4689_v49  ;;  %v1845_v63 = vrot.slane %v5616_v15, %v4689_v49 }
 0x107   :  { %v1849_v0 = vrot.slane %v5618_v43, %v4689_v49  ;;  %v1853_v28 = vrot.slane %v5620_v12, %v4689_v49  ;;  %v1854_v29 = vmul.f32 %v1825_v48, %v5608_v9  ;;  %v1855_v1 = vmul.f32 %v1829_v53, %v5608_v9 }
 0x108   :  { %v1856_v6 = vmul.f32 %v1833_v57, %v5608_v9  ;;  %v1857_v37 = vmul.f32 %v1837_v59, %v5608_v9  ;;  %v1858_v40 = vmul.f32 %v1841_v60, %v5608_v9  ;;  %v1859_v50 = vmul.f32 %v1845_v63, %v5608_v9 }
 0x109   :  { %v1860_v4 = vmul.f32 %v1849_v0, %v5608_v9  ;;  %v1861_v23 = vmul.f32 %v1853_v28, %v5608_v9  ;;  %v1862_v7 = vadd.f32 %v1854_v29, %v1814_v10  ;;  %v1863_v13 = vadd.f32 %v1855_v1, %v1815_v54 }
 0x10a   :  { %v1864_v55 = vadd.f32 %v1856_v6, %v1816_v19  ;;  %v1865_v56 = vadd.f32 %v1857_v37, %v1817_v33  ;;  %v1866_v51 = vadd.f32 %v1858_v40, %v1818_v11  ;;  %v1867_v41 = vadd.f32 %v1859_v50, %v1819_v25 }
 0x10b   :  { %v1868_v46 = vadd.f32 %v1860_v4, %v1820_v38  ;;  %v1869_v26 = vadd.f32 %v1861_v23, %v1821_v20  ;;  %v1873_v39 = vrot.slane %v5606_v27, %v4692_v5  ;;  %v1877_v52 = vrot.slane %v5608_v9, %v4692_v5 }
 0x10c   :  { %v1881_v3 = vrot.slane %v5610_v16, %v4692_v5  ;;  %v1885_v58 = vrot.slane %v5612_v18, %v4692_v5  ;;  %v1889_v61 = vrot.slane %v5614_v36, %v4692_v5  ;;  %v1893_v17 = vrot.slane %v5616_v15, %v4692_v5 }
 0x10d   :  { %v1897_v2 = vrot.slane %v5618_v43, %v4692_v5  ;;  %v1901_v21 = vrot.slane %v5620_v12, %v4692_v5  ;;  %v1902_v8 = vmul.f32 %v1873_v39, %v5610_v16  ;;  %v1903_v42 = vmul.f32 %v1877_v52, %v5610_v16 }
 0x10e   :  { %v1904_v22 = vmul.f32 %v1881_v3, %v5610_v16  ;;  %v1905_v44 = vmul.f32 %v1885_v58, %v5610_v16  ;;  %v1906_v14 = vmul.f32 %v1889_v61, %v5610_v16  ;;  %v1907_v45 = vmul.f32 %v1893_v17, %v5610_v16 }
 0x10f   :  { %v1908_v47 = vmul.f32 %v1897_v2, %v5610_v16  ;;  %v1909_v62 = vmul.f32 %v1901_v21, %v5610_v16  ;;  %v1910_v10 = vadd.f32 %v1902_v8, %v1862_v7  ;;  %v1911_v54 = vadd.f32 %v1903_v42, %v1863_v13 }
 0x110   :  { %v1912_v19 = vadd.f32 %v1904_v22, %v1864_v55  ;;  %v1913_v33 = vadd.f32 %v1905_v44, %v1865_v56  ;;  %v1914_v11 = vadd.f32 %v1906_v14, %v1866_v51  ;;  %v1915_v25 = vadd.f32 %v1907_v45, %v1867_v41 }
 0x111   :  { %v1916_v38 = vadd.f32 %v1908_v47, %v1868_v46  ;;  %v1917_v20 = vadd.f32 %v1909_v62, %v1869_v26  ;;  %v1921_v48 = vrot.slane %v5606_v27, %v4776_v30  ;;  %v1925_v53 = vrot.slane %v5608_v9, %v4776_v30 }
 0x112   :  { %v1929_v57 = vrot.slane %v5610_v16, %v4776_v30  ;;  %v1933_v59 = vrot.slane %v5612_v18, %v4776_v30  ;;  %v1937_v60 = vrot.slane %v5614_v36, %v4776_v30  ;;  %v1941_v63 = vrot.slane %v5616_v15, %v4776_v30 }
 0x113   :  { %v1945_v0 = vrot.slane %v5618_v43, %v4776_v30  ;;  %v1949_v28 = vrot.slane %v5620_v12, %v4776_v30  ;;  %v1950_v29 = vmul.f32 %v1921_v48, %v5612_v18  ;;  %v1951_v1 = vmul.f32 %v1925_v53, %v5612_v18 }
 0x114   :  { %v1952_v6 = vmul.f32 %v1929_v57, %v5612_v18  ;;  %v1953_v37 = vmul.f32 %v1933_v59, %v5612_v18  ;;  %v1954_v40 = vmul.f32 %v1937_v60, %v5612_v18  ;;  %v1955_v50 = vmul.f32 %v1941_v63, %v5612_v18 }
 0x115   :  { %v1956_v4 = vmul.f32 %v1945_v0, %v5612_v18  ;;  %v1957_v23 = vmul.f32 %v1949_v28, %v5612_v18  ;;  %v1958_v7 = vadd.f32 %v1950_v29, %v1910_v10  ;;  %v1959_v13 = vadd.f32 %v1951_v1, %v1911_v54 }
 0x116   :  { %v1960_v55 = vadd.f32 %v1952_v6, %v1912_v19  ;;  %v1961_v56 = vadd.f32 %v1953_v37, %v1913_v33  ;;  %v1962_v51 = vadd.f32 %v1954_v40, %v1914_v11  ;;  %v1963_v41 = vadd.f32 %v1955_v50, %v1915_v25 }
 0x117   :  { %v1964_v46 = vadd.f32 %v1956_v4, %v1916_v38  ;;  %v1965_v26 = vadd.f32 %v1957_v23, %v1917_v20  ;;  %v1969_v39 = vrot.slane %v5606_v27, %v4779_v31  ;;  %v1973_v52 = vrot.slane %v5608_v9, %v4779_v31 }
 0x118   :  { %v1977_v3 = vrot.slane %v5610_v16, %v4779_v31  ;;  %v1981_v58 = vrot.slane %v5612_v18, %v4779_v31  ;;  %v1985_v61 = vrot.slane %v5614_v36, %v4779_v31  ;;  %v1989_v17 = vrot.slane %v5616_v15, %v4779_v31 }
 0x119   :  { %v1993_v2 = vrot.slane %v5618_v43, %v4779_v31  ;;  %v1997_v21 = vrot.slane %v5620_v12, %v4779_v31  ;;  %v1998_v8 = vmul.f32 %v1969_v39, %v5614_v36  ;;  %v1999_v42 = vmul.f32 %v1973_v52, %v5614_v36 }
 0x11a   :  { %v2000_v22 = vmul.f32 %v1977_v3, %v5614_v36  ;;  %v2001_v44 = vmul.f32 %v1981_v58, %v5614_v36  ;;  %v2002_v14 = vmul.f32 %v1985_v61, %v5614_v36  ;;  %v2003_v45 = vmul.f32 %v1989_v17, %v5614_v36 }
 0x11b   :  { %v2004_v47 = vmul.f32 %v1993_v2, %v5614_v36  ;;  %v2005_v62 = vmul.f32 %v1997_v21, %v5614_v36  ;;  %v2006_v10 = vadd.f32 %v1998_v8, %v1958_v7  ;;  %v2007_v54 = vadd.f32 %v1999_v42, %v1959_v13 }
 0x11c   :  { %v2008_v19 = vadd.f32 %v2000_v22, %v1960_v55  ;;  %v2009_v33 = vadd.f32 %v2001_v44, %v1961_v56  ;;  %v2010_v11 = vadd.f32 %v2002_v14, %v1962_v51  ;;  %v2011_v25 = vadd.f32 %v2003_v45, %v1963_v41 }
 0x11d   :  { %v2012_v38 = vadd.f32 %v2004_v47, %v1964_v46  ;;  %v2013_v20 = vadd.f32 %v2005_v62, %v1965_v26  ;;  %v2017_v48 = vrot.slane %v5606_v27, %v4782_v32  ;;  %v2021_v53 = vrot.slane %v5608_v9, %v4782_v32 }
 0x11e   :  { %v2025_v57 = vrot.slane %v5610_v16, %v4782_v32  ;;  %v2029_v59 = vrot.slane %v5612_v18, %v4782_v32  ;;  %v2033_v60 = vrot.slane %v5614_v36, %v4782_v32  ;;  %v2037_v63 = vrot.slane %v5616_v15, %v4782_v32 }
 0x11f   :  { %v2041_v0 = vrot.slane %v5618_v43, %v4782_v32  ;;  %v2045_v28 = vrot.slane %v5620_v12, %v4782_v32  ;;  %v2046_v29 = vmul.f32 %v2017_v48, %v5616_v15  ;;  %v2047_v1 = vmul.f32 %v2021_v53, %v5616_v15 }
 0x120   :  { %v2048_v6 = vmul.f32 %v2025_v57, %v5616_v15  ;;  %v2049_v37 = vmul.f32 %v2029_v59, %v5616_v15  ;;  %v2050_v40 = vmul.f32 %v2033_v60, %v5616_v15  ;;  %v2051_v50 = vmul.f32 %v2037_v63, %v5616_v15 }
 0x121   :  { %v2052_v4 = vmul.f32 %v2041_v0, %v5616_v15  ;;  %v2053_v23 = vmul.f32 %v2045_v28, %v5616_v15  ;;  %v2054_v7 = vadd.f32 %v2046_v29, %v2006_v10  ;;  %v2055_v13 = vadd.f32 %v2047_v1, %v2007_v54 }
 0x122   :  { %v2056_v55 = vadd.f32 %v2048_v6, %v2008_v19  ;;  %v2057_v56 = vadd.f32 %v2049_v37, %v2009_v33  ;;  %v2058_v51 = vadd.f32 %v2050_v40, %v2010_v11  ;;  %v2059_v41 = vadd.f32 %v2051_v50, %v2011_v25 }
 0x123   :  { %v2060_v46 = vadd.f32 %v2052_v4, %v2012_v38  ;;  %v2061_v26 = vadd.f32 %v2053_v23, %v2013_v20  ;;  %v2065_v39 = vrot.slane %v5606_v27, %v4785_v34  ;;  %v2069_v52 = vrot.slane %v5608_v9, %v4785_v34 }
 0x124   :  { %v2073_v3 = vrot.slane %v5610_v16, %v4785_v34  ;;  %v2077_v58 = vrot.slane %v5612_v18, %v4785_v34  ;;  %v2081_v61 = vrot.slane %v5614_v36, %v4785_v34  ;;  %v2085_v17 = vrot.slane %v5616_v15, %v4785_v34 }
 0x125   :  { %v2089_v2 = vrot.slane %v5618_v43, %v4785_v34  ;;  %v2093_v21 = vrot.slane %v5620_v12, %v4785_v34  ;;  %v2094_v8 = vmul.f32 %v2065_v39, %v5618_v43  ;;  %v2095_v42 = vmul.f32 %v2069_v52, %v5618_v43 }
 0x126   :  { %v2096_v22 = vmul.f32 %v2073_v3, %v5618_v43  ;;  %v2097_v44 = vmul.f32 %v2077_v58, %v5618_v43  ;;  %v2098_v14 = vmul.f32 %v2081_v61, %v5618_v43  ;;  %v2099_v45 = vmul.f32 %v2085_v17, %v5618_v43 }
 0x127   :  { %v2100_v47 = vmul.f32 %v2089_v2, %v5618_v43  ;;  %v2101_v62 = vmul.f32 %v2093_v21, %v5618_v43  ;;  %v2102_v10 = vadd.f32 %v2094_v8, %v2054_v7  ;;  %v2103_v54 = vadd.f32 %v2095_v42, %v2055_v13 }
 0x128   :  { %v2104_v19 = vadd.f32 %v2096_v22, %v2056_v55  ;;  %v2105_v33 = vadd.f32 %v2097_v44, %v2057_v56  ;;  %v2106_v11 = vadd.f32 %v2098_v14, %v2058_v51  ;;  %v2107_v25 = vadd.f32 %v2099_v45, %v2059_v41 }
 0x129   :  { %v2108_v38 = vadd.f32 %v2100_v47, %v2060_v46  ;;  %v2109_v20 = vadd.f32 %v2101_v62, %v2061_v26  ;;  %v2113_v48 = vrot.slane %v5606_v27, %v4788_v35  ;;  %v2117_v53 = vrot.slane %v5608_v9, %v4788_v35 }
 0x12a   :  { %v2121_v57 = vrot.slane %v5610_v16, %v4788_v35  ;;  %v2125_v59 = vrot.slane %v5612_v18, %v4788_v35  ;;  %v2129_v60 = vrot.slane %v5614_v36, %v4788_v35  ;;  %v2133_v63 = vrot.slane %v5616_v15, %v4788_v35 }
 0x12b   :  { %v2137_v0 = vrot.slane %v5618_v43, %v4788_v35  ;;  %v2141_v27 = vrot.slane %v5620_v12, %v4788_v35  ;;  %v2142_v9 = vmul.f32 %v2113_v48, %v5620_v12  ;;  %v2143_v28 = vmul.f32 %v2117_v53, %v5620_v12 }
 0x12c   :  { %v2144_v16 = vmul.f32 %v2121_v57, %v5620_v12  ;;  %v2145_v18 = vmul.f32 %v2125_v59, %v5620_v12  ;;  %v2146_v29 = vmul.f32 %v2129_v60, %v5620_v12  ;;  %v2147_v36 = vmul.f32 %v2133_v63, %v5620_v12 }
 0x12d   :  { %v2148_v15 = vmul.f32 %v2137_v0, %v5620_v12  ;;  %v2149_v1 = vmul.f32 %v2141_v27, %v5620_v12  ;;  %v5814_v43 = vadd.f32 %v2142_v9, %v2102_v10  ;;  %v5816_v6 = vadd.f32 %v2143_v28, %v2103_v54 }
 0x12e   :  { %v5818_v37 = vadd.f32 %v2144_v16, %v2104_v19  ;;  %v5820_v40 = vadd.f32 %v2145_v18, %v2105_v33  ;;  %v5822_v50 = vadd.f32 %v2146_v29, %v2106_v11  ;;  %v5824_v4 = vadd.f32 %v2147_v36, %v2107_v25 }
 0x12f   :  { %v5826_v23 = vadd.f32 %v2148_v15, %v2108_v38  ;;  %v5828_v7 = vadd.f32 %v2149_v1, %v2109_v20  ;;  %v2161_v13 = vrot.slane %v5814_v43, %v4684_v24  ;;  %v2165_v12 = vrot.slane %v5816_v6, %v4684_v24 }
 0x130   :  { %v2169_v55 = vrot.slane %v5818_v37, %v4684_v24  ;;  %v2173_v56 = vrot.slane %v5820_v40, %v4684_v24  ;;  %v2177_v51 = vrot.slane %v5822_v50, %v4684_v24  ;;  %v2181_v41 = vrot.slane %v5824_v4, %v4684_v24 }
 0x131   :  { %v2185_v46 = vrot.slane %v5826_v23, %v4684_v24  ;;  %v2189_v26 = vrot.slane %v5828_v7, %v4684_v24  ;;  %v2190_v39 = vmul.f32 %v2161_v13, %v5814_v43  ;;  %v2191_v52 = vmul.f32 %v2165_v12, %v5814_v43 }
 0x132   :  { %v2192_v3 = vmul.f32 %v2169_v55, %v5814_v43  ;;  %v2193_v58 = vmul.f32 %v2173_v56, %v5814_v43  ;;  %v2194_v61 = vmul.f32 %v2177_v51, %v5814_v43  ;;  %v2195_v17 = vmul.f32 %v2181_v41, %v5814_v43 }
 0x133   :  { %v2196_v2 = vmul.f32 %v2185_v46, %v5814_v43  ;;  %v2197_v21 = vmul.f32 %v2189_v26, %v5814_v43  ;;  %v2201_v8 = vrot.slane %v5814_v43, %v4689_v49  ;;  %v2205_v42 = vrot.slane %v5816_v6, %v4689_v49 }
 0x134   :  { %v2209_v22 = vrot.slane %v5818_v37, %v4689_v49  ;;  %v2213_v44 = vrot.slane %v5820_v40, %v4689_v49  ;;  %v2217_v14 = vrot.slane %v5822_v50, %v4689_v49  ;;  %v2221_v45 = vrot.slane %v5824_v4, %v4689_v49 }
 0x135   :  { %v2225_v47 = vrot.slane %v5826_v23, %v4689_v49  ;;  %v2229_v62 = vrot.slane %v5828_v7, %v4689_v49  ;;  %v2230_v10 = vmul.f32 %v2201_v8, %v5816_v6  ;;  %v2231_v54 = vmul.f32 %v2205_v42, %v5816_v6 }
 0x136   :  { %v2232_v19 = vmul.f32 %v2209_v22, %v5816_v6  ;;  %v2233_v33 = vmul.f32 %v2213_v44, %v5816_v6  ;;  %v2234_v11 = vmul.f32 %v2217_v14, %v5816_v6  ;;  %v2235_v25 = vmul.f32 %v2221_v45, %v5816_v6 }
 0x137   :  { %v2236_v38 = vmul.f32 %v2225_v47, %v5816_v6  ;;  %v2237_v20 = vmul.f32 %v2229_v62, %v5816_v6  ;;  %v2238_v48 = vadd.f32 %v2230_v10, %v2190_v39  ;;  %v2239_v53 = vadd.f32 %v2231_v54, %v2191_v52 }
 0x138   :  { %v2240_v57 = vadd.f32 %v2232_v19, %v2192_v3  ;;  %v2241_v59 = vadd.f32 %v2233_v33, %v2193_v58  ;;  %v2242_v60 = vadd.f32 %v2234_v11, %v2194_v61  ;;  %v2243_v63 = vadd.f32 %v2235_v25, %v2195_v17 }
 0x139   :  { %v2244_v0 = vadd.f32 %v2236_v38, %v2196_v2  ;;  %v2245_v27 = vadd.f32 %v2237_v20, %v2197_v21  ;;  %v2249_v9 = vrot.slane %v5814_v43, %v4692_v5  ;;  %v2253_v28 = vrot.slane %v5816_v6, %v4692_v5 }
 0x13a   :  { %v2257_v16 = vrot.slane %v5818_v37, %v4692_v5  ;;  %v2261_v18 = vrot.slane %v5820_v40, %v4692_v5  ;;  %v2265_v29 = vrot.slane %v5822_v50, %v4692_v5  ;;  %v2269_v36 = vrot.slane %v5824_v4, %v4692_v5 }
 0x13b   :  { %v2273_v15 = vrot.slane %v5826_v23, %v4692_v5  ;;  %v2277_v1 = vrot.slane %v5828_v7, %v4692_v5  ;;  %v2278_v13 = vmul.f32 %v2249_v9, %v5818_v37  ;;  %v2279_v12 = vmul.f32 %v2253_v28, %v5818_v37 }
 0x13c   :  { %v2280_v55 = vmul.f32 %v2257_v16, %v5818_v37  ;;  %v2281_v56 = vmul.f32 %v2261_v18, %v5818_v37  ;;  %v2282_v51 = vmul.f32 %v2265_v29, %v5818_v37  ;;  %v2283_v41 = vmul.f32 %v2269_v36, %v5818_v37 }
 0x13d   :  { %v2284_v46 = vmul.f32 %v2273_v15, %v5818_v37  ;;  %v2285_v26 = vmul.f32 %v2277_v1, %v5818_v37  ;;  %v2286_v39 = vadd.f32 %v2278_v13, %v2238_v48  ;;  %v2287_v52 = vadd.f32 %v2279_v12, %v2239_v53 }
 0x13e   :  { %v2288_v3 = vadd.f32 %v2280_v55, %v2240_v57  ;;  %v2289_v58 = vadd.f32 %v2281_v56, %v2241_v59  ;;  %v2290_v61 = vadd.f32 %v2282_v51, %v2242_v60  ;;  %v2291_v17 = vadd.f32 %v2283_v41, %v2243_v63 }
 0x13f   :  { %v2292_v2 = vadd.f32 %v2284_v46, %v2244_v0  ;;  %v2293_v21 = vadd.f32 %v2285_v26, %v2245_v27  ;;  %v2297_v8 = vrot.slane %v5814_v43, %v4776_v30  ;;  %v2301_v42 = vrot.slane %v5816_v6, %v4776_v30 }
 0x140   :  { %v2305_v22 = vrot.slane %v5818_v37, %v4776_v30  ;;  %v2309_v44 = vrot.slane %v5820_v40, %v4776_v30  ;;  %v2313_v14 = vrot.slane %v5822_v50, %v4776_v30  ;;  %v2317_v45 = vrot.slane %v5824_v4, %v4776_v30 }
 0x141   :  { %v2321_v47 = vrot.slane %v5826_v23, %v4776_v30  ;;  %v2325_v62 = vrot.slane %v5828_v7, %v4776_v30  ;;  %v2326_v10 = vmul.f32 %v2297_v8, %v5820_v40  ;;  %v2327_v54 = vmul.f32 %v2301_v42, %v5820_v40 }
 0x142   :  { %v2328_v19 = vmul.f32 %v2305_v22, %v5820_v40  ;;  %v2329_v33 = vmul.f32 %v2309_v44, %v5820_v40  ;;  %v2330_v11 = vmul.f32 %v2313_v14, %v5820_v40  ;;  %v2331_v25 = vmul.f32 %v2317_v45, %v5820_v40 }
 0x143   :  { %v2332_v38 = vmul.f32 %v2321_v47, %v5820_v40  ;;  %v2333_v20 = vmul.f32 %v2325_v62, %v5820_v40  ;;  %v2334_v48 = vadd.f32 %v2326_v10, %v2286_v39  ;;  %v2335_v53 = vadd.f32 %v2327_v54, %v2287_v52 }
 0x144   :  { %v2336_v57 = vadd.f32 %v2328_v19, %v2288_v3  ;;  %v2337_v59 = vadd.f32 %v2329_v33, %v2289_v58  ;;  %v2338_v60 = vadd.f32 %v2330_v11, %v2290_v61  ;;  %v2339_v63 = vadd.f32 %v2331_v25, %v2291_v17 }
 0x145   :  { %v2340_v0 = vadd.f32 %v2332_v38, %v2292_v2  ;;  %v2341_v27 = vadd.f32 %v2333_v20, %v2293_v21  ;;  %v2345_v9 = vrot.slane %v5814_v43, %v4779_v31  ;;  %v2349_v28 = vrot.slane %v5816_v6, %v4779_v31 }
 0x146   :  { %v2353_v16 = vrot.slane %v5818_v37, %v4779_v31  ;;  %v2357_v18 = vrot.slane %v5820_v40, %v4779_v31  ;;  %v2361_v29 = vrot.slane %v5822_v50, %v4779_v31  ;;  %v2365_v36 = vrot.slane %v5824_v4, %v4779_v31 }
 0x147   :  { %v2369_v15 = vrot.slane %v5826_v23, %v4779_v31  ;;  %v2373_v1 = vrot.slane %v5828_v7, %v4779_v31  ;;  %v2374_v13 = vmul.f32 %v2345_v9, %v5822_v50  ;;  %v2375_v12 = vmul.f32 %v2349_v28, %v5822_v50 }
 0x148   :  { %v2376_v55 = vmul.f32 %v2353_v16, %v5822_v50  ;;  %v2377_v56 = vmul.f32 %v2357_v18, %v5822_v50  ;;  %v2378_v51 = vmul.f32 %v2361_v29, %v5822_v50  ;;  %v2379_v41 = vmul.f32 %v2365_v36, %v5822_v50 }
 0x149   :  { %v2380_v46 = vmul.f32 %v2369_v15, %v5822_v50  ;;  %v2381_v26 = vmul.f32 %v2373_v1, %v5822_v50  ;;  %v2382_v39 = vadd.f32 %v2374_v13, %v2334_v48  ;;  %v2383_v52 = vadd.f32 %v2375_v12, %v2335_v53 }
 0x14a   :  { %v2384_v3 = vadd.f32 %v2376_v55, %v2336_v57  ;;  %v2385_v58 = vadd.f32 %v2377_v56, %v2337_v59  ;;  %v2386_v61 = vadd.f32 %v2378_v51, %v2338_v60  ;;  %v2387_v17 = vadd.f32 %v2379_v41, %v2339_v63 }
 0x14b   :  { %v2388_v2 = vadd.f32 %v2380_v46, %v2340_v0  ;;  %v2389_v21 = vadd.f32 %v2381_v26, %v2341_v27  ;;  %v2393_v8 = vrot.slane %v5814_v43, %v4782_v32  ;;  %v2397_v42 = vrot.slane %v5816_v6, %v4782_v32 }
 0x14c   :  { %v2401_v22 = vrot.slane %v5818_v37, %v4782_v32  ;;  %v2405_v44 = vrot.slane %v5820_v40, %v4782_v32  ;;  %v2409_v14 = vrot.slane %v5822_v50, %v4782_v32  ;;  %v2413_v45 = vrot.slane %v5824_v4, %v4782_v32 }
 0x14d   :  { %v2417_v47 = vrot.slane %v5826_v23, %v4782_v32  ;;  %v2421_v62 = vrot.slane %v5828_v7, %v4782_v32  ;;  %v2422_v10 = vmul.f32 %v2393_v8, %v5824_v4  ;;  %v2423_v54 = vmul.f32 %v2397_v42, %v5824_v4 }
 0x14e   :  { %v2424_v19 = vmul.f32 %v2401_v22, %v5824_v4  ;;  %v2425_v33 = vmul.f32 %v2405_v44, %v5824_v4  ;;  %v2426_v11 = vmul.f32 %v2409_v14, %v5824_v4  ;;  %v2427_v25 = vmul.f32 %v2413_v45, %v5824_v4 }
 0x14f   :  { %v2428_v38 = vmul.f32 %v2417_v47, %v5824_v4  ;;  %v2429_v20 = vmul.f32 %v2421_v62, %v5824_v4  ;;  %v2430_v48 = vadd.f32 %v2422_v10, %v2382_v39  ;;  %v2431_v53 = vadd.f32 %v2423_v54, %v2383_v52 }
 0x150   :  { %v2432_v57 = vadd.f32 %v2424_v19, %v2384_v3  ;;  %v2433_v59 = vadd.f32 %v2425_v33, %v2385_v58  ;;  %v2434_v60 = vadd.f32 %v2426_v11, %v2386_v61  ;;  %v2435_v63 = vadd.f32 %v2427_v25, %v2387_v17 }
 0x151   :  { %v2436_v0 = vadd.f32 %v2428_v38, %v2388_v2  ;;  %v2437_v27 = vadd.f32 %v2429_v20, %v2389_v21  ;;  %v2441_v9 = vrot.slane %v5814_v43, %v4785_v34  ;;  %v2445_v28 = vrot.slane %v5816_v6, %v4785_v34 }
 0x152   :  { %v2449_v16 = vrot.slane %v5818_v37, %v4785_v34  ;;  %v2453_v18 = vrot.slane %v5820_v40, %v4785_v34  ;;  %v2457_v29 = vrot.slane %v5822_v50, %v4785_v34  ;;  %v2461_v36 = vrot.slane %v5824_v4, %v4785_v34 }
 0x153   :  { %v2465_v15 = vrot.slane %v5826_v23, %v4785_v34  ;;  %v2469_v1 = vrot.slane %v5828_v7, %v4785_v34  ;;  %v2470_v13 = vmul.f32 %v2441_v9, %v5826_v23  ;;  %v2471_v12 = vmul.f32 %v2445_v28, %v5826_v23 }
 0x154   :  { %v2472_v55 = vmul.f32 %v2449_v16, %v5826_v23  ;;  %v2473_v56 = vmul.f32 %v2453_v18, %v5826_v23  ;;  %v2474_v51 = vmul.f32 %v2457_v29, %v5826_v23  ;;  %v2475_v41 = vmul.f32 %v2461_v36, %v5826_v23 }
 0x155   :  { %v2476_v46 = vmul.f32 %v2465_v15, %v5826_v23  ;;  %v2477_v26 = vmul.f32 %v2469_v1, %v5826_v23  ;;  %v2478_v39 = vadd.f32 %v2470_v13, %v2430_v48  ;;  %v2479_v52 = vadd.f32 %v2471_v12, %v2431_v53 }
 0x156   :  { %v2480_v3 = vadd.f32 %v2472_v55, %v2432_v57  ;;  %v2481_v58 = vadd.f32 %v2473_v56, %v2433_v59  ;;  %v2482_v61 = vadd.f32 %v2474_v51, %v2434_v60  ;;  %v2483_v17 = vadd.f32 %v2475_v41, %v2435_v63 }
 0x157   :  { %v2484_v2 = vadd.f32 %v2476_v46, %v2436_v0  ;;  %v2485_v21 = vadd.f32 %v2477_v26, %v2437_v27  ;;  %v2489_v8 = vrot.slane %v5814_v43, %v4788_v35  ;;  %v2493_v42 = vrot.slane %v5816_v6, %v4788_v35 }
 0x158   :  { %v2497_v22 = vrot.slane %v5818_v37, %v4788_v35  ;;  %v2501_v44 = vrot.slane %v5820_v40, %v4788_v35  ;;  %v2505_v14 = vrot.slane %v5822_v50, %v4788_v35  ;;  %v2509_v45 = vrot.slane %v5824_v4, %v4788_v35 }
 0x159   :  { %v2513_v47 = vrot.slane %v5826_v23, %v4788_v35  ;;  %v2517_v43 = vrot.slane %v5828_v7, %v4788_v35  ;;  %v2518_v6 = vmul.f32 %v2489_v8, %v5828_v7  ;;  %v2519_v62 = vmul.f32 %v2493_v42, %v5828_v7 }
 0x15a   :  { %v2520_v37 = vmul.f32 %v2497_v22, %v5828_v7  ;;  %v2521_v40 = vmul.f32 %v2501_v44, %v5828_v7  ;;  %v2522_v10 = vmul.f32 %v2505_v14, %v5828_v7  ;;  %v2523_v50 = vmul.f32 %v2509_v45, %v5828_v7 }
 0x15b   :  { %v2524_v4 = vmul.f32 %v2513_v47, %v5828_v7  ;;  %v2525_v54 = vmul.f32 %v2517_v43, %v5828_v7  ;;  %v6022_v23 = vadd.f32 %v2518_v6, %v2478_v39  ;;  %v6024_v19 = vadd.f32 %v2519_v62, %v2479_v52 }
 0x15c   :  { %v6026_v33 = vadd.f32 %v2520_v37, %v2480_v3  ;;  %v6028_v11 = vadd.f32 %v2521_v40, %v2481_v58  ;;  %v6030_v25 = vadd.f32 %v2522_v10, %v2482_v61  ;;  %v6032_v38 = vadd.f32 %v2523_v50, %v2483_v17 }
 0x15d   :  { %v6034_v20 = vadd.f32 %v2524_v4, %v2484_v2  ;;  %v6036_v48 = vadd.f32 %v2525_v54, %v2485_v21  ;;  %v2537_v53 = vrot.slane %v6022_v23, %v4684_v24  ;;  %v2541_v7 = vrot.slane %v6024_v19, %v4684_v24 }
 0x15e   :  { %v2545_v57 = vrot.slane %v6026_v33, %v4684_v24  ;;  %v2549_v59 = vrot.slane %v6028_v11, %v4684_v24  ;;  %v2553_v60 = vrot.slane %v6030_v25, %v4684_v24  ;;  %v2557_v63 = vrot.slane %v6032_v38, %v4684_v24 }
 0x15f   :  { %v2561_v0 = vrot.slane %v6034_v20, %v4684_v24  ;;  %v2565_v27 = vrot.slane %v6036_v48, %v4684_v24  ;;  %v2566_v9 = vmul.f32 %v2537_v53, %v6022_v23  ;;  %v2567_v28 = vmul.f32 %v2541_v7, %v6022_v23 }
 0x160   :  { %v2568_v16 = vmul.f32 %v2545_v57, %v6022_v23  ;;  %v2569_v18 = vmul.f32 %v2549_v59, %v6022_v23  ;;  %v2570_v29 = vmul.f32 %v2553_v60, %v6022_v23  ;;  %v2571_v36 = vmul.f32 %v2557_v63, %v6022_v23 }
 0x161   :  { %v2572_v15 = vmul.f32 %v2561_v0, %v6022_v23  ;;  %v2573_v1 = vmul.f32 %v2565_v27, %v6022_v23  ;;  %v2577_v13 = vrot.slane %v6022_v23, %v4689_v49  ;;  %v2581_v12 = vrot.slane %v6024_v19, %v4689_v49 }
 0x162   :  { %v2585_v55 = vrot.slane %v6026_v33, %v4689_v49  ;;  %v2589_v56 = vrot.slane %v6028_v11, %v4689_v49  ;;  %v2593_v51 = vrot.slane %v6030_v25, %v4689_v49  ;;  %v2597_v41 = vrot.slane %v6032_v38, %v4689_v49 }
 0x163   :  { %v2601_v46 = vrot.slane %v6034_v20, %v4689_v49  ;;  %v2605_v26 = vrot.slane %v6036_v48, %v4689_v49  ;;  %v2606_v39 = vmul.f32 %v2577_v13, %v6024_v19  ;;  %v2607_v52 = vmul.f32 %v2581_v12, %v6024_v19 }
 0x164   :  { %v2608_v3 = vmul.f32 %v2585_v55, %v6024_v19  ;;  %v2609_v58 = vmul.f32 %v2589_v56, %v6024_v19  ;;  %v2610_v61 = vmul.f32 %v2593_v51, %v6024_v19  ;;  %v2611_v17 = vmul.f32 %v2597_v41, %v6024_v19 }
 0x165   :  { %v2612_v2 = vmul.f32 %v2601_v46, %v6024_v19  ;;  %v2613_v21 = vmul.f32 %v2605_v26, %v6024_v19  ;;  %v2614_v8 = vadd.f32 %v2606_v39, %v2566_v9  ;;  %v2615_v42 = vadd.f32 %v2607_v52, %v2567_v28 }
 0x166   :  { %v2616_v22 = vadd.f32 %v2608_v3, %v2568_v16  ;;  %v2617_v44 = vadd.f32 %v2609_v58, %v2569_v18  ;;  %v2618_v14 = vadd.f32 %v2610_v61, %v2570_v29  ;;  %v2619_v45 = vadd.f32 %v2611_v17, %v2571_v36 }
 0x167   :  { %v2620_v47 = vadd.f32 %v2612_v2, %v2572_v15  ;;  %v2621_v43 = vadd.f32 %v2613_v21, %v2573_v1  ;;  %v2625_v6 = vrot.slane %v6022_v23, %v4692_v5  ;;  %v2629_v62 = vrot.slane %v6024_v19, %v4692_v5 }
 0x168   :  { %v2633_v37 = vrot.slane %v6026_v33, %v4692_v5  ;;  %v2637_v40 = vrot.slane %v6028_v11, %v4692_v5  ;;  %v2641_v10 = vrot.slane %v6030_v25, %v4692_v5  ;;  %v2645_v50 = vrot.slane %v6032_v38, %v4692_v5 }
 0x169   :  { %v2649_v4 = vrot.slane %v6034_v20, %v4692_v5  ;;  %v2653_v54 = vrot.slane %v6036_v48, %v4692_v5  ;;  %v2654_v53 = vmul.f32 %v2625_v6, %v6026_v33  ;;  %v2655_v7 = vmul.f32 %v2629_v62, %v6026_v33 }
 0x16a   :  { %v2656_v57 = vmul.f32 %v2633_v37, %v6026_v33  ;;  %v2657_v59 = vmul.f32 %v2637_v40, %v6026_v33  ;;  %v2658_v60 = vmul.f32 %v2641_v10, %v6026_v33  ;;  %v2659_v63 = vmul.f32 %v2645_v50, %v6026_v33 }
 0x16b   :  { %v2660_v0 = vmul.f32 %v2649_v4, %v6026_v33  ;;  %v2661_v27 = vmul.f32 %v2653_v54, %v6026_v33  ;;  %v2662_v9 = vadd.f32 %v2654_v53, %v2614_v8  ;;  %v2663_v28 = vadd.f32 %v2655_v7, %v2615_v42 }
 0x16c   :  { %v2664_v16 = vadd.f32 %v2656_v57, %v2616_v22  ;;  %v2665_v18 = vadd.f32 %v2657_v59, %v2617_v44  ;;  %v2666_v29 = vadd.f32 %v2658_v60, %v2618_v14  ;;  %v2667_v36 = vadd.f32 %v2659_v63, %v2619_v45 }
 0x16d   :  { %v2668_v15 = vadd.f32 %v2660_v0, %v2620_v47  ;;  %v2669_v1 = vadd.f32 %v2661_v27, %v2621_v43  ;;  %v2673_v13 = vrot.slane %v6022_v23, %v4776_v30  ;;  %v2677_v12 = vrot.slane %v6024_v19, %v4776_v30 }
 0x16e   :  { %v2681_v55 = vrot.slane %v6026_v33, %v4776_v30  ;;  %v2685_v56 = vrot.slane %v6028_v11, %v4776_v30  ;;  %v2689_v51 = vrot.slane %v6030_v25, %v4776_v30  ;;  %v2693_v41 = vrot.slane %v6032_v38, %v4776_v30 }
 0x16f   :  { %v2697_v46 = vrot.slane %v6034_v20, %v4776_v30  ;;  %v2701_v26 = vrot.slane %v6036_v48, %v4776_v30  ;;  %v2702_v39 = vmul.f32 %v2673_v13, %v6028_v11  ;;  %v2703_v52 = vmul.f32 %v2677_v12, %v6028_v11 }
 0x170   :  { %v2704_v3 = vmul.f32 %v2681_v55, %v6028_v11  ;;  %v2705_v58 = vmul.f32 %v2685_v56, %v6028_v11  ;;  %v2706_v61 = vmul.f32 %v2689_v51, %v6028_v11  ;;  %v2707_v17 = vmul.f32 %v2693_v41, %v6028_v11 }
 0x171   :  { %v2708_v2 = vmul.f32 %v2697_v46, %v6028_v11  ;;  %v2709_v21 = vmul.f32 %v2701_v26, %v6028_v11  ;;  %v2710_v8 = vadd.f32 %v2702_v39, %v2662_v9  ;;  %v2711_v42 = vadd.f32 %v2703_v52, %v2663_v28 }
 0x172   :  { %v2712_v22 = vadd.f32 %v2704_v3, %v2664_v16  ;;  %v2713_v44 = vadd.f32 %v2705_v58, %v2665_v18  ;;  %v2714_v14 = vadd.f32 %v2706_v61, %v2666_v29  ;;  %v2715_v45 = vadd.f32 %v2707_v17, %v2667_v36 }
 0x173   :  { %v2716_v47 = vadd.f32 %v2708_v2, %v2668_v15  ;;  %v2717_v43 = vadd.f32 %v2709_v21, %v2669_v1  ;;  %v2721_v6 = vrot.slane %v6022_v23, %v4779_v31  ;;  %v2725_v62 = vrot.slane %v6024_v19, %v4779_v31 }
 0x174   :  { %v2729_v37 = vrot.slane %v6026_v33, %v4779_v31  ;;  %v2733_v40 = vrot.slane %v6028_v11, %v4779_v31  ;;  %v2737_v10 = vrot.slane %v6030_v25, %v4779_v31  ;;  %v2741_v50 = vrot.slane %v6032_v38, %v4779_v31 }
 0x175   :  { %v2745_v4 = vrot.slane %v6034_v20, %v4779_v31  ;;  %v2749_v54 = vrot.slane %v6036_v48, %v4779_v31  ;;  %v2750_v53 = vmul.f32 %v2721_v6, %v6030_v25  ;;  %v2751_v7 = vmul.f32 %v2725_v62, %v6030_v25 }
 0x176   :  { %v2752_v57 = vmul.f32 %v2729_v37, %v6030_v25  ;;  %v2753_v59 = vmul.f32 %v2733_v40, %v6030_v25  ;;  %v2754_v60 = vmul.f32 %v2737_v10, %v6030_v25  ;;  %v2755_v63 = vmul.f32 %v2741_v50, %v6030_v25 }
 0x177   :  { %v2756_v0 = vmul.f32 %v2745_v4, %v6030_v25  ;;  %v2757_v27 = vmul.f32 %v2749_v54, %v6030_v25  ;;  %v2758_v9 = vadd.f32 %v2750_v53, %v2710_v8  ;;  %v2759_v28 = vadd.f32 %v2751_v7, %v2711_v42 }
 0x178   :  { %v2760_v16 = vadd.f32 %v2752_v57, %v2712_v22  ;;  %v2761_v18 = vadd.f32 %v2753_v59, %v2713_v44  ;;  %v2762_v29 = vadd.f32 %v2754_v60, %v2714_v14  ;;  %v2763_v36 = vadd.f32 %v2755_v63, %v2715_v45 }
 0x179   :  { %v2764_v15 = vadd.f32 %v2756_v0, %v2716_v47  ;;  %v2765_v1 = vadd.f32 %v2757_v27, %v2717_v43  ;;  %v2769_v13 = vrot.slane %v6022_v23, %v4782_v32  ;;  %v2773_v12 = vrot.slane %v6024_v19, %v4782_v32 }
 0x17a   :  { %v2777_v55 = vrot.slane %v6026_v33, %v4782_v32  ;;  %v2781_v56 = vrot.slane %v6028_v11, %v4782_v32  ;;  %v2785_v51 = vrot.slane %v6030_v25, %v4782_v32  ;;  %v2789_v41 = vrot.slane %v6032_v38, %v4782_v32 }
 0x17b   :  { %v2793_v46 = vrot.slane %v6034_v20, %v4782_v32  ;;  %v2797_v26 = vrot.slane %v6036_v48, %v4782_v32  ;;  %v2798_v39 = vmul.f32 %v2769_v13, %v6032_v38  ;;  %v2799_v52 = vmul.f32 %v2773_v12, %v6032_v38 }
 0x17c   :  { %v2800_v3 = vmul.f32 %v2777_v55, %v6032_v38  ;;  %v2801_v58 = vmul.f32 %v2781_v56, %v6032_v38  ;;  %v2802_v61 = vmul.f32 %v2785_v51, %v6032_v38  ;;  %v2803_v17 = vmul.f32 %v2789_v41, %v6032_v38 }
 0x17d   :  { %v2804_v2 = vmul.f32 %v2793_v46, %v6032_v38  ;;  %v2805_v21 = vmul.f32 %v2797_v26, %v6032_v38  ;;  %v2806_v8 = vadd.f32 %v2798_v39, %v2758_v9  ;;  %v2807_v42 = vadd.f32 %v2799_v52, %v2759_v28 }
 0x17e   :  { %v2808_v22 = vadd.f32 %v2800_v3, %v2760_v16  ;;  %v2809_v44 = vadd.f32 %v2801_v58, %v2761_v18  ;;  %v2810_v14 = vadd.f32 %v2802_v61, %v2762_v29  ;;  %v2811_v45 = vadd.f32 %v2803_v17, %v2763_v36 }
 0x17f   :  { %v2812_v47 = vadd.f32 %v2804_v2, %v2764_v15  ;;  %v2813_v43 = vadd.f32 %v2805_v21, %v2765_v1  ;;  %v2817_v6 = vrot.slane %v6022_v23, %v4785_v34  ;;  %v2821_v62 = vrot.slane %v6024_v19, %v4785_v34 }
 0x180   :  { %v2825_v37 = vrot.slane %v6026_v33, %v4785_v34  ;;  %v2829_v40 = vrot.slane %v6028_v11, %v4785_v34  ;;  %v2833_v10 = vrot.slane %v6030_v25, %v4785_v34  ;;  %v2837_v50 = vrot.slane %v6032_v38, %v4785_v34 }
 0x181   :  { %v2841_v4 = vrot.slane %v6034_v20, %v4785_v34  ;;  %v2845_v54 = vrot.slane %v6036_v48, %v4785_v34  ;;  %v2846_v53 = vmul.f32 %v2817_v6, %v6034_v20  ;;  %v2847_v7 = vmul.f32 %v2821_v62, %v6034_v20 }
 0x182   :  { %v2848_v57 = vmul.f32 %v2825_v37, %v6034_v20  ;;  %v2849_v59 = vmul.f32 %v2829_v40, %v6034_v20  ;;  %v2850_v60 = vmul.f32 %v2833_v10, %v6034_v20  ;;  %v2851_v63 = vmul.f32 %v2837_v50, %v6034_v20 }
 0x183   :  { %v2852_v0 = vmul.f32 %v2841_v4, %v6034_v20  ;;  %v2853_v27 = vmul.f32 %v2845_v54, %v6034_v20  ;;  %v2854_v9 = vadd.f32 %v2846_v53, %v2806_v8  ;;  %v2855_v28 = vadd.f32 %v2847_v7, %v2807_v42 }
 0x184   :  { %v2856_v16 = vadd.f32 %v2848_v57, %v2808_v22  ;;  %v2857_v18 = vadd.f32 %v2849_v59, %v2809_v44  ;;  %v2858_v29 = vadd.f32 %v2850_v60, %v2810_v14  ;;  %v2859_v36 = vadd.f32 %v2851_v63, %v2811_v45 }
 0x185   :  { %v2860_v15 = vadd.f32 %v2852_v0, %v2812_v47  ;;  %v2861_v1 = vadd.f32 %v2853_v27, %v2813_v43  ;;  %v2865_v13 = vrot.slane %v6022_v23, %v4788_v35  ;;  %v2869_v12 = vrot.slane %v6024_v19, %v4788_v35 }
 0x186   :  { %v2873_v55 = vrot.slane %v6026_v33, %v4788_v35  ;;  %v2877_v56 = vrot.slane %v6028_v11, %v4788_v35  ;;  %v2881_v51 = vrot.slane %v6030_v25, %v4788_v35  ;;  %v2885_v41 = vrot.slane %v6032_v38, %v4788_v35 }
 0x187   :  { %v2889_v46 = vrot.slane %v6034_v20, %v4788_v35  ;;  %v2893_v23 = vrot.slane %v6036_v48, %v4788_v35  ;;  %v2894_v19 = vmul.f32 %v2865_v13, %v6036_v48  ;;  %v2895_v26 = vmul.f32 %v2869_v12, %v6036_v48 }
 0x188   :  { %v2896_v33 = vmul.f32 %v2873_v55, %v6036_v48  ;;  %v2897_v11 = vmul.f32 %v2877_v56, %v6036_v48  ;;  %v2898_v39 = vmul.f32 %v2881_v51, %v6036_v48  ;;  %v2899_v25 = vmul.f32 %v2885_v41, %v6036_v48 }
 0x189   :  { %v2900_v38 = vmul.f32 %v2889_v46, %v6036_v48  ;;  %v2901_v52 = vmul.f32 %v2893_v23, %v6036_v48  ;;  %v6230_v20 = vadd.f32 %v2894_v19, %v2854_v9  ;;  %v6232_v3 = vadd.f32 %v2895_v26, %v2855_v28 }
 0x18a   :  { %v6234_v58 = vadd.f32 %v2896_v33, %v2856_v16  ;;  %v6236_v61 = vadd.f32 %v2897_v11, %v2857_v18  ;;  %v6238_v17 = vadd.f32 %v2898_v39, %v2858_v29  ;;  %v6240_v2 = vadd.f32 %v2899_v25, %v2859_v36 }
 0x18b   :  { %v6242_v21 = vadd.f32 %v2900_v38, %v2860_v15  ;;  %v6244_v8 = vadd.f32 %v2901_v52, %v2861_v1  ;;  %v2913_v42 = vrot.slane %v6230_v20, %v4684_v24  ;;  %v2917_v48 = vrot.slane %v6232_v3, %v4684_v24 }
 0x18c   :  { %v2921_v22 = vrot.slane %v6234_v58, %v4684_v24  ;;  %v2925_v44 = vrot.slane %v6236_v61, %v4684_v24  ;;  %v2929_v14 = vrot.slane %v6238_v17, %v4684_v24  ;;  %v2933_v45 = vrot.slane %v6240_v2, %v4684_v24 }
 0x18d   :  { %v2937_v47 = vrot.slane %v6242_v21, %v4684_v24  ;;  %v2941_v43 = vrot.slane %v6244_v8, %v4684_v24  ;;  %v2942_v6 = vmul.f32 %v2913_v42, %v6230_v20  ;;  %v2943_v62 = vmul.f32 %v2917_v48, %v6230_v20 }
 0x18e   :  { %v2944_v37 = vmul.f32 %v2921_v22, %v6230_v20  ;;  %v2945_v40 = vmul.f32 %v2925_v44, %v6230_v20  ;;  %v2946_v10 = vmul.f32 %v2929_v14, %v6230_v20  ;;  %v2947_v50 = vmul.f32 %v2933_v45, %v6230_v20 }
 0x18f   :  { %v2948_v4 = vmul.f32 %v2937_v47, %v6230_v20  ;;  %v2949_v54 = vmul.f32 %v2941_v43, %v6230_v20  ;;  %v2953_v53 = vrot.slane %v6230_v20, %v4689_v49  ;;  %v2957_v7 = vrot.slane %v6232_v3, %v4689_v49 }
 0x190   :  { %v2961_v57 = vrot.slane %v6234_v58, %v4689_v49  ;;  %v2965_v59 = vrot.slane %v6236_v61, %v4689_v49  ;;  %v2969_v60 = vrot.slane %v6238_v17, %v4689_v49  ;;  %v2973_v63 = vrot.slane %v6240_v2, %v4689_v49 }
 0x191   :  { %v2977_v0 = vrot.slane %v6242_v21, %v4689_v49  ;;  %v2981_v27 = vrot.slane %v6244_v8, %v4689_v49  ;;  %v2982_v9 = vmul.f32 %v2953_v53, %v6232_v3  ;;  %v2983_v28 = vmul.f32 %v2957_v7, %v6232_v3 }
 0x192   :  { %v2984_v16 = vmul.f32 %v2961_v57, %v6232_v3  ;;  %v2985_v18 = vmul.f32 %v2965_v59, %v6232_v3  ;;  %v2986_v29 = vmul.f32 %v2969_v60, %v6232_v3  ;;  %v2987_v36 = vmul.f32 %v2973_v63, %v6232_v3 }
 0x193   :  { %v2988_v15 = vmul.f32 %v2977_v0, %v6232_v3  ;;  %v2989_v1 = vmul.f32 %v2981_v27, %v6232_v3  ;;  %v2990_v13 = vadd.f32 %v2982_v9, %v2942_v6  ;;  %v2991_v12 = vadd.f32 %v2983_v28, %v2943_v62 }
 0x194   :  { %v2992_v55 = vadd.f32 %v2984_v16, %v2944_v37  ;;  %v2993_v56 = vadd.f32 %v2985_v18, %v2945_v40  ;;  %v2994_v51 = vadd.f32 %v2986_v29, %v2946_v10  ;;  %v2995_v41 = vadd.f32 %v2987_v36, %v2947_v50 }
 0x195   :  { %v2996_v46 = vadd.f32 %v2988_v15, %v2948_v4  ;;  %v2997_v23 = vadd.f32 %v2989_v1, %v2949_v54  ;;  %v3001_v19 = vrot.slane %v6230_v20, %v4692_v5  ;;  %v3005_v26 = vrot.slane %v6232_v3, %v4692_v5 }
 0x196   :  { %v3009_v33 = vrot.slane %v6234_v58, %v4692_v5  ;;  %v3013_v11 = vrot.slane %v6236_v61, %v4692_v5  ;;  %v3017_v39 = vrot.slane %v6238_v17, %v4692_v5  ;;  %v3021_v25 = vrot.slane %v6240_v2, %v4692_v5 }
 0x197   :  { %v3025_v38 = vrot.slane %v6242_v21, %v4692_v5  ;;  %v3029_v52 = vrot.slane %v6244_v8, %v4692_v5  ;;  %v3030_v42 = vmul.f32 %v3001_v19, %v6234_v58  ;;  %v3031_v48 = vmul.f32 %v3005_v26, %v6234_v58 }
 0x198   :  { %v3032_v22 = vmul.f32 %v3009_v33, %v6234_v58  ;;  %v3033_v44 = vmul.f32 %v3013_v11, %v6234_v58  ;;  %v3034_v14 = vmul.f32 %v3017_v39, %v6234_v58  ;;  %v3035_v45 = vmul.f32 %v3021_v25, %v6234_v58 }
 0x199   :  { %v3036_v47 = vmul.f32 %v3025_v38, %v6234_v58  ;;  %v3037_v43 = vmul.f32 %v3029_v52, %v6234_v58  ;;  %v3038_v6 = vadd.f32 %v3030_v42, %v2990_v13  ;;  %v3039_v62 = vadd.f32 %v3031_v48, %v2991_v12 }
 0x19a   :  { %v3040_v37 = vadd.f32 %v3032_v22, %v2992_v55  ;;  %v3041_v40 = vadd.f32 %v3033_v44, %v2993_v56  ;;  %v3042_v10 = vadd.f32 %v3034_v14, %v2994_v51  ;;  %v3043_v50 = vadd.f32 %v3035_v45, %v2995_v41 }
 0x19b   :  { %v3044_v4 = vadd.f32 %v3036_v47, %v2996_v46  ;;  %v3045_v54 = vadd.f32 %v3037_v43, %v2997_v23  ;;  %v3049_v53 = vrot.slane %v6230_v20, %v4776_v30  ;;  %v3053_v7 = vrot.slane %v6232_v3, %v4776_v30 }
 0x19c   :  { %v3057_v57 = vrot.slane %v6234_v58, %v4776_v30  ;;  %v3061_v59 = vrot.slane %v6236_v61, %v4776_v30  ;;  %v3065_v60 = vrot.slane %v6238_v17, %v4776_v30  ;;  %v3069_v63 = vrot.slane %v6240_v2, %v4776_v30 }
 0x19d   :  { %v3073_v0 = vrot.slane %v6242_v21, %v4776_v30  ;;  %v3077_v27 = vrot.slane %v6244_v8, %v4776_v30  ;;  %v3078_v9 = vmul.f32 %v3049_v53, %v6236_v61  ;;  %v3079_v28 = vmul.f32 %v3053_v7, %v6236_v61 }
 0x19e   :  { %v3080_v16 = vmul.f32 %v3057_v57, %v6236_v61  ;;  %v3081_v18 = vmul.f32 %v3061_v59, %v6236_v61  ;;  %v3082_v29 = vmul.f32 %v3065_v60, %v6236_v61  ;;  %v3083_v36 = vmul.f32 %v3069_v63, %v6236_v61 }
 0x19f   :  { %v3084_v15 = vmul.f32 %v3073_v0, %v6236_v61  ;;  %v3085_v1 = vmul.f32 %v3077_v27, %v6236_v61  ;;  %v3086_v13 = vadd.f32 %v3078_v9, %v3038_v6  ;;  %v3087_v12 = vadd.f32 %v3079_v28, %v3039_v62 }
 0x1a0   :  { %v3088_v55 = vadd.f32 %v3080_v16, %v3040_v37  ;;  %v3089_v56 = vadd.f32 %v3081_v18, %v3041_v40  ;;  %v3090_v51 = vadd.f32 %v3082_v29, %v3042_v10  ;;  %v3091_v41 = vadd.f32 %v3083_v36, %v3043_v50 }
 0x1a1   :  { %v3092_v46 = vadd.f32 %v3084_v15, %v3044_v4  ;;  %v3093_v23 = vadd.f32 %v3085_v1, %v3045_v54  ;;  %v3097_v19 = vrot.slane %v6230_v20, %v4779_v31  ;;  %v3101_v26 = vrot.slane %v6232_v3, %v4779_v31 }
 0x1a2   :  { %v3105_v33 = vrot.slane %v6234_v58, %v4779_v31  ;;  %v3109_v11 = vrot.slane %v6236_v61, %v4779_v31  ;;  %v3113_v39 = vrot.slane %v6238_v17, %v4779_v31  ;;  %v3117_v25 = vrot.slane %v6240_v2, %v4779_v31 }
 0x1a3   :  { %v3121_v38 = vrot.slane %v6242_v21, %v4779_v31  ;;  %v3125_v52 = vrot.slane %v6244_v8, %v4779_v31  ;;  %v3126_v42 = vmul.f32 %v3097_v19, %v6238_v17  ;;  %v3127_v48 = vmul.f32 %v3101_v26, %v6238_v17 }
 0x1a4   :  { %v3128_v22 = vmul.f32 %v3105_v33, %v6238_v17  ;;  %v3129_v44 = vmul.f32 %v3109_v11, %v6238_v17  ;;  %v3130_v14 = vmul.f32 %v3113_v39, %v6238_v17  ;;  %v3131_v45 = vmul.f32 %v3117_v25, %v6238_v17 }
 0x1a5   :  { %v3132_v47 = vmul.f32 %v3121_v38, %v6238_v17  ;;  %v3133_v43 = vmul.f32 %v3125_v52, %v6238_v17  ;;  %v3134_v6 = vadd.f32 %v3126_v42, %v3086_v13  ;;  %v3135_v62 = vadd.f32 %v3127_v48, %v3087_v12 }
 0x1a6   :  { %v3136_v37 = vadd.f32 %v3128_v22, %v3088_v55  ;;  %v3137_v40 = vadd.f32 %v3129_v44, %v3089_v56  ;;  %v3138_v10 = vadd.f32 %v3130_v14, %v3090_v51  ;;  %v3139_v50 = vadd.f32 %v3131_v45, %v3091_v41 }
 0x1a7   :  { %v3140_v4 = vadd.f32 %v3132_v47, %v3092_v46  ;;  %v3141_v54 = vadd.f32 %v3133_v43, %v3093_v23  ;;  %v3145_v53 = vrot.slane %v6230_v20, %v4782_v32  ;;  %v3149_v7 = vrot.slane %v6232_v3, %v4782_v32 }
 0x1a8   :  { %v3153_v57 = vrot.slane %v6234_v58, %v4782_v32  ;;  %v3157_v59 = vrot.slane %v6236_v61, %v4782_v32  ;;  %v3161_v60 = vrot.slane %v6238_v17, %v4782_v32  ;;  %v3165_v63 = vrot.slane %v6240_v2, %v4782_v32 }
 0x1a9   :  { %v3169_v0 = vrot.slane %v6242_v21, %v4782_v32  ;;  %v3173_v27 = vrot.slane %v6244_v8, %v4782_v32  ;;  %v3174_v9 = vmul.f32 %v3145_v53, %v6240_v2  ;;  %v3175_v28 = vmul.f32 %v3149_v7, %v6240_v2 }
 0x1aa   :  { %v3176_v16 = vmul.f32 %v3153_v57, %v6240_v2  ;;  %v3177_v18 = vmul.f32 %v3157_v59, %v6240_v2  ;;  %v3178_v29 = vmul.f32 %v3161_v60, %v6240_v2  ;;  %v3179_v36 = vmul.f32 %v3165_v63, %v6240_v2 }
 0x1ab   :  { %v3180_v15 = vmul.f32 %v3169_v0, %v6240_v2  ;;  %v3181_v1 = vmul.f32 %v3173_v27, %v6240_v2  ;;  %v3182_v13 = vadd.f32 %v3174_v9, %v3134_v6  ;;  %v3183_v12 = vadd.f32 %v3175_v28, %v3135_v62 }
 0x1ac   :  { %v3184_v55 = vadd.f32 %v3176_v16, %v3136_v37  ;;  %v3185_v56 = vadd.f32 %v3177_v18, %v3137_v40  ;;  %v3186_v51 = vadd.f32 %v3178_v29, %v3138_v10  ;;  %v3187_v41 = vadd.f32 %v3179_v36, %v3139_v50 }
 0x1ad   :  { %v3188_v46 = vadd.f32 %v3180_v15, %v3140_v4  ;;  %v3189_v23 = vadd.f32 %v3181_v1, %v3141_v54  ;;  %v3193_v19 = vrot.slane %v6230_v20, %v4785_v34  ;;  %v3197_v26 = vrot.slane %v6232_v3, %v4785_v34 }
 0x1ae   :  { %v3201_v33 = vrot.slane %v6234_v58, %v4785_v34  ;;  %v3205_v11 = vrot.slane %v6236_v61, %v4785_v34  ;;  %v3209_v39 = vrot.slane %v6238_v17, %v4785_v34  ;;  %v3213_v25 = vrot.slane %v6240_v2, %v4785_v34 }
 0x1af   :  { %v3217_v38 = vrot.slane %v6242_v21, %v4785_v34  ;;  %v3221_v52 = vrot.slane %v6244_v8, %v4785_v34  ;;  %v3222_v42 = vmul.f32 %v3193_v19, %v6242_v21  ;;  %v3223_v48 = vmul.f32 %v3197_v26, %v6242_v21 }
 0x1b0   :  { %v3224_v22 = vmul.f32 %v3201_v33, %v6242_v21  ;;  %v3225_v44 = vmul.f32 %v3205_v11, %v6242_v21  ;;  %v3226_v14 = vmul.f32 %v3209_v39, %v6242_v21  ;;  %v3227_v45 = vmul.f32 %v3213_v25, %v6242_v21 }
 0x1b1   :  { %v3228_v47 = vmul.f32 %v3217_v38, %v6242_v21  ;;  %v3229_v43 = vmul.f32 %v3221_v52, %v6242_v21  ;;  %v3230_v6 = vadd.f32 %v3222_v42, %v3182_v13  ;;  %v3231_v62 = vadd.f32 %v3223_v48, %v3183_v12 }
 0x1b2   :  { %v3232_v37 = vadd.f32 %v3224_v22, %v3184_v55  ;;  %v3233_v40 = vadd.f32 %v3225_v44, %v3185_v56  ;;  %v3234_v10 = vadd.f32 %v3226_v14, %v3186_v51  ;;  %v3235_v50 = vadd.f32 %v3227_v45, %v3187_v41 }
 0x1b3   :  { %v3236_v4 = vadd.f32 %v3228_v47, %v3188_v46  ;;  %v3237_v54 = vadd.f32 %v3229_v43, %v3189_v23  ;;  %v3241_v53 = vrot.slane %v6230_v20, %v4788_v35  ;;  %v3245_v7 = vrot.slane %v6232_v3, %v4788_v35 }
 0x1b4   :  { %v3249_v57 = vrot.slane %v6234_v58, %v4788_v35  ;;  %v3253_v59 = vrot.slane %v6236_v61, %v4788_v35  ;;  %v3257_v60 = vrot.slane %v6238_v17, %v4788_v35  ;;  %v3261_v63 = vrot.slane %v6240_v2, %v4788_v35 }
 0x1b5   :  { %v3265_v0 = vrot.slane %v6242_v21, %v4788_v35  ;;  %v3269_v20 = vrot.slane %v6244_v8, %v4788_v35  ;;  %v3270_v3 = vmul.f32 %v3241_v53, %v6244_v8  ;;  %v3271_v27 = vmul.f32 %v3245_v7, %v6244_v8 }
 0x1b6   :  { %v3272_v58 = vmul.f32 %v3249_v57, %v6244_v8  ;;  %v3273_v61 = vmul.f32 %v3253_v59, %v6244_v8  ;;  %v3274_v9 = vmul.f32 %v3257_v60, %v6244_v8  ;;  %v3275_v17 = vmul.f32 %v3261_v63, %v6244_v8 }
 0x1b7   :  { %v3276_v2 = vmul.f32 %v3265_v0, %v6244_v8  ;;  %v3277_v28 = vmul.f32 %v3269_v20, %v6244_v8  ;;  %v6438_v21 = vadd.f32 %v3270_v3, %v3230_v6  ;;  %v6440_v16 = vadd.f32 %v3271_v27, %v3231_v62 }
 0x1b8   :  { %v6442_v18 = vadd.f32 %v3272_v58, %v3232_v37  ;;  %v6444_v29 = vadd.f32 %v3273_v61, %v3233_v40  ;;  %v6446_v36 = vadd.f32 %v3274_v9, %v3234_v10  ;;  %v6448_v15 = vadd.f32 %v3275_v17, %v3235_v50 }
 0x1b9   :  { %v6450_v1 = vadd.f32 %v3276_v2, %v3236_v4  ;;  %v6452_v13 = vadd.f32 %v3277_v28, %v3237_v54  ;;  %v3289_v12 = vrot.slane %v6438_v21, %v4684_v24  ;;  %v3293_v8 = vrot.slane %v6440_v16, %v4684_v24 }
 0x1ba   :  { %v3297_v55 = vrot.slane %v6442_v18, %v4684_v24  ;;  %v3301_v56 = vrot.slane %v6444_v29, %v4684_v24  ;;  %v3305_v51 = vrot.slane %v6446_v36, %v4684_v24  ;;  %v3309_v41 = vrot.slane %v6448_v15, %v4684_v24 }
 0x1bb   :  { %v3313_v46 = vrot.slane %v6450_v1, %v4684_v24  ;;  %v3317_v23 = vrot.slane %v6452_v13, %v4684_v24  ;;  %v3318_v19 = vmul.f32 %v3289_v12, %v6438_v21  ;;  %v3319_v26 = vmul.f32 %v3293_v8, %v6438_v21 }
 0x1bc   :  { %v3320_v33 = vmul.f32 %v3297_v55, %v6438_v21  ;;  %v3321_v11 = vmul.f32 %v3301_v56, %v6438_v21  ;;  %v3322_v39 = vmul.f32 %v3305_v51, %v6438_v21  ;;  %v3323_v25 = vmul.f32 %v3309_v41, %v6438_v21 }
 0x1bd   :  { %v3324_v38 = vmul.f32 %v3313_v46, %v6438_v21  ;;  %v3325_v52 = vmul.f32 %v3317_v23, %v6438_v21  ;;  %v3329_v42 = vrot.slane %v6438_v21, %v4689_v49  ;;  %v3333_v48 = vrot.slane %v6440_v16, %v4689_v49 }
 0x1be   :  { %v3337_v22 = vrot.slane %v6442_v18, %v4689_v49  ;;  %v3341_v44 = vrot.slane %v6444_v29, %v4689_v49  ;;  %v3345_v14 = vrot.slane %v6446_v36, %v4689_v49  ;;  %v3349_v45 = vrot.slane %v6448_v15, %v4689_v49 }
 0x1bf   :  { %v3353_v47 = vrot.slane %v6450_v1, %v4689_v49  ;;  %v3357_v43 = vrot.slane %v6452_v13, %v4689_v49  ;;  %v3358_v6 = vmul.f32 %v3329_v42, %v6440_v16  ;;  %v3359_v62 = vmul.f32 %v3333_v48, %v6440_v16 }
 0x1c0   :  { %v3360_v37 = vmul.f32 %v3337_v22, %v6440_v16  ;;  %v3361_v40 = vmul.f32 %v3341_v44, %v6440_v16  ;;  %v3362_v10 = vmul.f32 %v3345_v14, %v6440_v16  ;;  %v3363_v50 = vmul.f32 %v3349_v45, %v6440_v16 }
 0x1c1   :  { %v3364_v4 = vmul.f32 %v3353_v47, %v6440_v16  ;;  %v3365_v54 = vmul.f32 %v3357_v43, %v6440_v16  ;;  %v3366_v53 = vadd.f32 %v3358_v6, %v3318_v19  ;;  %v3367_v7 = vadd.f32 %v3359_v62, %v3319_v26 }
 0x1c2   :  { %v3368_v57 = vadd.f32 %v3360_v37, %v3320_v33  ;;  %v3369_v59 = vadd.f32 %v3361_v40, %v3321_v11  ;;  %v3370_v60 = vadd.f32 %v3362_v10, %v3322_v39  ;;  %v3371_v63 = vadd.f32 %v3363_v50, %v3323_v25 }
 0x1c3   :  { %v3372_v0 = vadd.f32 %v3364_v4, %v3324_v38  ;;  %v3373_v20 = vadd.f32 %v3365_v54, %v3325_v52  ;;  %v3377_v3 = vrot.slane %v6438_v21, %v4692_v5  ;;  %v3381_v27 = vrot.slane %v6440_v16, %v4692_v5 }
 0x1c4   :  { %v3385_v58 = vrot.slane %v6442_v18, %v4692_v5  ;;  %v3389_v61 = vrot.slane %v6444_v29, %v4692_v5  ;;  %v3393_v9 = vrot.slane %v6446_v36, %v4692_v5  ;;  %v3397_v17 = vrot.slane %v6448_v15, %v4692_v5 }
 0x1c5   :  { %v3401_v2 = vrot.slane %v6450_v1, %v4692_v5  ;;  %v3405_v28 = vrot.slane %v6452_v13, %v4692_v5  ;;  %v3406_v12 = vmul.f32 %v3377_v3, %v6442_v18  ;;  %v3407_v8 = vmul.f32 %v3381_v27, %v6442_v18 }
 0x1c6   :  { %v3408_v55 = vmul.f32 %v3385_v58, %v6442_v18  ;;  %v3409_v56 = vmul.f32 %v3389_v61, %v6442_v18  ;;  %v3410_v51 = vmul.f32 %v3393_v9, %v6442_v18  ;;  %v3411_v41 = vmul.f32 %v3397_v17, %v6442_v18 }
 0x1c7   :  { %v3412_v46 = vmul.f32 %v3401_v2, %v6442_v18  ;;  %v3413_v23 = vmul.f32 %v3405_v28, %v6442_v18  ;;  %v3414_v19 = vadd.f32 %v3406_v12, %v3366_v53  ;;  %v3415_v26 = vadd.f32 %v3407_v8, %v3367_v7 }
 0x1c8   :  { %v3416_v33 = vadd.f32 %v3408_v55, %v3368_v57  ;;  %v3417_v11 = vadd.f32 %v3409_v56, %v3369_v59  ;;  %v3418_v39 = vadd.f32 %v3410_v51, %v3370_v60  ;;  %v3419_v25 = vadd.f32 %v3411_v41, %v3371_v63 }
 0x1c9   :  { %v3420_v38 = vadd.f32 %v3412_v46, %v3372_v0  ;;  %v3421_v52 = vadd.f32 %v3413_v23, %v3373_v20  ;;  %v3425_v42 = vrot.slane %v6438_v21, %v4776_v30  ;;  %v3429_v48 = vrot.slane %v6440_v16, %v4776_v30 }
 0x1ca   :  { %v3433_v22 = vrot.slane %v6442_v18, %v4776_v30  ;;  %v3437_v44 = vrot.slane %v6444_v29, %v4776_v30  ;;  %v3441_v14 = vrot.slane %v6446_v36, %v4776_v30  ;;  %v3445_v45 = vrot.slane %v6448_v15, %v4776_v30 }
 0x1cb   :  { %v3449_v47 = vrot.slane %v6450_v1, %v4776_v30  ;;  %v3453_v43 = vrot.slane %v6452_v13, %v4776_v30  ;;  %v3454_v6 = vmul.f32 %v3425_v42, %v6444_v29  ;;  %v3455_v62 = vmul.f32 %v3429_v48, %v6444_v29 }
 0x1cc   :  { %v3456_v37 = vmul.f32 %v3433_v22, %v6444_v29  ;;  %v3457_v40 = vmul.f32 %v3437_v44, %v6444_v29  ;;  %v3458_v10 = vmul.f32 %v3441_v14, %v6444_v29  ;;  %v3459_v50 = vmul.f32 %v3445_v45, %v6444_v29 }
 0x1cd   :  { %v3460_v4 = vmul.f32 %v3449_v47, %v6444_v29  ;;  %v3461_v54 = vmul.f32 %v3453_v43, %v6444_v29  ;;  %v3462_v53 = vadd.f32 %v3454_v6, %v3414_v19  ;;  %v3463_v7 = vadd.f32 %v3455_v62, %v3415_v26 }
 0x1ce   :  { %v3464_v57 = vadd.f32 %v3456_v37, %v3416_v33  ;;  %v3465_v59 = vadd.f32 %v3457_v40, %v3417_v11  ;;  %v3466_v60 = vadd.f32 %v3458_v10, %v3418_v39  ;;  %v3467_v63 = vadd.f32 %v3459_v50, %v3419_v25 }
 0x1cf   :  { %v3468_v0 = vadd.f32 %v3460_v4, %v3420_v38  ;;  %v3469_v20 = vadd.f32 %v3461_v54, %v3421_v52  ;;  %v3473_v3 = vrot.slane %v6438_v21, %v4779_v31  ;;  %v3477_v27 = vrot.slane %v6440_v16, %v4779_v31 }
 0x1d0   :  { %v3481_v58 = vrot.slane %v6442_v18, %v4779_v31  ;;  %v3485_v61 = vrot.slane %v6444_v29, %v4779_v31  ;;  %v3489_v9 = vrot.slane %v6446_v36, %v4779_v31  ;;  %v3493_v17 = vrot.slane %v6448_v15, %v4779_v31 }
 0x1d1   :  { %v3497_v2 = vrot.slane %v6450_v1, %v4779_v31  ;;  %v3501_v28 = vrot.slane %v6452_v13, %v4779_v31  ;;  %v3502_v12 = vmul.f32 %v3473_v3, %v6446_v36  ;;  %v3503_v8 = vmul.f32 %v3477_v27, %v6446_v36 }
 0x1d2   :  { %v3504_v55 = vmul.f32 %v3481_v58, %v6446_v36  ;;  %v3505_v56 = vmul.f32 %v3485_v61, %v6446_v36  ;;  %v3506_v51 = vmul.f32 %v3489_v9, %v6446_v36  ;;  %v3507_v41 = vmul.f32 %v3493_v17, %v6446_v36 }
 0x1d3   :  { %v3508_v46 = vmul.f32 %v3497_v2, %v6446_v36  ;;  %v3509_v23 = vmul.f32 %v3501_v28, %v6446_v36  ;;  %v3510_v19 = vadd.f32 %v3502_v12, %v3462_v53  ;;  %v3511_v26 = vadd.f32 %v3503_v8, %v3463_v7 }
 0x1d4   :  { %v3512_v33 = vadd.f32 %v3504_v55, %v3464_v57  ;;  %v3513_v11 = vadd.f32 %v3505_v56, %v3465_v59  ;;  %v3514_v39 = vadd.f32 %v3506_v51, %v3466_v60  ;;  %v3515_v25 = vadd.f32 %v3507_v41, %v3467_v63 }
 0x1d5   :  { %v3516_v38 = vadd.f32 %v3508_v46, %v3468_v0  ;;  %v3517_v52 = vadd.f32 %v3509_v23, %v3469_v20  ;;  %v3521_v42 = vrot.slane %v6438_v21, %v4782_v32  ;;  %v3525_v48 = vrot.slane %v6440_v16, %v4782_v32 }
 0x1d6   :  { %v3529_v22 = vrot.slane %v6442_v18, %v4782_v32  ;;  %v3533_v44 = vrot.slane %v6444_v29, %v4782_v32  ;;  %v3537_v14 = vrot.slane %v6446_v36, %v4782_v32  ;;  %v3541_v45 = vrot.slane %v6448_v15, %v4782_v32 }
 0x1d7   :  { %v3545_v47 = vrot.slane %v6450_v1, %v4782_v32  ;;  %v3549_v43 = vrot.slane %v6452_v13, %v4782_v32  ;;  %v3550_v6 = vmul.f32 %v3521_v42, %v6448_v15  ;;  %v3551_v62 = vmul.f32 %v3525_v48, %v6448_v15 }
 0x1d8   :  { %v3552_v37 = vmul.f32 %v3529_v22, %v6448_v15  ;;  %v3553_v40 = vmul.f32 %v3533_v44, %v6448_v15  ;;  %v3554_v10 = vmul.f32 %v3537_v14, %v6448_v15  ;;  %v3555_v50 = vmul.f32 %v3541_v45, %v6448_v15 }
 0x1d9   :  { %v3556_v4 = vmul.f32 %v3545_v47, %v6448_v15  ;;  %v3557_v54 = vmul.f32 %v3549_v43, %v6448_v15  ;;  %v3558_v53 = vadd.f32 %v3550_v6, %v3510_v19  ;;  %v3559_v7 = vadd.f32 %v3551_v62, %v3511_v26 }
 0x1da   :  { %v3560_v57 = vadd.f32 %v3552_v37, %v3512_v33  ;;  %v3561_v59 = vadd.f32 %v3553_v40, %v3513_v11  ;;  %v3562_v60 = vadd.f32 %v3554_v10, %v3514_v39  ;;  %v3563_v63 = vadd.f32 %v3555_v50, %v3515_v25 }
 0x1db   :  { %v3564_v0 = vadd.f32 %v3556_v4, %v3516_v38  ;;  %v3565_v20 = vadd.f32 %v3557_v54, %v3517_v52  ;;  %v3569_v3 = vrot.slane %v6438_v21, %v4785_v34  ;;  %v3573_v27 = vrot.slane %v6440_v16, %v4785_v34 }
 0x1dc   :  { %v3577_v58 = vrot.slane %v6442_v18, %v4785_v34  ;;  %v3581_v61 = vrot.slane %v6444_v29, %v4785_v34  ;;  %v3585_v9 = vrot.slane %v6446_v36, %v4785_v34  ;;  %v3589_v17 = vrot.slane %v6448_v15, %v4785_v34 }
 0x1dd   :  { %v3593_v2 = vrot.slane %v6450_v1, %v4785_v34  ;;  %v3597_v28 = vrot.slane %v6452_v13, %v4785_v34  ;;  %v3598_v12 = vmul.f32 %v3569_v3, %v6450_v1  ;;  %v3599_v8 = vmul.f32 %v3573_v27, %v6450_v1 }
 0x1de   :  { %v3600_v55 = vmul.f32 %v3577_v58, %v6450_v1  ;;  %v3601_v56 = vmul.f32 %v3581_v61, %v6450_v1  ;;  %v3602_v51 = vmul.f32 %v3585_v9, %v6450_v1  ;;  %v3603_v41 = vmul.f32 %v3589_v17, %v6450_v1 }
 0x1df   :  { %v3604_v46 = vmul.f32 %v3593_v2, %v6450_v1  ;;  %v3605_v23 = vmul.f32 %v3597_v28, %v6450_v1  ;;  %v3606_v19 = vadd.f32 %v3598_v12, %v3558_v53  ;;  %v3607_v26 = vadd.f32 %v3599_v8, %v3559_v7 }
 0x1e0   :  { %v3608_v33 = vadd.f32 %v3600_v55, %v3560_v57  ;;  %v3609_v11 = vadd.f32 %v3601_v56, %v3561_v59  ;;  %v3610_v39 = vadd.f32 %v3602_v51, %v3562_v60  ;;  %v3611_v25 = vadd.f32 %v3603_v41, %v3563_v63 }
 0x1e1   :  { %v3612_v38 = vadd.f32 %v3604_v46, %v3564_v0  ;;  %v3613_v52 = vadd.f32 %v3605_v23, %v3565_v20  ;;  %v3617_v42 = vrot.slane %v6438_v21, %v4788_v35  ;;  %v3621_v48 = vrot.slane %v6440_v16, %v4788_v35 }
 0x1e2   :  { %v3625_v22 = vrot.slane %v6442_v18, %v4788_v35  ;;  %v3629_v44 = vrot.slane %v6444_v29, %v4788_v35  ;;  %v3633_v14 = vrot.slane %v6446_v36, %v4788_v35  ;;  %v3637_v45 = vrot.slane %v6448_v15, %v4788_v35 }
 0x1e3   :  { %v3641_v47 = vrot.slane %v6450_v1, %v4788_v35  ;;  %v3645_v21 = vrot.slane %v6452_v13, %v4788_v35  ;;  %v3646_v16 = vmul.f32 %v3617_v42, %v6452_v13  ;;  %v3647_v43 = vmul.f32 %v3621_v48, %v6452_v13 }
 0x1e4   :  { %v3648_v18 = vmul.f32 %v3625_v22, %v6452_v13  ;;  %v3649_v29 = vmul.f32 %v3629_v44, %v6452_v13  ;;  %v3650_v6 = vmul.f32 %v3633_v14, %v6452_v13  ;;  %v3651_v36 = vmul.f32 %v3637_v45, %v6452_v13 }
 0x1e5   :  { %v3652_v15 = vmul.f32 %v3641_v47, %v6452_v13  ;;  %v3653_v62 = vmul.f32 %v3645_v21, %v6452_v13  ;;  %v6646_v1 = vadd.f32 %v3646_v16, %v3606_v19  ;;  %v6648_v37 = vadd.f32 %v3647_v43, %v3607_v26 }
 0x1e6   :  { %v6650_v40 = vadd.f32 %v3648_v18, %v3608_v33  ;;  %v6652_v10 = vadd.f32 %v3649_v29, %v3609_v11  ;;  %v6654_v50 = vadd.f32 %v3650_v6, %v3610_v39  ;;  %v6656_v4 = vadd.f32 %v3651_v36, %v3611_v25 }
 0x1e7   :  { %v6658_v54 = vadd.f32 %v3652_v15, %v3612_v38  ;;  %v6660_v53 = vadd.f32 %v3653_v62, %v3613_v52  ;;  %v3665_v7 = vrot.slane %v6646_v1, %v4684_v24  ;;  %v3669_v13 = vrot.slane %v6648_v37, %v4684_v24 }
 0x1e8   :  { %v3673_v57 = vrot.slane %v6650_v40, %v4684_v24  ;;  %v3677_v59 = vrot.slane %v6652_v10, %v4684_v24  ;;  %v3681_v60 = vrot.slane %v6654_v50, %v4684_v24  ;;  %v3685_v63 = vrot.slane %v6656_v4, %v4684_v24 }
 0x1e9   :  { %v3689_v0 = vrot.slane %v6658_v54, %v4684_v24  ;;  %v3693_v20 = vrot.slane %v6660_v53, %v4684_v24  ;;  %v3694_v3 = vmul.f32 %v3665_v7, %v6646_v1  ;;  %v3695_v27 = vmul.f32 %v3669_v13, %v6646_v1 }
 0x1ea   :  { %v3696_v58 = vmul.f32 %v3673_v57, %v6646_v1  ;;  %v3697_v61 = vmul.f32 %v3677_v59, %v6646_v1  ;;  %v3698_v9 = vmul.f32 %v3681_v60, %v6646_v1  ;;  %v3699_v17 = vmul.f32 %v3685_v63, %v6646_v1 }
 0x1eb   :  { %v3700_v2 = vmul.f32 %v3689_v0, %v6646_v1  ;;  %v3701_v28 = vmul.f32 %v3693_v20, %v6646_v1  ;;  %v3705_v12 = vrot.slane %v6646_v1, %v4689_v49  ;;  %v3709_v8 = vrot.slane %v6648_v37, %v4689_v49 }
 0x1ec   :  { %v3713_v55 = vrot.slane %v6650_v40, %v4689_v49  ;;  %v3717_v56 = vrot.slane %v6652_v10, %v4689_v49  ;;  %v3721_v51 = vrot.slane %v6654_v50, %v4689_v49  ;;  %v3725_v41 = vrot.slane %v6656_v4, %v4689_v49 }
 0x1ed   :  { %v3729_v46 = vrot.slane %v6658_v54, %v4689_v49  ;;  %v3733_v23 = vrot.slane %v6660_v53, %v4689_v49  ;;  %v3734_v19 = vmul.f32 %v3705_v12, %v6648_v37  ;;  %v3735_v26 = vmul.f32 %v3709_v8, %v6648_v37 }
 0x1ee   :  { %v3736_v33 = vmul.f32 %v3713_v55, %v6648_v37  ;;  %v3737_v11 = vmul.f32 %v3717_v56, %v6648_v37  ;;  %v3738_v39 = vmul.f32 %v3721_v51, %v6648_v37  ;;  %v3739_v25 = vmul.f32 %v3725_v41, %v6648_v37 }
 0x1ef   :  { %v3740_v38 = vmul.f32 %v3729_v46, %v6648_v37  ;;  %v3741_v52 = vmul.f32 %v3733_v23, %v6648_v37  ;;  %v3742_v42 = vadd.f32 %v3734_v19, %v3694_v3  ;;  %v3743_v48 = vadd.f32 %v3735_v26, %v3695_v27 }
 0x1f0   :  { %v3744_v22 = vadd.f32 %v3736_v33, %v3696_v58  ;;  %v3745_v44 = vadd.f32 %v3737_v11, %v3697_v61  ;;  %v3746_v14 = vadd.f32 %v3738_v39, %v3698_v9  ;;  %v3747_v45 = vadd.f32 %v3739_v25, %v3699_v17 }
 0x1f1   :  { %v3748_v47 = vadd.f32 %v3740_v38, %v3700_v2  ;;  %v3749_v21 = vadd.f32 %v3741_v52, %v3701_v28  ;;  %v3753_v16 = vrot.slane %v6646_v1, %v4692_v5  ;;  %v3757_v43 = vrot.slane %v6648_v37, %v4692_v5 }
 0x1f2   :  { %v3761_v18 = vrot.slane %v6650_v40, %v4692_v5  ;;  %v3765_v29 = vrot.slane %v6652_v10, %v4692_v5  ;;  %v3769_v6 = vrot.slane %v6654_v50, %v4692_v5  ;;  %v3773_v36 = vrot.slane %v6656_v4, %v4692_v5 }
 0x1f3   :  { %v3777_v15 = vrot.slane %v6658_v54, %v4692_v5  ;;  %v3781_v62 = vrot.slane %v6660_v53, %v4692_v5  ;;  %v3782_v7 = vmul.f32 %v3753_v16, %v6650_v40  ;;  %v3783_v13 = vmul.f32 %v3757_v43, %v6650_v40 }
 0x1f4   :  { %v3784_v57 = vmul.f32 %v3761_v18, %v6650_v40  ;;  %v3785_v59 = vmul.f32 %v3765_v29, %v6650_v40  ;;  %v3786_v60 = vmul.f32 %v3769_v6, %v6650_v40  ;;  %v3787_v63 = vmul.f32 %v3773_v36, %v6650_v40 }
 0x1f5   :  { %v3788_v0 = vmul.f32 %v3777_v15, %v6650_v40  ;;  %v3789_v20 = vmul.f32 %v3781_v62, %v6650_v40  ;;  %v3790_v3 = vadd.f32 %v3782_v7, %v3742_v42  ;;  %v3791_v27 = vadd.f32 %v3783_v13, %v3743_v48 }
 0x1f6   :  { %v3792_v58 = vadd.f32 %v3784_v57, %v3744_v22  ;;  %v3793_v61 = vadd.f32 %v3785_v59, %v3745_v44  ;;  %v3794_v9 = vadd.f32 %v3786_v60, %v3746_v14  ;;  %v3795_v17 = vadd.f32 %v3787_v63, %v3747_v45 }
 0x1f7   :  { %v3796_v2 = vadd.f32 %v3788_v0, %v3748_v47  ;;  %v3797_v28 = vadd.f32 %v3789_v20, %v3749_v21  ;;  %v3801_v12 = vrot.slane %v6646_v1, %v4776_v30  ;;  %v3805_v8 = vrot.slane %v6648_v37, %v4776_v30 }
 0x1f8   :  { %v3809_v55 = vrot.slane %v6650_v40, %v4776_v30  ;;  %v3813_v56 = vrot.slane %v6652_v10, %v4776_v30  ;;  %v3817_v51 = vrot.slane %v6654_v50, %v4776_v30  ;;  %v3821_v41 = vrot.slane %v6656_v4, %v4776_v30 }
 0x1f9   :  { %v3825_v46 = vrot.slane %v6658_v54, %v4776_v30  ;;  %v3829_v23 = vrot.slane %v6660_v53, %v4776_v30  ;;  %v3830_v19 = vmul.f32 %v3801_v12, %v6652_v10  ;;  %v3831_v26 = vmul.f32 %v3805_v8, %v6652_v10 }
 0x1fa   :  { %v3832_v33 = vmul.f32 %v3809_v55, %v6652_v10  ;;  %v3833_v11 = vmul.f32 %v3813_v56, %v6652_v10  ;;  %v3834_v39 = vmul.f32 %v3817_v51, %v6652_v10  ;;  %v3835_v25 = vmul.f32 %v3821_v41, %v6652_v10 }
 0x1fb   :  { %v3836_v38 = vmul.f32 %v3825_v46, %v6652_v10  ;;  %v3837_v52 = vmul.f32 %v3829_v23, %v6652_v10  ;;  %v3838_v42 = vadd.f32 %v3830_v19, %v3790_v3  ;;  %v3839_v48 = vadd.f32 %v3831_v26, %v3791_v27 }
 0x1fc   :  { %v3840_v22 = vadd.f32 %v3832_v33, %v3792_v58  ;;  %v3841_v44 = vadd.f32 %v3833_v11, %v3793_v61  ;;  %v3842_v14 = vadd.f32 %v3834_v39, %v3794_v9  ;;  %v3843_v45 = vadd.f32 %v3835_v25, %v3795_v17 }
 0x1fd   :  { %v3844_v47 = vadd.f32 %v3836_v38, %v3796_v2  ;;  %v3845_v21 = vadd.f32 %v3837_v52, %v3797_v28  ;;  %v3849_v16 = vrot.slane %v6646_v1, %v4779_v31  ;;  %v3853_v43 = vrot.slane %v6648_v37, %v4779_v31 }
 0x1fe   :  { %v3857_v18 = vrot.slane %v6650_v40, %v4779_v31  ;;  %v3861_v29 = vrot.slane %v6652_v10, %v4779_v31  ;;  %v3865_v6 = vrot.slane %v6654_v50, %v4779_v31  ;;  %v3869_v36 = vrot.slane %v6656_v4, %v4779_v31 }
 0x1ff   :  { %v3873_v15 = vrot.slane %v6658_v54, %v4779_v31  ;;  %v3877_v62 = vrot.slane %v6660_v53, %v4779_v31  ;;  %v3878_v7 = vmul.f32 %v3849_v16, %v6654_v50  ;;  %v3879_v13 = vmul.f32 %v3853_v43, %v6654_v50 }
 0x200   :  { %v3880_v57 = vmul.f32 %v3857_v18, %v6654_v50  ;;  %v3881_v59 = vmul.f32 %v3861_v29, %v6654_v50  ;;  %v3882_v60 = vmul.f32 %v3865_v6, %v6654_v50  ;;  %v3883_v63 = vmul.f32 %v3869_v36, %v6654_v50 }
 0x201   :  { %v3884_v0 = vmul.f32 %v3873_v15, %v6654_v50  ;;  %v3885_v20 = vmul.f32 %v3877_v62, %v6654_v50  ;;  %v3886_v3 = vadd.f32 %v3878_v7, %v3838_v42  ;;  %v3887_v27 = vadd.f32 %v3879_v13, %v3839_v48 }
 0x202   :  { %v3888_v58 = vadd.f32 %v3880_v57, %v3840_v22  ;;  %v3889_v61 = vadd.f32 %v3881_v59, %v3841_v44  ;;  %v3890_v9 = vadd.f32 %v3882_v60, %v3842_v14  ;;  %v3891_v17 = vadd.f32 %v3883_v63, %v3843_v45 }
 0x203   :  { %v3892_v2 = vadd.f32 %v3884_v0, %v3844_v47  ;;  %v3893_v28 = vadd.f32 %v3885_v20, %v3845_v21  ;;  %v3897_v12 = vrot.slane %v6646_v1, %v4782_v32  ;;  %v3901_v8 = vrot.slane %v6648_v37, %v4782_v32 }
 0x204   :  { %v3905_v55 = vrot.slane %v6650_v40, %v4782_v32  ;;  %v3909_v56 = vrot.slane %v6652_v10, %v4782_v32  ;;  %v3913_v51 = vrot.slane %v6654_v50, %v4782_v32  ;;  %v3917_v41 = vrot.slane %v6656_v4, %v4782_v32 }
 0x205   :  { %v3921_v46 = vrot.slane %v6658_v54, %v4782_v32  ;;  %v3925_v23 = vrot.slane %v6660_v53, %v4782_v32  ;;  %v3926_v19 = vmul.f32 %v3897_v12, %v6656_v4  ;;  %v3927_v26 = vmul.f32 %v3901_v8, %v6656_v4 }
 0x206   :  { %v3928_v33 = vmul.f32 %v3905_v55, %v6656_v4  ;;  %v3929_v11 = vmul.f32 %v3909_v56, %v6656_v4  ;;  %v3930_v39 = vmul.f32 %v3913_v51, %v6656_v4  ;;  %v3931_v25 = vmul.f32 %v3917_v41, %v6656_v4 }
 0x207   :  { %v3932_v38 = vmul.f32 %v3921_v46, %v6656_v4  ;;  %v3933_v52 = vmul.f32 %v3925_v23, %v6656_v4  ;;  %v3934_v42 = vadd.f32 %v3926_v19, %v3886_v3  ;;  %v3935_v48 = vadd.f32 %v3927_v26, %v3887_v27 }
 0x208   :  { %v3936_v22 = vadd.f32 %v3928_v33, %v3888_v58  ;;  %v3937_v44 = vadd.f32 %v3929_v11, %v3889_v61  ;;  %v3938_v14 = vadd.f32 %v3930_v39, %v3890_v9  ;;  %v3939_v45 = vadd.f32 %v3931_v25, %v3891_v17 }
 0x209   :  { %v3940_v47 = vadd.f32 %v3932_v38, %v3892_v2  ;;  %v3941_v21 = vadd.f32 %v3933_v52, %v3893_v28  ;;  %v3945_v16 = vrot.slane %v6646_v1, %v4785_v34  ;;  %v3949_v43 = vrot.slane %v6648_v37, %v4785_v34 }
 0x20a   :  { %v3953_v18 = vrot.slane %v6650_v40, %v4785_v34  ;;  %v3957_v29 = vrot.slane %v6652_v10, %v4785_v34  ;;  %v3961_v6 = vrot.slane %v6654_v50, %v4785_v34  ;;  %v3965_v36 = vrot.slane %v6656_v4, %v4785_v34 }
 0x20b   :  { %v3969_v15 = vrot.slane %v6658_v54, %v4785_v34  ;;  %v3973_v62 = vrot.slane %v6660_v53, %v4785_v34  ;;  %v3974_v7 = vmul.f32 %v3945_v16, %v6658_v54  ;;  %v3975_v13 = vmul.f32 %v3949_v43, %v6658_v54 }
 0x20c   :  { %v3976_v57 = vmul.f32 %v3953_v18, %v6658_v54  ;;  %v3977_v59 = vmul.f32 %v3957_v29, %v6658_v54  ;;  %v3978_v60 = vmul.f32 %v3961_v6, %v6658_v54  ;;  %v3979_v63 = vmul.f32 %v3965_v36, %v6658_v54 }
 0x20d   :  { %v3980_v0 = vmul.f32 %v3969_v15, %v6658_v54  ;;  %v3981_v20 = vmul.f32 %v3973_v62, %v6658_v54  ;;  %v3982_v3 = vadd.f32 %v3974_v7, %v3934_v42  ;;  %v3983_v27 = vadd.f32 %v3975_v13, %v3935_v48 }
 0x20e   :  { %v3984_v58 = vadd.f32 %v3976_v57, %v3936_v22  ;;  %v3985_v61 = vadd.f32 %v3977_v59, %v3937_v44  ;;  %v3986_v9 = vadd.f32 %v3978_v60, %v3938_v14  ;;  %v3987_v17 = vadd.f32 %v3979_v63, %v3939_v45 }
 0x20f   :  { %v3988_v2 = vadd.f32 %v3980_v0, %v3940_v47  ;;  %v3989_v28 = vadd.f32 %v3981_v20, %v3941_v21  ;;  %v3993_v12 = vrot.slane %v6646_v1, %v4788_v35  ;;  %v3997_v8 = vrot.slane %v6648_v37, %v4788_v35 }
 0x210   :  { %v4001_v55 = vrot.slane %v6650_v40, %v4788_v35  ;;  %v4005_v56 = vrot.slane %v6652_v10, %v4788_v35  ;;  %v4009_v51 = vrot.slane %v6654_v50, %v4788_v35  ;;  %v4013_v41 = vrot.slane %v6656_v4, %v4788_v35 }
 0x211   :  { %v4017_v46 = vrot.slane %v6658_v54, %v4788_v35  ;;  %v4021_v1 = vrot.slane %v6660_v53, %v4788_v35  ;;  %v4022_v37 = vmul.f32 %v3993_v12, %v6660_v53  ;;  %v4023_v23 = vmul.f32 %v3997_v8, %v6660_v53 }
 0x212   :  { %v4024_v40 = vmul.f32 %v4001_v55, %v6660_v53  ;;  %v4025_v10 = vmul.f32 %v4005_v56, %v6660_v53  ;;  %v4026_v19 = vmul.f32 %v4009_v51, %v6660_v53  ;;  %v4027_v50 = vmul.f32 %v4013_v41, %v6660_v53 }
 0x213   :  { %v4028_v4 = vmul.f32 %v4017_v46, %v6660_v53  ;;  %v4029_v26 = vmul.f32 %v4021_v1, %v6660_v53  ;;  %v6854_v54 = vadd.f32 %v4022_v37, %v3982_v3  ;;  %v6856_v33 = vadd.f32 %v4023_v23, %v3983_v27 }
 0x214   :  { %v6858_v11 = vadd.f32 %v4024_v40, %v3984_v58  ;;  %v6860_v39 = vadd.f32 %v4025_v10, %v3985_v61  ;;  %v6862_v25 = vadd.f32 %v4026_v19, %v3986_v9  ;;  %v6864_v38 = vadd.f32 %v4027_v50, %v3987_v17 }
 0x215   :  { %v6866_v52 = vadd.f32 %v4028_v4, %v3988_v2  ;;  %v6868_v42 = vadd.f32 %v4029_v26, %v3989_v28  ;;  %v4041_v48 = vrot.slane %v6854_v54, %v4684_v24  ;;  %v4045_v53 = vrot.slane %v6856_v33, %v4684_v24 }
 0x216   :  { %v4049_v22 = vrot.slane %v6858_v11, %v4684_v24  ;;  %v4053_v44 = vrot.slane %v6860_v39, %v4684_v24  ;;  %v4057_v14 = vrot.slane %v6862_v25, %v4684_v24  ;;  %v4061_v45 = vrot.slane %v6864_v38, %v4684_v24 }
 0x217   :  { %v4065_v47 = vrot.slane %v6866_v52, %v4684_v24  ;;  %v4069_v21 = vrot.slane %v6868_v42, %v4684_v24  ;;  %v4070_v16 = vmul.f32 %v4041_v48, %v6854_v54  ;;  %v4071_v43 = vmul.f32 %v4045_v53, %v6854_v54 }
 0x218   :  { %v4072_v18 = vmul.f32 %v4049_v22, %v6854_v54  ;;  %v4073_v29 = vmul.f32 %v4053_v44, %v6854_v54  ;;  %v4074_v6 = vmul.f32 %v4057_v14, %v6854_v54  ;;  %v4075_v36 = vmul.f32 %v4061_v45, %v6854_v54 }
 0x219   :  { %v4076_v15 = vmul.f32 %v4065_v47, %v6854_v54  ;;  %v4077_v62 = vmul.f32 %v4069_v21, %v6854_v54  ;;  %v4081_v7 = vrot.slane %v6854_v54, %v4689_v49  ;;  %v4085_v24 = vrot.slane %v6856_v33, %v4689_v49 }
 0x21a   :  { %v4089_v13 = vrot.slane %v6858_v11, %v4689_v49  ;;  %v4093_v57 = vrot.slane %v6860_v39, %v4689_v49  ;;  %v4097_v59 = vrot.slane %v6862_v25, %v4689_v49  ;;  %v4101_v60 = vrot.slane %v6864_v38, %v4689_v49 }
 0x21b   :  { %v4105_v63 = vrot.slane %v6866_v52, %v4689_v49  ;;  %v4109_v0 = vrot.slane %v6868_v42, %v4689_v49  ;;  %v4110_v20 = vmul.f32 %v4081_v7, %v6856_v33  ;;  %v4111_v3 = vmul.f32 %v4085_v24, %v6856_v33 }
 0x21c   :  { %v4112_v27 = vmul.f32 %v4089_v13, %v6856_v33  ;;  %v4113_v58 = vmul.f32 %v4093_v57, %v6856_v33  ;;  %v4114_v61 = vmul.f32 %v4097_v59, %v6856_v33  ;;  %v4115_v9 = vmul.f32 %v4101_v60, %v6856_v33 }
 0x21d   :  { %v4116_v17 = vmul.f32 %v4105_v63, %v6856_v33  ;;  %v4117_v2 = vmul.f32 %v4109_v0, %v6856_v33  ;;  %v4118_v28 = vadd.f32 %v4110_v20, %v4070_v16  ;;  %v4119_v12 = vadd.f32 %v4111_v3, %v4071_v43 }
 0x21e   :  { %v4120_v8 = vadd.f32 %v4112_v27, %v4072_v18  ;;  %v4121_v49 = vadd.f32 %v4113_v58, %v4073_v29  ;;  %v4122_v55 = vadd.f32 %v4114_v61, %v4074_v6  ;;  %v4123_v56 = vadd.f32 %v4115_v9, %v4075_v36 }
 0x21f   :  { %v4124_v51 = vadd.f32 %v4116_v17, %v4076_v15  ;;  %v4125_v41 = vadd.f32 %v4117_v2, %v4077_v62  ;;  %v4129_v46 = vrot.slane %v6854_v54, %v4692_v5  ;;  %v4133_v1 = vrot.slane %v6856_v33, %v4692_v5 }
 0x220   :  { %v4137_v37 = vrot.slane %v6858_v11, %v4692_v5  ;;  %v4141_v23 = vrot.slane %v6860_v39, %v4692_v5  ;;  %v4145_v40 = vrot.slane %v6862_v25, %v4692_v5  ;;  %v4149_v10 = vrot.slane %v6864_v38, %v4692_v5 }
 0x221   :  { %v4153_v19 = vrot.slane %v6866_v52, %v4692_v5  ;;  %v4157_v50 = vrot.slane %v6868_v42, %v4692_v5  ;;  %v4158_v4 = vmul.f32 %v4129_v46, %v6858_v11  ;;  %v4159_v26 = vmul.f32 %v4133_v1, %v6858_v11 }
 0x222   :  { %v4160_v48 = vmul.f32 %v4137_v37, %v6858_v11  ;;  %v4161_v53 = vmul.f32 %v4141_v23, %v6858_v11  ;;  %v4162_v22 = vmul.f32 %v4145_v40, %v6858_v11  ;;  %v4163_v44 = vmul.f32 %v4149_v10, %v6858_v11 }
 0x223   :  { %v4164_v14 = vmul.f32 %v4153_v19, %v6858_v11  ;;  %v4165_v45 = vmul.f32 %v4157_v50, %v6858_v11  ;;  %v4166_v47 = vadd.f32 %v4158_v4, %v4118_v28  ;;  %v4167_v21 = vadd.f32 %v4159_v26, %v4119_v12 }
 0x224   :  { %v4168_v16 = vadd.f32 %v4160_v48, %v4120_v8  ;;  %v4169_v5 = vadd.f32 %v4161_v53, %v4121_v49  ;;  %v4170_v43 = vadd.f32 %v4162_v22, %v4122_v55  ;;  %v4171_v18 = vadd.f32 %v4163_v44, %v4123_v56 }
 0x225   :  { %v4172_v29 = vadd.f32 %v4164_v14, %v4124_v51  ;;  %v4173_v6 = vadd.f32 %v4165_v45, %v4125_v41  ;;  %v4177_v36 = vrot.slane %v6854_v54, %v4776_v30  ;;  %v4181_v15 = vrot.slane %v6856_v33, %v4776_v30 }
 0x226   :  { %v4185_v62 = vrot.slane %v6858_v11, %v4776_v30  ;;  %v4189_v7 = vrot.slane %v6860_v39, %v4776_v30  ;;  %v4193_v24 = vrot.slane %v6862_v25, %v4776_v30  ;;  %v4197_v13 = vrot.slane %v6864_v38, %v4776_v30 }
 0x227   :  { %v4201_v57 = vrot.slane %v6866_v52, %v4776_v30  ;;  %v4205_v59 = vrot.slane %v6868_v42, %v4776_v30  ;;  %v4206_v60 = vmul.f32 %v4177_v36, %v6860_v39  ;;  %v4207_v63 = vmul.f32 %v4181_v15, %v6860_v39 }
 0x228   :  { %v4208_v0 = vmul.f32 %v4185_v62, %v6860_v39  ;;  %v4209_v20 = vmul.f32 %v4189_v7, %v6860_v39  ;;  %v4210_v3 = vmul.f32 %v4193_v24, %v6860_v39  ;;  %v4211_v27 = vmul.f32 %v4197_v13, %v6860_v39 }
 0x229   :  { %v4212_v58 = vmul.f32 %v4201_v57, %v6860_v39  ;;  %v4213_v61 = vmul.f32 %v4205_v59, %v6860_v39  ;;  %v4214_v9 = vadd.f32 %v4206_v60, %v4166_v47  ;;  %v4215_v17 = vadd.f32 %v4207_v63, %v4167_v21 }
 0x22a   :  { %v4216_v2 = vadd.f32 %v4208_v0, %v4168_v16  ;;  %v4217_v30 = vadd.f32 %v4209_v20, %v4169_v5  ;;  %v4218_v28 = vadd.f32 %v4210_v3, %v4170_v43  ;;  %v4219_v12 = vadd.f32 %v4211_v27, %v4171_v18 }
 0x22b   :  { %v4220_v8 = vadd.f32 %v4212_v58, %v4172_v29  ;;  %v4221_v49 = vadd.f32 %v4213_v61, %v4173_v6  ;;  %v4225_v55 = vrot.slane %v6854_v54, %v4779_v31  ;;  %v4229_v56 = vrot.slane %v6856_v33, %v4779_v31 }
 0x22c   :  { %v4233_v51 = vrot.slane %v6858_v11, %v4779_v31  ;;  %v4237_v41 = vrot.slane %v6860_v39, %v4779_v31  ;;  %v4241_v46 = vrot.slane %v6862_v25, %v4779_v31  ;;  %v4245_v1 = vrot.slane %v6864_v38, %v4779_v31 }
 0x22d   :  { %v4249_v37 = vrot.slane %v6866_v52, %v4779_v31  ;;  %v4253_v23 = vrot.slane %v6868_v42, %v4779_v31  ;;  %v4254_v40 = vmul.f32 %v4225_v55, %v6862_v25  ;;  %v4255_v10 = vmul.f32 %v4229_v56, %v6862_v25 }
 0x22e   :  { %v4256_v19 = vmul.f32 %v4233_v51, %v6862_v25  ;;  %v4257_v50 = vmul.f32 %v4237_v41, %v6862_v25  ;;  %v4258_v4 = vmul.f32 %v4241_v46, %v6862_v25  ;;  %v4259_v26 = vmul.f32 %v4245_v1, %v6862_v25 }
 0x22f   :  { %v4260_v48 = vmul.f32 %v4249_v37, %v6862_v25  ;;  %v4261_v53 = vmul.f32 %v4253_v23, %v6862_v25  ;;  %v4262_v22 = vadd.f32 %v4254_v40, %v4214_v9  ;;  %v4263_v44 = vadd.f32 %v4255_v10, %v4215_v17 }
 0x230   :  { %v4264_v14 = vadd.f32 %v4256_v19, %v4216_v2  ;;  %v4265_v31 = vadd.f32 %v4257_v50, %v4217_v30  ;;  %v4266_v45 = vadd.f32 %v4258_v4, %v4218_v28  ;;  %v4267_v47 = vadd.f32 %v4259_v26, %v4219_v12 }
 0x231   :  { %v4268_v21 = vadd.f32 %v4260_v48, %v4220_v8  ;;  %v4269_v16 = vadd.f32 %v4261_v53, %v4221_v49  ;;  %v4273_v5 = vrot.slane %v6854_v54, %v4782_v32  ;;  %v4277_v43 = vrot.slane %v6856_v33, %v4782_v32 }
 0x232   :  { %v4281_v18 = vrot.slane %v6858_v11, %v4782_v32  ;;  %v4285_v29 = vrot.slane %v6860_v39, %v4782_v32  ;;  %v4289_v6 = vrot.slane %v6862_v25, %v4782_v32  ;;  %v4293_v36 = vrot.slane %v6864_v38, %v4782_v32 }
 0x233   :  { %v4297_v15 = vrot.slane %v6866_v52, %v4782_v32  ;;  %v4301_v62 = vrot.slane %v6868_v42, %v4782_v32  ;;  %v4302_v7 = vmul.f32 %v4273_v5, %v6864_v38  ;;  %v4303_v24 = vmul.f32 %v4277_v43, %v6864_v38 }
 0x234   :  { %v4304_v13 = vmul.f32 %v4281_v18, %v6864_v38  ;;  %v4305_v57 = vmul.f32 %v4285_v29, %v6864_v38  ;;  %v4306_v59 = vmul.f32 %v4289_v6, %v6864_v38  ;;  %v4307_v60 = vmul.f32 %v4293_v36, %v6864_v38 }
 0x235   :  { %v4308_v63 = vmul.f32 %v4297_v15, %v6864_v38  ;;  %v4309_v0 = vmul.f32 %v4301_v62, %v6864_v38  ;;  %v4310_v20 = vadd.f32 %v4302_v7, %v4262_v22  ;;  %v4311_v3 = vadd.f32 %v4303_v24, %v4263_v44 }
 0x236   :  { %v4312_v27 = vadd.f32 %v4304_v13, %v4264_v14  ;;  %v4313_v32 = vadd.f32 %v4305_v57, %v4265_v31  ;;  %v4314_v58 = vadd.f32 %v4306_v59, %v4266_v45  ;;  %v4315_v61 = vadd.f32 %v4307_v60, %v4267_v47 }
 0x237   :  { %v4316_v9 = vadd.f32 %v4308_v63, %v4268_v21  ;;  %v4317_v17 = vadd.f32 %v4309_v0, %v4269_v16  ;;  %v4321_v2 = vrot.slane %v6854_v54, %v4785_v34  ;;  %v4325_v30 = vrot.slane %v6856_v33, %v4785_v34 }
 0x238   :  { %v4329_v28 = vrot.slane %v6858_v11, %v4785_v34  ;;  %v4333_v12 = vrot.slane %v6860_v39, %v4785_v34  ;;  %v4337_v8 = vrot.slane %v6862_v25, %v4785_v34  ;;  %v4341_v49 = vrot.slane %v6864_v38, %v4785_v34 }
 0x239   :  { %v4345_v55 = vrot.slane %v6866_v52, %v4785_v34  ;;  %v4349_v56 = vrot.slane %v6868_v42, %v4785_v34  ;;  %v4350_v51 = vmul.f32 %v4321_v2, %v6866_v52  ;;  %v4351_v41 = vmul.f32 %v4325_v30, %v6866_v52 }
 0x23a   :  { %v4352_v46 = vmul.f32 %v4329_v28, %v6866_v52  ;;  %v4353_v1 = vmul.f32 %v4333_v12, %v6866_v52  ;;  %v4354_v37 = vmul.f32 %v4337_v8, %v6866_v52  ;;  %v4355_v23 = vmul.f32 %v4341_v49, %v6866_v52 }
 0x23b   :  { %v4356_v40 = vmul.f32 %v4345_v55, %v6866_v52  ;;  %v4357_v10 = vmul.f32 %v4349_v56, %v6866_v52  ;;  %v4358_v19 = vadd.f32 %v4350_v51, %v4310_v20  ;;  %v4359_v50 = vadd.f32 %v4351_v41, %v4311_v3 }
 0x23c   :  { %v4360_v4 = vadd.f32 %v4352_v46, %v4312_v27  ;;  %v4361_v34 = vadd.f32 %v4353_v1, %v4313_v32  ;;  %v4362_v26 = vadd.f32 %v4354_v37, %v4314_v58  ;;  %v4363_v48 = vadd.f32 %v4355_v23, %v4315_v61 }
 0x23d   :  { %v4364_v53 = vadd.f32 %v4356_v40, %v4316_v9  ;;  %v4365_v22 = vadd.f32 %v4357_v10, %v4317_v17  ;;  %v4369_v44 = vrot.slane %v6854_v54, %v4788_v35  ;;  %v4373_v14 = vrot.slane %v6856_v33, %v4788_v35 }
 0x23e   :  { %v4377_v31 = vrot.slane %v6858_v11, %v4788_v35  ;;  %v4381_v45 = vrot.slane %v6860_v39, %v4788_v35  ;;  %v4385_v47 = vrot.slane %v6862_v25, %v4788_v35  ;;  %v4389_v21 = vrot.slane %v6864_v38, %v4788_v35 }
 0x23f   :  { %v4393_v16 = vrot.slane %v6866_v52, %v4788_v35  ;;  %v4397_v54 = vrot.slane %v6868_v42, %v4788_v35  ;;  %v4398_v33 = vmul.f32 %v4369_v44, %v6868_v42  ;;  %v4399_v5 = vmul.f32 %v4373_v14, %v6868_v42 }
 0x240   :  { %v4400_v11 = vmul.f32 %v4377_v31, %v6868_v42  ;;  %v4401_v39 = vmul.f32 %v4381_v45, %v6868_v42  ;;  %v4402_v43 = vmul.f32 %v4385_v47, %v6868_v42  ;;  %v4403_v25 = vmul.f32 %v4389_v21, %v6868_v42 }
 0x241   :  { %v4404_v38 = vmul.f32 %v4393_v16, %v6868_v42  ;;  %v4405_v52 = vmul.f32 %v4397_v54, %v6868_v42  ;;  %v4406_v18 = vadd.f32 %v4398_v33, %v4358_v19  ;;  %v4407_v35 = vadd.f32 %v4399_v5, %v4359_v50 }
 0x242   :  { %v4408_v29 = vadd.f32 %v4400_v11, %v4360_v4  ;;  %v4409_v6 = vadd.f32 %v4401_v39, %v4361_v34  ;;  %v4410_v36 = vadd.f32 %v4402_v43, %v4362_v26  ;;  %v4411_v15 = vadd.f32 %v4403_v25, %v4363_v48 }
 0x243   :  { %v4412_v62 = vadd.f32 %v4404_v38, %v4364_v53  ;;  %v4413_v7 = vadd.f32 %v4405_v52, %v4365_v22  ;;  %4414 = vst [vmem:[#allocation5] sm:$0xff] %v4406_v18  ;;  %4415 = vst [vmem:[#allocation5 + $0x8] sm:$0xff] %v4407_v35 }
 0x244   :  { %4416 = vst [vmem:[#allocation5 + $0x10] sm:$0xff] %v4408_v29  ;;  %4417 = vst [vmem:[#allocation5 + $0x18] sm:$0xff] %v4409_v6 }
 0x245   :  { %4418 = vst [vmem:[#allocation5 + $0x20] sm:$0xff] %v4410_v36  ;;  %4419 = vst [vmem:[#allocation5 + $0x28] sm:$0xff] %v4411_v15 }
 0x246   :  { %4420 = vst [vmem:[#allocation5 + $0x30] sm:$0xff] %v4412_v62  ;;  %4421 = vst [vmem:[#allocation5 + $0x38] sm:$0xff] %v4413_v7 }
 0x247   :  { %4485 = shalt.err (!%p4482_p12)
}
 0x248   :  { %s4486_s24 = scalar_lea.hbm %s7078_s1, 1024 }
 0x249   :  { %p4487_p13 = scmp.ne.s32.totalorder %s7078_s1, %s4486_s24  ;;  %p4490_p0 = scmp.lt.u32.totalorder %s4486_s24, %s7078_s1 }
 0x24b   :  { %p4492_p1 = pnand %p4490_p0, %p4487_p13 }
 0x24d   :  { %4495 = shalt.err (!%p4492_p1)
}
 0x24e   :  { %4433 = dma.vmem_to_hbm [thread:$0]  %s4428_s20, 1024, %s7078_s1, [#allocation4], %s4501_s16, %s4501_s16, %s4502_s17  }
 0x24f   :  { %4498 = dma.done.wait [#allocation4], 1024  }
 0x250   :  { %4499 = vsyncadd [#allocation4], 4294966272 }
 0x251   :  { %4437 = vsyncpa [#allocation3], 1 }
 0x252   :  { %4438 = vsyncpa [#allocation4], 1 }

</bundles_post_ra>
